<compile_context>
chip_gen: v6e
topology: v6e:2x2x1
jax: 0.10.0
libtpu: 0.0.40
codegen_flags: <defaults>
</compile_context>

<pallas_src>
import math
import jax
import jax.numpy as jnp
from jax.experimental import pallas as pl
from jax.experimental.pallas import tpu as pltpu

# --- model dimensions (consistent with the module) ---
S = 8            # sequence length
F = 6            # input_dim
FP = 8           # feature dim zero-padded to 8 for a clean matmul K-dim
D = 32           # d_model
NH = 2           # nhead
DH = D // NH     # per-head dim = 16
DHID = 128       # d_hid (feed-forward width)
NL = 2           # nlayers
LN_EPS = 1e-5

# --- batching: SPB sequences per grid step -> M_BLK rows per matmul slab ---
SPB = 16
M_BLK = SPB * S          # 128 rows per block
MASK_VAL = -1e30         # block-diag attention mask value (exp -> exactly 0)

# gmat row offsets (global matrices, 128 lanes)
GM_PROJ = 0              # input proj weight (F, D)           rows 0:8  (6 live)
GM_OUTP = FP             # outp weight (D, D)                 rows 8:40
GM_REG = FP + D          # regressor matrix (D, 128), col 0   rows 40:72
GM_ROWS = FP + 2 * D     # 72

# lmat row offsets (per-layer matrices, 128 lanes, dense row blocks)
LM_IN = 0                # in_proj weight (D, 3D)   cols 0:96
LM_FF1 = D               # linear1 weight (D, DHID) cols 0:128
LM_FF2 = 2 * D           # linear2 weight stored TRANSPOSED (D, DHID)
LM_OUT = 3 * D           # out_proj weight (D, D)   cols 0:32
LM_ROWS = 4 * D          # 128

# TODO(synk): dropout / MSELoss / Adam optimizer are training-only; forward here is eval-mode.


def _layer_norm(v, w, b):
    # one-pass stats: mean and E[x^2] are independent XLU reductions (they overlap)
    mu = jnp.mean(v, axis=-1, keepdims=True)
    ex2 = jnp.mean(v * v, axis=-1, keepdims=True)
    var = ex2 - mu * mu
    return (v - mu) * jax.lax.rsqrt(var + LN_EPS) * w + b


def residual_model_kernel(x_ref, msk_ref, pool_ref, gmat_ref, lmat_ref,
                          gvec_ref, lvec_ref, o_ref):
    inv_sqrt_dh = 1.0 / math.sqrt(DH)
    blk_mask = msk_ref[...]                              # (M_BLK, M_BLK): 0 / -1e30

    # ---- input projection on the whole (M_BLK, FP) slab ----
    x = x_ref[...]                                       # (M_BLK, FP), zero-padded cols
    h = jnp.dot(x, gmat_ref[GM_PROJ:GM_PROJ + FP, 0:D],
                preferred_element_type=jnp.float32) + gvec_ref[0:1, 0:D]

    # ---- NL post-LN transformer encoder layers ----
    for l in range(NL):                                  # static unroll, NL = 2
        # fused Q/K/V projection against the full 128-lane weight rows (tail lanes = 0)
        qkv = jnp.dot(h, lmat_ref[l, LM_IN:LM_IN + D, :],
                      preferred_element_type=jnp.float32) + lvec_ref[l, 0:1, :]
        q = qkv[:, 0:D]
        k = qkv[:, D:2 * D]
        v = qkv[:, 2 * D:3 * D]

        # per-head attention; head separation via 0/1 lane masks so each head's context
        # lands lane-concatenated in a single (M_BLK, D) tensor (one out-proj matmul).
        ctx = jnp.zeros((M_BLK, D), jnp.float32)
        for hd in range(NH):                             # static unroll, NH = 2
            hm = gvec_ref[5 + hd:6 + hd, 0:D]            # (1, D) lane mask for this head
            s = jnp.einsum('qd,kd->qk', q * hm, k * hm,
                           preferred_element_type=jnp.float32) * inv_sqrt_dh
            s = s + blk_mask                             # block-diag over sequences
            e = jnp.exp(s)                               # masked entries underflow to 0
            p = e / jnp.sum(e, axis=-1, keepdims=True)   # exact normalization
            ctx = ctx + jnp.dot(p, v * hm, preferred_element_type=jnp.float32)
        attn = jnp.dot(ctx, lmat_ref[l, LM_OUT:LM_OUT + D, 0:D],
                       preferred_element_type=jnp.float32) + lvec_ref[l, 1:2, 0:D]

        h = _layer_norm(h + attn, lvec_ref[l, 2:3, 0:D], lvec_ref[l, 3:4, 0:D])

        # feed-forward (ReLU); ff2 is stored transposed -> contract on its minor dim
        ff = jnp.dot(h, lmat_ref[l, LM_FF1:LM_FF1 + D, :],
                     preferred_element_type=jnp.float32) + lvec_ref[l, 6:7, :]
        ff = jnp.maximum(ff, 0.0)
        ff = jnp.einsum('mf,df->md', ff, lmat_ref[l, LM_FF2:LM_FF2 + D, :],
                        preferred_element_type=jnp.float32) + lvec_ref[l, 7:8, 0:D]

        h = _layer_norm(h + ff, lvec_ref[l, 4:5, 0:D], lvec_ref[l, 5:6, 0:D])

    # ---- mean pool over sequence (via matmul), outp, final LayerNorm ----
    pooled = jnp.dot(pool_ref[...], h, preferred_element_type=jnp.float32)  # (SPB, D)
    h2 = jnp.dot(pooled, gmat_ref[GM_OUTP:GM_OUTP + D, 0:D],
                 preferred_element_type=jnp.float32) + gvec_ref[1:2, 0:D]
    z = _layer_norm(h2, gvec_ref[2:3, 0:D], gvec_ref[3:4, 0:D])

    # ---- regressor (pre-folded with y_std / y_mean); lane-dense (SPB, 128) store ----
    o_ref[...] = jnp.dot(z, gmat_ref[GM_REG:GM_REG + D, :],
                         preferred_element_type=jnp.float32) + gvec_ref[4:5, :]


def _build_constants():
    """Host-built block-diagonal attention mask and mean-pooling matrix."""
    row_seq = jnp.arange(M_BLK, dtype=jnp.int32)[:, None] // S
    col_seq = jnp.arange(M_BLK, dtype=jnp.int32)[None, :] // S
    blk_mask = jnp.where(row_seq == col_seq, 0.0, MASK_VAL).astype(jnp.float32)
    pr = jnp.arange(SPB, dtype=jnp.int32)[:, None]
    pool_mat = jnp.where(pr == col_seq, 1.0 / S, 0.0).astype(jnp.float32)   # (SPB, M_BLK)
    return blk_mask, pool_mat


def pack_params(params):
    """Pack the 22 natural parameter arrays into 4 VMEM-friendly slabs."""
    (proj_wt, proj_b, in_wt, in_b, out_wt, out_b,
     ln1_w, ln1_b, ln2_w, ln2_b, ff1_wt, ff1_b, ff2_wt, ff2_b,
     outp_wt, outp_b, fn_w, fn_b, reg_wt, reg_b, y_std, y_mean) = params

    # global matrices: (72, 128)
    gmat = jnp.zeros((GM_ROWS, 128), jnp.float32)
    gmat = gmat.at[GM_PROJ:GM_PROJ + F, 0:D].set(proj_wt)
    gmat = gmat.at[GM_OUTP:GM_OUTP + D, 0:D].set(outp_wt)
    gmat = gmat.at[GM_REG:GM_REG + D, 0].set(reg_wt[:, 0] * y_std[0, 0])

    # per-layer matrices: (NL, 128, 128), all row blocks lane-dense
    lmat = jnp.zeros((NL, LM_ROWS, 128), jnp.float32)
    lmat = lmat.at[:, LM_IN:LM_IN + D, 0:3 * D].set(in_wt)
    lmat = lmat.at[:, LM_FF1:LM_FF1 + D, 0:DHID].set(ff1_wt)
    lmat = lmat.at[:, LM_FF2:LM_FF2 + D, 0:DHID].set(jnp.swapaxes(ff2_wt, 1, 2))
    lmat = lmat.at[:, LM_OUT:LM_OUT + D, 0:D].set(out_wt)

    # global vectors: one (8, 128) tile (rows 5/6 are the per-head lane masks)
    gvec = jnp.zeros((8, 128), jnp.float32)
    gvec = gvec.at[0, 0:D].set(proj_b[0])
    gvec = gvec.at[1, 0:D].set(outp_b[0])
    gvec = gvec.at[2, 0:D].set(fn_w[0])
    gvec = gvec.at[3, 0:D].set(fn_b[0])
    gvec = gvec.at[4, 0].set(reg_b[0, 0] * y_std[0, 0] + y_mean[0, 0])
    gvec = gvec.at[5, 0:DH].set(1.0)           # head-0 lane mask
    gvec = gvec.at[6, DH:D].set(1.0)           # head-1 lane mask

    # per-layer vectors: one (8, 128) tile per layer
    lvec = jnp.zeros((NL, 8, 128), jnp.float32)
    lvec = lvec.at[:, 0, 0:3 * D].set(in_b[:, 0, :])
    lvec = lvec.at[:, 1, 0:D].set(out_b[:, 0, :])
    lvec = lvec.at[:, 2, 0:D].set(ln1_w[:, 0, :])
    lvec = lvec.at[:, 3, 0:D].set(ln1_b[:, 0, :])
    lvec = lvec.at[:, 4, 0:D].set(ln2_w[:, 0, :])
    lvec = lvec.at[:, 5, 0:D].set(ln2_b[:, 0, :])
    lvec = lvec.at[:, 6, 0:DHID].set(ff1_b[:, 0, :])
    lvec = lvec.at[:, 7, 0:D].set(ff2_b[:, 0, :])
    return gmat, lmat, gvec, lvec


def residual_model_forward(x, params):
    """x: (batch, S, F) -> (batch, 1); batch is folded into sublanes + a parallel grid."""
    nb = x.shape[0]
    assert x.shape[1] == S and x.shape[2] == F
    gmat, lmat, gvec, lvec = pack_params(params)
    blk_mask, pool_mat = _build_constants()

    nblk = max(1, (nb + SPB - 1) // SPB)
    xr = x.reshape(nb * S, F).astype(jnp.float32)
    xr = jnp.pad(xr, ((0, nblk * M_BLK - nb * S), (0, FP - F)))

    const2 = lambda i: (0, 0)
    const3 = lambda i: (0, 0, 0)
    out = pl.pallas_call(
        residual_model_kernel,
        out_shape=jax.ShapeDtypeStruct((nblk * SPB, 128), jnp.float32),
        grid=(nblk,),
        in_specs=[
            pl.BlockSpec((M_BLK, FP), lambda i: (i, 0)),     # x slab (pipelined)
            pl.BlockSpec((M_BLK, M_BLK), const2),            # block-diag mask (resident)
            pl.BlockSpec((SPB, M_BLK), const2),              # pooling matrix (resident)
            pl.BlockSpec((GM_ROWS, 128), const2),            # global matrices (resident)
            pl.BlockSpec((NL, LM_ROWS, 128), const3),        # per-layer matrices (resident)
            pl.BlockSpec((8, 128), const2),                  # global vectors (resident)
            pl.BlockSpec((NL, 8, 128), const3),              # per-layer vectors (resident)
        ],
        out_specs=pl.BlockSpec((SPB, 128), lambda i: (i, 0)),
        compiler_params=pltpu.CompilerParams(
            dimension_semantics=("parallel",)),              # megacore sharding on v7x
    )(xr, blk_mask, pool_mat, gmat, lmat, gvec, lvec)
    return out[:nb, 0:1]


def make_params(key):
    keys = iter(jax.random.split(key, 32))

    def rnd(shape, scale=0.1):
        return (scale * jax.random.normal(next(keys), shape)).astype(jnp.float32)

    ones = lambda shape: jnp.ones(shape, jnp.float32)
    zeros = lambda shape: jnp.zeros(shape, jnp.float32)

    proj_wt = rnd((F, D))            # Linear(6, 32), stored (in, out)
    proj_b = rnd((1, D))
    in_wt = rnd((NL, D, 3 * D))      # MHA in_proj, stored (in, out) per layer
    in_b = rnd((NL, 1, 3 * D))
    out_wt = rnd((NL, D, D))         # MHA out_proj, stored (in, out)
    out_b = rnd((NL, 1, D))
    ln1_w = ones((NL, 1, D))
    ln1_b = zeros((NL, 1, D))
    ln2_w = ones((NL, 1, D))
    ln2_b = zeros((NL, 1, D))
    ff1_wt = rnd((NL, D, DHID))      # Linear(32, 128)
    ff1_b = rnd((NL, 1, DHID))
    ff2_wt = rnd((NL, DHID, D))      # Linear(128, 32)
    ff2_b = rnd((NL, 1, D))
    outp_wt = rnd((D, D))            # outp Linear(32, 32)
    outp_b = rnd((1, D))
    fn_w = ones((1, D))              # final_norm
    fn_b = zeros((1, D))
    reg_wt = rnd((D, 1))             # regressor Linear(32, 1)
    reg_b = rnd((1, 1))
    y_std = jnp.full((1, 1), 2.0, jnp.float32)
    y_mean = jnp.full((1, 1), 0.5, jnp.float32)

    return (proj_wt, proj_b,
            in_wt, in_b, out_wt, out_b,
            ln1_w, ln1_b, ln2_w, ln2_b,
            ff1_wt, ff1_b, ff2_wt, ff2_b,
            outp_wt, outp_b, fn_w, fn_b,
            reg_wt, reg_b, y_std, y_mean)


def reference_forward(x, params):
    """Pure-JAX reference mirroring the PyTorch module (eval mode)."""
    (proj_wt, proj_b, in_wt, in_b, out_wt, out_b,
     ln1_w, ln1_b, ln2_w, ln2_b, ff1_wt, ff1_b, ff2_wt, ff2_b,
     outp_wt, outp_b, fn_w, fn_b, reg_wt, reg_b, y_std, y_mean) = params

    def ln(v, w, b):
        mu = v.mean(-1, keepdims=True)
        var = ((v - mu) ** 2).mean(-1, keepdims=True)
        return (v - mu) / jnp.sqrt(var + LN_EPS) * w + b

    h = x @ proj_wt + proj_b                              # (batch, S, D)
    for l in range(NL):
        qkv = h @ in_wt[l] + in_b[l]                      # (batch, S, 3D)
        heads = []
        for hd in range(NH):
            q = qkv[..., hd * DH:(hd + 1) * DH]
            k = qkv[..., D + hd * DH:D + (hd + 1) * DH]
            v = qkv[..., 2 * D + hd * DH:2 * D + (hd + 1) * DH]
            s = jnp.einsum('bqd,bkd->bqk', q, k) / math.sqrt(DH)
            p = jax.nn.softmax(s, axis=-1)
            heads.append(jnp.einsum('bqk,bkd->bqd', p, v))
        attn = jnp.concatenate(heads, axis=-1) @ out_wt[l] + out_b[l]
        h = ln(h + attn, ln1_w[l], ln1_b[l])
        ff = jax.nn.relu(h @ ff1_wt[l] + ff1_b[l]) @ ff2_wt[l] + ff2_b[l]
        h = ln(h + ff, ln2_w[l], ln2_b[l])
    z = ln(h.mean(axis=1) @ outp_wt + outp_b, fn_w, fn_b)
    return (z @ reg_wt + reg_b) * y_std + y_mean


if __name__ == "__main__":
    root = jax.random.PRNGKey(0)
    params = make_params(root)

    BATCH = 64   # 4 grid steps of 16 sequences each (128-row matmul slabs per step)
    x = jax.random.normal(jax.random.fold_in(root, 123), (BATCH, S, F), dtype=jnp.float32)

    out = jax.block_until_ready(residual_model_forward(x, params))
    ref = reference_forward(x, params)

    assert out.shape == (BATCH, 1)
    assert bool(jnp.all(jnp.isfinite(out)))
    assert bool(jnp.allclose(out, ref, rtol=2e-3, atol=2e-3)), (out, ref)
    print("KERNEL_OK")
</pallas_src>

<mosaic_0001>
module attributes {stable_mosaic.version = 11 : i64} {
  func.func @residual_model_kernel(%arg0: i32, %arg1: memref<128x8xf32, #tpu.memory_space<vmem>>, %arg2: memref<128x128xf32, #tpu.memory_space<vmem>>, %arg3: memref<16x128xf32, #tpu.memory_space<vmem>>, %arg4: memref<72x128xf32, #tpu.memory_space<vmem>>, %arg5: memref<2x128x128xf32, #tpu.memory_space<vmem>>, %arg6: memref<8x128xf32, #tpu.memory_space<vmem>>, %arg7: memref<2x8x128xf32, #tpu.memory_space<vmem>>, %arg8: memref<16x128xf32, #tpu.memory_space<vmem>>) attributes {dimension_semantics = [#tpu.dimension_semantics<parallel>], iteration_bounds = array<i64: 4>, scalar_prefetch = 0 : i64, scratch_operands = 0 : i64, tpu.core_type = #tpu.core_type<tc>, window_params = [{transform_indices = @transform_0, window_bounds = array<i64: 128, 8>}, {pipeline_mode = #tpu.pipeline_mode<synchronous>, transform_indices = @transform_1, window_bounds = array<i64: 128, 128>}, {pipeline_mode = #tpu.pipeline_mode<synchronous>, transform_indices = @transform_2, window_bounds = array<i64: 16, 128>}, {pipeline_mode = #tpu.pipeline_mode<synchronous>, transform_indices = @transform_3, window_bounds = array<i64: 72, 128>}, {pipeline_mode = #tpu.pipeline_mode<synchronous>, transform_indices = @transform_4, window_bounds = array<i64: 2, 128, 128>}, {pipeline_mode = #tpu.pipeline_mode<synchronous>, transform_indices = @transform_5, window_bounds = array<i64: 8, 128>}, {pipeline_mode = #tpu.pipeline_mode<synchronous>, transform_indices = @transform_6, window_bounds = array<i64: 2, 8, 128>}, {transform_indices = @transform_7, window_bounds = array<i64: 16, 128>}]} {
    %c0 = arith.constant 0 : index
    %c0_0 = arith.constant 0 : index
    %0 = vector.load %arg2[%c0, %c0_0] : memref<128x128xf32, #tpu.memory_space<vmem>>, vector<128x128xf32>
    %c0_1 = arith.constant 0 : index
    %c0_2 = arith.constant 0 : index
    %1 = vector.load %arg1[%c0_1, %c0_2] : memref<128x8xf32, #tpu.memory_space<vmem>>, vector<128x8xf32>
    %c0_3 = arith.constant 0 : index
    %c0_4 = arith.constant 0 : index
    %2 = vector.load %arg4[%c0_3, %c0_4] : memref<72x128xf32, #tpu.memory_space<vmem>>, vector<8x32xf32>
    %cst = arith.constant dense<0.000000e+00> : vector<128x32xf32>
    %3 = tpu.matmul %1, %2, %cst {dimension_numbers = #tpu.dot_dimension_numbers<[1], [0], [0], [1], [0, 0, 1, 1], [], []>} : vector<128x8xf32>, vector<8x32xf32>, vector<128x32xf32> -> vector<128x32xf32>
    %c0_5 = arith.constant 0 : index
    %c0_6 = arith.constant 0 : index
    %4 = vector.load %arg6[%c0_5, %c0_6] : memref<8x128xf32, #tpu.memory_space<vmem>>, vector<1x32xf32>
    %5 = vector.broadcast %4 : vector<1x32xf32> to vector<128x32xf32>
    %6 = arith.addf %3, %5 : vector<128x32xf32>
    %c0_7 = arith.constant 0 : index
    %c0_8 = arith.constant 0 : index
    %c0_9 = arith.constant 0 : index
    %7 = vector.load %arg5[%c0_7, %c0_8, %c0_9] : memref<2x128x128xf32, #tpu.memory_space<vmem>>, vector<1x32x128xf32>
    %8 = vector.shape_cast %7 : vector<1x32x128xf32> to vector<32x128xf32>
    %cst_10 = arith.constant dense<0.000000e+00> : vector<128x128xf32>
    %9 = tpu.matmul %6, %8, %cst_10 {dimension_numbers = #tpu.dot_dimension_numbers<[1], [0], [0], [1], [0, 0, 1, 1], [], []>} : vector<128x32xf32>, vector<32x128xf32>, vector<128x128xf32> -> vector<128x128xf32>
    %c0_11 = arith.constant 0 : index
    %c0_12 = arith.constant 0 : index
    %c0_13 = arith.constant 0 : index
    %10 = vector.load %arg7[%c0_11, %c0_12, %c0_13] : memref<2x8x128xf32, #tpu.memory_space<vmem>>, vector<1x1x128xf32>
    %11 = vector.shape_cast %10 : vector<1x1x128xf32> to vector<1x128xf32>
    %12 = vector.broadcast %11 : vector<1x128xf32> to vector<128x128xf32>
    %13 = arith.addf %9, %12 : vector<128x128xf32>
    %14 = vector.extract_strided_slice %13 {offsets = [0, 0], sizes = [128, 32], strides = [1, 1]} : vector<128x128xf32> to vector<128x32xf32>
    %15 = vector.extract_strided_slice %13 {offsets = [0, 32], sizes = [128, 32], strides = [1, 1]} : vector<128x128xf32> to vector<128x32xf32>
    %16 = vector.extract_strided_slice %13 {offsets = [0, 64], sizes = [128, 32], strides = [1, 1]} : vector<128x128xf32> to vector<128x32xf32>
    %cst_14 = arith.constant 0.000000e+00 : f32
    %17 = vector.broadcast %cst_14 : f32 to vector<128x32xf32>
    %c5 = arith.constant 5 : index
    %c0_15 = arith.constant 0 : index
    %18 = vector.load %arg6[%c5, %c0_15] : memref<8x128xf32, #tpu.memory_space<vmem>>, vector<1x32xf32>
    %19 = vector.broadcast %18 : vector<1x32xf32> to vector<128x32xf32>
    %20 = arith.mulf %14, %19 : vector<128x32xf32>
    %21 = vector.broadcast %18 : vector<1x32xf32> to vector<128x32xf32>
    %22 = arith.mulf %15, %21 : vector<128x32xf32>
    "tpu.trace_start"() <{level = 10 : i32, message = "qd,kd->qk"}> : () -> ()
    %cst_16 = arith.constant dense<0.000000e+00> : vector<128x128xf32>
    %23 = tpu.matmul %20, %22, %cst_16 {dimension_numbers = #tpu.dot_dimension_numbers<[1], [1], [0], [0], [0, 0, 1, 0], [], []>} : vector<128x32xf32>, vector<128x32xf32>, vector<128x128xf32> -> vector<128x128xf32>
    "tpu.trace_stop"() : () -> ()
    %cst_17 = arith.constant 2.500000e-01 : f32
    %24 = vector.broadcast %cst_17 : f32 to vector<128x128xf32>
    %25 = arith.mulf %23, %24 : vector<128x128xf32>
    %26 = arith.addf %25, %0 : vector<128x128xf32>
    %27 = math.exp %26 : vector<128x128xf32>
    %cst_18 = arith.constant dense<0.000000e+00> : vector<128xf32>
    %28 = vector.multi_reduction <add>, %27, %cst_18 [1] : vector<128x128xf32> to vector<128xf32>
    %29 = vector.shape_cast %28 : vector<128xf32> to vector<128x1xf32>
    %30 = vector.broadcast %29 : vector<128x1xf32> to vector<128x128xf32>
    %31 = arith.divf %27, %30 : vector<128x128xf32>
    %32 = vector.broadcast %18 : vector<1x32xf32> to vector<128x32xf32>
    %33 = arith.mulf %16, %32 : vector<128x32xf32>
    %cst_19 = arith.constant dense<0.000000e+00> : vector<128x32xf32>
    %34 = tpu.matmul %31, %33, %cst_19 {dimension_numbers = #tpu.dot_dimension_numbers<[1], [0], [0], [1], [0, 0, 1, 1], [], []>} : vector<128x128xf32>, vector<128x32xf32>, vector<128x32xf32> -> vector<128x32xf32>
    %35 = arith.addf %17, %34 : vector<128x32xf32>
    %c6 = arith.constant 6 : index
    %c0_20 = arith.constant 0 : index
    %36 = vector.load %arg6[%c6, %c0_20] : memref<8x128xf32, #tpu.memory_space<vmem>>, vector<1x32xf32>
    %37 = vector.broadcast %36 : vector<1x32xf32> to vector<128x32xf32>
    %38 = arith.mulf %14, %37 : vector<128x32xf32>
    %39 = vector.broadcast %36 : vector<1x32xf32> to vector<128x32xf32>
    %40 = arith.mulf %15, %39 : vector<128x32xf32>
    "tpu.trace_start"() <{level = 10 : i32, message = "qd,kd->qk"}> : () -> ()
    %cst_21 = arith.constant dense<0.000000e+00> : vector<128x128xf32>
    %41 = tpu.matmul %38, %40, %cst_21 {dimension_numbers = #tpu.dot_dimension_numbers<[1], [1], [0], [0], [0, 0, 1, 0], [], []>} : vector<128x32xf32>, vector<128x32xf32>, vector<128x128xf32> -> vector<128x128xf32>
    "tpu.trace_stop"() : () -> ()
    %cst_22 = arith.constant 2.500000e-01 : f32
    %42 = vector.broadcast %cst_22 : f32 to vector<128x128xf32>
    %43 = arith.mulf %41, %42 : vector<128x128xf32>
    %44 = arith.addf %43, %0 : vector<128x128xf32>
    %45 = math.exp %44 : vector<128x128xf32>
    %cst_23 = arith.constant dense<0.000000e+00> : vector<128xf32>
    %46 = vector.multi_reduction <add>, %45, %cst_23 [1] : vector<128x128xf32> to vector<128xf32>
    %47 = vector.shape_cast %46 : vector<128xf32> to vector<128x1xf32>
    %48 = vector.broadcast %47 : vector<128x1xf32> to vector<128x128xf32>
    %49 = arith.divf %45, %48 : vector<128x128xf32>
    %50 = vector.broadcast %36 : vector<1x32xf32> to vector<128x32xf32>
    %51 = arith.mulf %16, %50 : vector<128x32xf32>
    %cst_24 = arith.constant dense<0.000000e+00> : vector<128x32xf32>
    %52 = tpu.matmul %49, %51, %cst_24 {dimension_numbers = #tpu.dot_dimension_numbers<[1], [0], [0], [1], [0, 0, 1, 1], [], []>} : vector<128x128xf32>, vector<128x32xf32>, vector<128x32xf32> -> vector<128x32xf32>
    %53 = arith.addf %35, %52 : vector<128x32xf32>
    %c0_25 = arith.constant 0 : index
    %c96 = arith.constant 96 : index
    %c0_26 = arith.constant 0 : index
    %54 = vector.load %arg5[%c0_25, %c96, %c0_26] : memref<2x128x128xf32, #tpu.memory_space<vmem>>, vector<1x32x32xf32>
    %55 = vector.shape_cast %54 : vector<1x32x32xf32> to vector<32x32xf32>
    %cst_27 = arith.constant dense<0.000000e+00> : vector<128x32xf32>
    %56 = tpu.matmul %53, %55, %cst_27 {dimension_numbers = #tpu.dot_dimension_numbers<[1], [0], [0], [1], [0, 0, 1, 1], [], []>} : vector<128x32xf32>, vector<32x32xf32>, vector<128x32xf32> -> vector<128x32xf32>
    %c0_28 = arith.constant 0 : index
    %c1 = arith.constant 1 : index
    %c0_29 = arith.constant 0 : index
    %57 = vector.load %arg7[%c0_28, %c1, %c0_29] : memref<2x8x128xf32, #tpu.memory_space<vmem>>, vector<1x1x32xf32>
    %58 = vector.shape_cast %57 : vector<1x1x32xf32> to vector<1x32xf32>
    %59 = vector.broadcast %58 : vector<1x32xf32> to vector<128x32xf32>
    %60 = arith.addf %56, %59 : vector<128x32xf32>
    %61 = arith.addf %6, %60 : vector<128x32xf32>
    %c0_30 = arith.constant 0 : index
    %c2 = arith.constant 2 : index
    %c0_31 = arith.constant 0 : index
    %62 = vector.load %arg7[%c0_30, %c2, %c0_31] : memref<2x8x128xf32, #tpu.memory_space<vmem>>, vector<1x1x32xf32>
    %63 = vector.shape_cast %62 : vector<1x1x32xf32> to vector<1x32xf32>
    %c0_32 = arith.constant 0 : index
    %c3 = arith.constant 3 : index
    %c0_33 = arith.constant 0 : index
    %64 = vector.load %arg7[%c0_32, %c3, %c0_33] : memref<2x8x128xf32, #tpu.memory_space<vmem>>, vector<1x1x32xf32>
    %65 = vector.shape_cast %64 : vector<1x1x32xf32> to vector<1x32xf32>
    %cst_34 = arith.constant dense<0.000000e+00> : vector<128xf32>
    %66 = vector.multi_reduction <add>, %61, %cst_34 [1] : vector<128x32xf32> to vector<128xf32>
    %67 = vector.shape_cast %66 : vector<128xf32> to vector<128x1xf32>
    %cst_35 = arith.constant 3.200000e+01 : f32
    %68 = vector.broadcast %cst_35 : f32 to vector<128x1xf32>
    %69 = arith.divf %67, %68 : vector<128x1xf32>
    %70 = arith.mulf %61, %61 : vector<128x32xf32>
    %cst_36 = arith.constant dense<0.000000e+00> : vector<128xf32>
    %71 = vector.multi_reduction <add>, %70, %cst_36 [1] : vector<128x32xf32> to vector<128xf32>
    %72 = vector.shape_cast %71 : vector<128xf32> to vector<128x1xf32>
    %cst_37 = arith.constant 3.200000e+01 : f32
    %73 = vector.broadcast %cst_37 : f32 to vector<128x1xf32>
    %74 = arith.divf %72, %73 : vector<128x1xf32>
    %75 = arith.mulf %69, %69 : vector<128x1xf32>
    %76 = arith.subf %74, %75 : vector<128x1xf32>
    %77 = vector.broadcast %69 : vector<128x1xf32> to vector<128x32xf32>
    %78 = arith.subf %61, %77 : vector<128x32xf32>
    %cst_38 = arith.constant 9.99999974E-6 : f32
    %79 = vector.broadcast %cst_38 : f32 to vector<128x1xf32>
    %80 = arith.addf %76, %79 : vector<128x1xf32>
    %81 = math.rsqrt %80 : vector<128x1xf32>
    %82 = vector.broadcast %81 : vector<128x1xf32> to vector<128x32xf32>
    %83 = arith.mulf %78, %82 : vector<128x32xf32>
    %84 = vector.broadcast %63 : vector<1x32xf32> to vector<128x32xf32>
    %85 = arith.mulf %83, %84 : vector<128x32xf32>
    %86 = vector.broadcast %65 : vector<1x32xf32> to vector<128x32xf32>
    %87 = arith.addf %85, %86 : vector<128x32xf32>
    %c0_39 = arith.constant 0 : index
    %c32 = arith.constant 32 : index
    %c0_40 = arith.constant 0 : index
    %88 = vector.load %arg5[%c0_39, %c32, %c0_40] : memref<2x128x128xf32, #tpu.memory_space<vmem>>, vector<1x32x128xf32>
    %89 = vector.shape_cast %88 : vector<1x32x128xf32> to vector<32x128xf32>
    %cst_41 = arith.constant dense<0.000000e+00> : vector<128x128xf32>
    %90 = tpu.matmul %87, %89, %cst_41 {dimension_numbers = #tpu.dot_dimension_numbers<[1], [0], [0], [1], [0, 0, 1, 1], [], []>} : vector<128x32xf32>, vector<32x128xf32>, vector<128x128xf32> -> vector<128x128xf32>
    %c0_42 = arith.constant 0 : index
    %c6_43 = arith.constant 6 : index
    %c0_44 = arith.constant 0 : index
    %91 = vector.load %arg7[%c0_42, %c6_43, %c0_44] : memref<2x8x128xf32, #tpu.memory_space<vmem>>, vector<1x1x128xf32>
    %92 = vector.shape_cast %91 : vector<1x1x128xf32> to vector<1x128xf32>
    %93 = vector.broadcast %92 : vector<1x128xf32> to vector<128x128xf32>
    %94 = arith.addf %90, %93 : vector<128x128xf32>
    %cst_45 = arith.constant 0.000000e+00 : f32
    %95 = vector.broadcast %cst_45 : f32 to vector<128x128xf32>
    %96 = arith.maximumf %94, %95 : vector<128x128xf32>
    %c0_46 = arith.constant 0 : index
    %c64 = arith.constant 64 : index
    %c0_47 = arith.constant 0 : index
    %97 = vector.load %arg5[%c0_46, %c64, %c0_47] : memref<2x128x128xf32, #tpu.memory_space<vmem>>, vector<1x32x128xf32>
    %98 = vector.shape_cast %97 : vector<1x32x128xf32> to vector<32x128xf32>
    "tpu.trace_start"() <{level = 10 : i32, message = "mf,df->md"}> : () -> ()
    %cst_48 = arith.constant dense<0.000000e+00> : vector<128x32xf32>
    %99 = tpu.matmul %96, %98, %cst_48 {dimension_numbers = #tpu.dot_dimension_numbers<[1], [1], [0], [0], [0, 0, 1, 0], [], []>} : vector<128x128xf32>, vector<32x128xf32>, vector<128x32xf32> -> vector<128x32xf32>
    "tpu.trace_stop"() : () -> ()
    %c0_49 = arith.constant 0 : index
    %c7 = arith.constant 7 : index
    %c0_50 = arith.constant 0 : index
    %100 = vector.load %arg7[%c0_49, %c7, %c0_50] : memref<2x8x128xf32, #tpu.memory_space<vmem>>, vector<1x1x32xf32>
    %101 = vector.shape_cast %100 : vector<1x1x32xf32> to vector<1x32xf32>
    %102 = vector.broadcast %101 : vector<1x32xf32> to vector<128x32xf32>
    %103 = arith.addf %99, %102 : vector<128x32xf32>
    %104 = arith.addf %87, %103 : vector<128x32xf32>
    %c0_51 = arith.constant 0 : index
    %c4 = arith.constant 4 : index
    %c0_52 = arith.constant 0 : index
    %105 = vector.load %arg7[%c0_51, %c4, %c0_52] : memref<2x8x128xf32, #tpu.memory_space<vmem>>, vector<1x1x32xf32>
    %106 = vector.shape_cast %105 : vector<1x1x32xf32> to vector<1x32xf32>
    %c0_53 = arith.constant 0 : index
    %c5_54 = arith.constant 5 : index
    %c0_55 = arith.constant 0 : index
    %107 = vector.load %arg7[%c0_53, %c5_54, %c0_55] : memref<2x8x128xf32, #tpu.memory_space<vmem>>, vector<1x1x32xf32>
    %108 = vector.shape_cast %107 : vector<1x1x32xf32> to vector<1x32xf32>
    %cst_56 = arith.constant dense<0.000000e+00> : vector<128xf32>
    %109 = vector.multi_reduction <add>, %104, %cst_56 [1] : vector<128x32xf32> to vector<128xf32>
    %110 = vector.shape_cast %109 : vector<128xf32> to vector<128x1xf32>
    %cst_57 = arith.constant 3.200000e+01 : f32
    %111 = vector.broadcast %cst_57 : f32 to vector<128x1xf32>
    %112 = arith.divf %110, %111 : vector<128x1xf32>
    %113 = arith.mulf %104, %104 : vector<128x32xf32>
    %cst_58 = arith.constant dense<0.000000e+00> : vector<128xf32>
    %114 = vector.multi_reduction <add>, %113, %cst_58 [1] : vector<128x32xf32> to vector<128xf32>
    %115 = vector.shape_cast %114 : vector<128xf32> to vector<128x1xf32>
    %cst_59 = arith.constant 3.200000e+01 : f32
    %116 = vector.broadcast %cst_59 : f32 to vector<128x1xf32>
    %117 = arith.divf %115, %116 : vector<128x1xf32>
    %118 = arith.mulf %112, %112 : vector<128x1xf32>
    %119 = arith.subf %117, %118 : vector<128x1xf32>
    %120 = vector.broadcast %112 : vector<128x1xf32> to vector<128x32xf32>
    %121 = arith.subf %104, %120 : vector<128x32xf32>
    %cst_60 = arith.constant 9.99999974E-6 : f32
    %122 = vector.broadcast %cst_60 : f32 to vector<128x1xf32>
    %123 = arith.addf %119, %122 : vector<128x1xf32>
    %124 = math.rsqrt %123 : vector<128x1xf32>
    %125 = vector.broadcast %124 : vector<128x1xf32> to vector<128x32xf32>
    %126 = arith.mulf %121, %125 : vector<128x32xf32>
    %127 = vector.broadcast %106 : vector<1x32xf32> to vector<128x32xf32>
    %128 = arith.mulf %126, %127 : vector<128x32xf32>
    %129 = vector.broadcast %108 : vector<1x32xf32> to vector<128x32xf32>
    %130 = arith.addf %128, %129 : vector<128x32xf32>
    %c1_61 = arith.constant 1 : index
    %c0_62 = arith.constant 0 : index
    %c0_63 = arith.constant 0 : index
    %131 = vector.load %arg5[%c1_61, %c0_62, %c0_63] : memref<2x128x128xf32, #tpu.memory_space<vmem>>, vector<1x32x128xf32>
    %132 = vector.shape_cast %131 : vector<1x32x128xf32> to vector<32x128xf32>
    %cst_64 = arith.constant dense<0.000000e+00> : vector<128x128xf32>
    %133 = tpu.matmul %130, %132, %cst_64 {dimension_numbers = #tpu.dot_dimension_numbers<[1], [0], [0], [1], [0, 0, 1, 1], [], []>} : vector<128x32xf32>, vector<32x128xf32>, vector<128x128xf32> -> vector<128x128xf32>
    %c1_65 = arith.constant 1 : index
    %c0_66 = arith.constant 0 : index
    %c0_67 = arith.constant 0 : index
    %134 = vector.load %arg7[%c1_65, %c0_66, %c0_67] : memref<2x8x128xf32, #tpu.memory_space<vmem>>, vector<1x1x128xf32>
    %135 = vector.shape_cast %134 : vector<1x1x128xf32> to vector<1x128xf32>
    %136 = vector.broadcast %135 : vector<1x128xf32> to vector<128x128xf32>
    %137 = arith.addf %133, %136 : vector<128x128xf32>
    %138 = vector.extract_strided_slice %137 {offsets = [0, 0], sizes = [128, 32], strides = [1, 1]} : vector<128x128xf32> to vector<128x32xf32>
    %139 = vector.extract_strided_slice %137 {offsets = [0, 32], sizes = [128, 32], strides = [1, 1]} : vector<128x128xf32> to vector<128x32xf32>
    %140 = vector.extract_strided_slice %137 {offsets = [0, 64], sizes = [128, 32], strides = [1, 1]} : vector<128x128xf32> to vector<128x32xf32>
    %cst_68 = arith.constant 0.000000e+00 : f32
    %141 = vector.broadcast %cst_68 : f32 to vector<128x32xf32>
    %c5_69 = arith.constant 5 : index
    %c0_70 = arith.constant 0 : index
    %142 = vector.load %arg6[%c5_69, %c0_70] : memref<8x128xf32, #tpu.memory_space<vmem>>, vector<1x32xf32>
    %143 = vector.broadcast %142 : vector<1x32xf32> to vector<128x32xf32>
    %144 = arith.mulf %138, %143 : vector<128x32xf32>
    %145 = vector.broadcast %142 : vector<1x32xf32> to vector<128x32xf32>
    %146 = arith.mulf %139, %145 : vector<128x32xf32>
    "tpu.trace_start"() <{level = 10 : i32, message = "qd,kd->qk"}> : () -> ()
    %cst_71 = arith.constant dense<0.000000e+00> : vector<128x128xf32>
    %147 = tpu.matmul %144, %146, %cst_71 {dimension_numbers = #tpu.dot_dimension_numbers<[1], [1], [0], [0], [0, 0, 1, 0], [], []>} : vector<128x32xf32>, vector<128x32xf32>, vector<128x128xf32> -> vector<128x128xf32>
    "tpu.trace_stop"() : () -> ()
    %cst_72 = arith.constant 2.500000e-01 : f32
    %148 = vector.broadcast %cst_72 : f32 to vector<128x128xf32>
    %149 = arith.mulf %147, %148 : vector<128x128xf32>
    %150 = arith.addf %149, %0 : vector<128x128xf32>
    %151 = math.exp %150 : vector<128x128xf32>
    %cst_73 = arith.constant dense<0.000000e+00> : vector<128xf32>
    %152 = vector.multi_reduction <add>, %151, %cst_73 [1] : vector<128x128xf32> to vector<128xf32>
    %153 = vector.shape_cast %152 : vector<128xf32> to vector<128x1xf32>
    %154 = vector.broadcast %153 : vector<128x1xf32> to vector<128x128xf32>
    %155 = arith.divf %151, %154 : vector<128x128xf32>
    %156 = vector.broadcast %142 : vector<1x32xf32> to vector<128x32xf32>
    %157 = arith.mulf %140, %156 : vector<128x32xf32>
    %cst_74 = arith.constant dense<0.000000e+00> : vector<128x32xf32>
    %158 = tpu.matmul %155, %157, %cst_74 {dimension_numbers = #tpu.dot_dimension_numbers<[1], [0], [0], [1], [0, 0, 1, 1], [], []>} : vector<128x128xf32>, vector<128x32xf32>, vector<128x32xf32> -> vector<128x32xf32>
    %159 = arith.addf %141, %158 : vector<128x32xf32>
    %c6_75 = arith.constant 6 : index
    %c0_76 = arith.constant 0 : index
    %160 = vector.load %arg6[%c6_75, %c0_76] : memref<8x128xf32, #tpu.memory_space<vmem>>, vector<1x32xf32>
    %161 = vector.broadcast %160 : vector<1x32xf32> to vector<128x32xf32>
    %162 = arith.mulf %138, %161 : vector<128x32xf32>
    %163 = vector.broadcast %160 : vector<1x32xf32> to vector<128x32xf32>
    %164 = arith.mulf %139, %163 : vector<128x32xf32>
    "tpu.trace_start"() <{level = 10 : i32, message = "qd,kd->qk"}> : () -> ()
    %cst_77 = arith.constant dense<0.000000e+00> : vector<128x128xf32>
    %165 = tpu.matmul %162, %164, %cst_77 {dimension_numbers = #tpu.dot_dimension_numbers<[1], [1], [0], [0], [0, 0, 1, 0], [], []>} : vector<128x32xf32>, vector<128x32xf32>, vector<128x128xf32> -> vector<128x128xf32>
    "tpu.trace_stop"() : () -> ()
    %cst_78 = arith.constant 2.500000e-01 : f32
    %166 = vector.broadcast %cst_78 : f32 to vector<128x128xf32>
    %167 = arith.mulf %165, %166 : vector<128x128xf32>
    %168 = arith.addf %167, %0 : vector<128x128xf32>
    %169 = math.exp %168 : vector<128x128xf32>
    %cst_79 = arith.constant dense<0.000000e+00> : vector<128xf32>
    %170 = vector.multi_reduction <add>, %169, %cst_79 [1] : vector<128x128xf32> to vector<128xf32>
    %171 = vector.shape_cast %170 : vector<128xf32> to vector<128x1xf32>
    %172 = vector.broadcast %171 : vector<128x1xf32> to vector<128x128xf32>
    %173 = arith.divf %169, %172 : vector<128x128xf32>
    %174 = vector.broadcast %160 : vector<1x32xf32> to vector<128x32xf32>
    %175 = arith.mulf %140, %174 : vector<128x32xf32>
    %cst_80 = arith.constant dense<0.000000e+00> : vector<128x32xf32>
    %176 = tpu.matmul %173, %175, %cst_80 {dimension_numbers = #tpu.dot_dimension_numbers<[1], [0], [0], [1], [0, 0, 1, 1], [], []>} : vector<128x128xf32>, vector<128x32xf32>, vector<128x32xf32> -> vector<128x32xf32>
    %177 = arith.addf %159, %176 : vector<128x32xf32>
    %c1_81 = arith.constant 1 : index
    %c96_82 = arith.constant 96 : index
    %c0_83 = arith.constant 0 : index
    %178 = vector.load %arg5[%c1_81, %c96_82, %c0_83] : memref<2x128x128xf32, #tpu.memory_space<vmem>>, vector<1x32x32xf32>
    %179 = vector.shape_cast %178 : vector<1x32x32xf32> to vector<32x32xf32>
    %cst_84 = arith.constant dense<0.000000e+00> : vector<128x32xf32>
    %180 = tpu.matmul %177, %179, %cst_84 {dimension_numbers = #tpu.dot_dimension_numbers<[1], [0], [0], [1], [0, 0, 1, 1], [], []>} : vector<128x32xf32>, vector<32x32xf32>, vector<128x32xf32> -> vector<128x32xf32>
    %c1_85 = arith.constant 1 : index
    %c1_86 = arith.constant 1 : index
    %c0_87 = arith.constant 0 : index
    %181 = vector.load %arg7[%c1_85, %c1_86, %c0_87] : memref<2x8x128xf32, #tpu.memory_space<vmem>>, vector<1x1x32xf32>
    %182 = vector.shape_cast %181 : vector<1x1x32xf32> to vector<1x32xf32>
    %183 = vector.broadcast %182 : vector<1x32xf32> to vector<128x32xf32>
    %184 = arith.addf %180, %183 : vector<128x32xf32>
    %185 = arith.addf %130, %184 : vector<128x32xf32>
    %c1_88 = arith.constant 1 : index
    %c2_89 = arith.constant 2 : index
    %c0_90 = arith.constant 0 : index
    %186 = vector.load %arg7[%c1_88, %c2_89, %c0_90] : memref<2x8x128xf32, #tpu.memory_space<vmem>>, vector<1x1x32xf32>
    %187 = vector.shape_cast %186 : vector<1x1x32xf32> to vector<1x32xf32>
    %c1_91 = arith.constant 1 : index
    %c3_92 = arith.constant 3 : index
    %c0_93 = arith.constant 0 : index
    %188 = vector.load %arg7[%c1_91, %c3_92, %c0_93] : memref<2x8x128xf32, #tpu.memory_space<vmem>>, vector<1x1x32xf32>
    %189 = vector.shape_cast %188 : vector<1x1x32xf32> to vector<1x32xf32>
    %cst_94 = arith.constant dense<0.000000e+00> : vector<128xf32>
    %190 = vector.multi_reduction <add>, %185, %cst_94 [1] : vector<128x32xf32> to vector<128xf32>
    %191 = vector.shape_cast %190 : vector<128xf32> to vector<128x1xf32>
    %cst_95 = arith.constant 3.200000e+01 : f32
    %192 = vector.broadcast %cst_95 : f32 to vector<128x1xf32>
    %193 = arith.divf %191, %192 : vector<128x1xf32>
    %194 = arith.mulf %185, %185 : vector<128x32xf32>
    %cst_96 = arith.constant dense<0.000000e+00> : vector<128xf32>
    %195 = vector.multi_reduction <add>, %194, %cst_96 [1] : vector<128x32xf32> to vector<128xf32>
    %196 = vector.shape_cast %195 : vector<128xf32> to vector<128x1xf32>
    %cst_97 = arith.constant 3.200000e+01 : f32
    %197 = vector.broadcast %cst_97 : f32 to vector<128x1xf32>
    %198 = arith.divf %196, %197 : vector<128x1xf32>
    %199 = arith.mulf %193, %193 : vector<128x1xf32>
    %200 = arith.subf %198, %199 : vector<128x1xf32>
    %201 = vector.broadcast %193 : vector<128x1xf32> to vector<128x32xf32>
    %202 = arith.subf %185, %201 : vector<128x32xf32>
    %cst_98 = arith.constant 9.99999974E-6 : f32
    %203 = vector.broadcast %cst_98 : f32 to vector<128x1xf32>
    %204 = arith.addf %200, %203 : vector<128x1xf32>
    %205 = math.rsqrt %204 : vector<128x1xf32>
    %206 = vector.broadcast %205 : vector<128x1xf32> to vector<128x32xf32>
    %207 = arith.mulf %202, %206 : vector<128x32xf32>
    %208 = vector.broadcast %187 : vector<1x32xf32> to vector<128x32xf32>
    %209 = arith.mulf %207, %208 : vector<128x32xf32>
    %210 = vector.broadcast %189 : vector<1x32xf32> to vector<128x32xf32>
    %211 = arith.addf %209, %210 : vector<128x32xf32>
    %c1_99 = arith.constant 1 : index
    %c32_100 = arith.constant 32 : index
    %c0_101 = arith.constant 0 : index
    %212 = vector.load %arg5[%c1_99, %c32_100, %c0_101] : memref<2x128x128xf32, #tpu.memory_space<vmem>>, vector<1x32x128xf32>
    %213 = vector.shape_cast %212 : vector<1x32x128xf32> to vector<32x128xf32>
    %cst_102 = arith.constant dense<0.000000e+00> : vector<128x128xf32>
    %214 = tpu.matmul %211, %213, %cst_102 {dimension_numbers = #tpu.dot_dimension_numbers<[1], [0], [0], [1], [0, 0, 1, 1], [], []>} : vector<128x32xf32>, vector<32x128xf32>, vector<128x128xf32> -> vector<128x128xf32>
    %c1_103 = arith.constant 1 : index
    %c6_104 = arith.constant 6 : index
    %c0_105 = arith.constant 0 : index
    %215 = vector.load %arg7[%c1_103, %c6_104, %c0_105] : memref<2x8x128xf32, #tpu.memory_space<vmem>>, vector<1x1x128xf32>
    %216 = vector.shape_cast %215 : vector<1x1x128xf32> to vector<1x128xf32>
    %217 = vector.broadcast %216 : vector<1x128xf32> to vector<128x128xf32>
    %218 = arith.addf %214, %217 : vector<128x128xf32>
    %cst_106 = arith.constant 0.000000e+00 : f32
    %219 = vector.broadcast %cst_106 : f32 to vector<128x128xf32>
    %220 = arith.maximumf %218, %219 : vector<128x128xf32>
    %c1_107 = arith.constant 1 : index
    %c64_108 = arith.constant 64 : index
    %c0_109 = arith.constant 0 : index
    %221 = vector.load %arg5[%c1_107, %c64_108, %c0_109] : memref<2x128x128xf32, #tpu.memory_space<vmem>>, vector<1x32x128xf32>
    %222 = vector.shape_cast %221 : vector<1x32x128xf32> to vector<32x128xf32>
    "tpu.trace_start"() <{level = 10 : i32, message = "mf,df->md"}> : () -> ()
    %cst_110 = arith.constant dense<0.000000e+00> : vector<128x32xf32>
    %223 = tpu.matmul %220, %222, %cst_110 {dimension_numbers = #tpu.dot_dimension_numbers<[1], [1], [0], [0], [0, 0, 1, 0], [], []>} : vector<128x128xf32>, vector<32x128xf32>, vector<128x32xf32> -> vector<128x32xf32>
    "tpu.trace_stop"() : () -> ()
    %c1_111 = arith.constant 1 : index
    %c7_112 = arith.constant 7 : index
    %c0_113 = arith.constant 0 : index
    %224 = vector.load %arg7[%c1_111, %c7_112, %c0_113] : memref<2x8x128xf32, #tpu.memory_space<vmem>>, vector<1x1x32xf32>
    %225 = vector.shape_cast %224 : vector<1x1x32xf32> to vector<1x32xf32>
    %226 = vector.broadcast %225 : vector<1x32xf32> to vector<128x32xf32>
    %227 = arith.addf %223, %226 : vector<128x32xf32>
    %228 = arith.addf %211, %227 : vector<128x32xf32>
    %c1_114 = arith.constant 1 : index
    %c4_115 = arith.constant 4 : index
    %c0_116 = arith.constant 0 : index
    %229 = vector.load %arg7[%c1_114, %c4_115, %c0_116] : memref<2x8x128xf32, #tpu.memory_space<vmem>>, vector<1x1x32xf32>
    %230 = vector.shape_cast %229 : vector<1x1x32xf32> to vector<1x32xf32>
    %c1_117 = arith.constant 1 : index
    %c5_118 = arith.constant 5 : index
    %c0_119 = arith.constant 0 : index
    %231 = vector.load %arg7[%c1_117, %c5_118, %c0_119] : memref<2x8x128xf32, #tpu.memory_space<vmem>>, vector<1x1x32xf32>
    %232 = vector.shape_cast %231 : vector<1x1x32xf32> to vector<1x32xf32>
    %cst_120 = arith.constant dense<0.000000e+00> : vector<128xf32>
    %233 = vector.multi_reduction <add>, %228, %cst_120 [1] : vector<128x32xf32> to vector<128xf32>
    %234 = vector.shape_cast %233 : vector<128xf32> to vector<128x1xf32>
    %cst_121 = arith.constant 3.200000e+01 : f32
    %235 = vector.broadcast %cst_121 : f32 to vector<128x1xf32>
    %236 = arith.divf %234, %235 : vector<128x1xf32>
    %237 = arith.mulf %228, %228 : vector<128x32xf32>
    %cst_122 = arith.constant dense<0.000000e+00> : vector<128xf32>
    %238 = vector.multi_reduction <add>, %237, %cst_122 [1] : vector<128x32xf32> to vector<128xf32>
    %239 = vector.shape_cast %238 : vector<128xf32> to vector<128x1xf32>
    %cst_123 = arith.constant 3.200000e+01 : f32
    %240 = vector.broadcast %cst_123 : f32 to vector<128x1xf32>
    %241 = arith.divf %239, %240 : vector<128x1xf32>
    %242 = arith.mulf %236, %236 : vector<128x1xf32>
    %243 = arith.subf %241, %242 : vector<128x1xf32>
    %244 = vector.broadcast %236 : vector<128x1xf32> to vector<128x32xf32>
    %245 = arith.subf %228, %244 : vector<128x32xf32>
    %cst_124 = arith.constant 9.99999974E-6 : f32
    %246 = vector.broadcast %cst_124 : f32 to vector<128x1xf32>
    %247 = arith.addf %243, %246 : vector<128x1xf32>
    %248 = math.rsqrt %247 : vector<128x1xf32>
    %249 = vector.broadcast %248 : vector<128x1xf32> to vector<128x32xf32>
    %250 = arith.mulf %245, %249 : vector<128x32xf32>
    %251 = vector.broadcast %230 : vector<1x32xf32> to vector<128x32xf32>
    %252 = arith.mulf %250, %251 : vector<128x32xf32>
    %253 = vector.broadcast %232 : vector<1x32xf32> to vector<128x32xf32>
    %254 = arith.addf %252, %253 : vector<128x32xf32>
    %c0_125 = arith.constant 0 : index
    %c0_126 = arith.constant 0 : index
    %255 = vector.load %arg3[%c0_125, %c0_126] : memref<16x128xf32, #tpu.memory_space<vmem>>, vector<16x128xf32>
    %cst_127 = arith.constant dense<0.000000e+00> : vector<16x32xf32>
    %256 = tpu.matmul %255, %254, %cst_127 {dimension_numbers = #tpu.dot_dimension_numbers<[1], [0], [0], [1], [0, 0, 1, 1], [], []>} : vector<16x128xf32>, vector<128x32xf32>, vector<16x32xf32> -> vector<16x32xf32>
    %c8 = arith.constant 8 : index
    %c0_128 = arith.constant 0 : index
    %257 = vector.load %arg4[%c8, %c0_128] : memref<72x128xf32, #tpu.memory_space<vmem>>, vector<32x32xf32>
    %cst_129 = arith.constant dense<0.000000e+00> : vector<16x32xf32>
    %258 = tpu.matmul %256, %257, %cst_129 {dimension_numbers = #tpu.dot_dimension_numbers<[1], [0], [0], [1], [0, 0, 1, 1], [], []>} : vector<16x32xf32>, vector<32x32xf32>, vector<16x32xf32> -> vector<16x32xf32>
    %c1_130 = arith.constant 1 : index
    %c0_131 = arith.constant 0 : index
    %259 = vector.load %arg6[%c1_130, %c0_131] : memref<8x128xf32, #tpu.memory_space<vmem>>, vector<1x32xf32>
    %260 = vector.broadcast %259 : vector<1x32xf32> to vector<16x32xf32>
    %261 = arith.addf %258, %260 : vector<16x32xf32>
    %c2_132 = arith.constant 2 : index
    %c0_133 = arith.constant 0 : index
    %262 = vector.load %arg6[%c2_132, %c0_133] : memref<8x128xf32, #tpu.memory_space<vmem>>, vector<1x32xf32>
    %c3_134 = arith.constant 3 : index
    %c0_135 = arith.constant 0 : index
    %263 = vector.load %arg6[%c3_134, %c0_135] : memref<8x128xf32, #tpu.memory_space<vmem>>, vector<1x32xf32>
    %cst_136 = arith.constant dense<0.000000e+00> : vector<16xf32>
    %264 = vector.multi_reduction <add>, %261, %cst_136 [1] : vector<16x32xf32> to vector<16xf32>
    %265 = vector.shape_cast %264 : vector<16xf32> to vector<16x1xf32>
    %cst_137 = arith.constant 3.200000e+01 : f32
    %266 = vector.broadcast %cst_137 : f32 to vector<16x1xf32>
    %267 = arith.divf %265, %266 : vector<16x1xf32>
    %268 = arith.mulf %261, %261 : vector<16x32xf32>
    %cst_138 = arith.constant dense<0.000000e+00> : vector<16xf32>
    %269 = vector.multi_reduction <add>, %268, %cst_138 [1] : vector<16x32xf32> to vector<16xf32>
    %270 = vector.shape_cast %269 : vector<16xf32> to vector<16x1xf32>
    %cst_139 = arith.constant 3.200000e+01 : f32
    %271 = vector.broadcast %cst_139 : f32 to vector<16x1xf32>
    %272 = arith.divf %270, %271 : vector<16x1xf32>
    %273 = arith.mulf %267, %267 : vector<16x1xf32>
    %274 = arith.subf %272, %273 : vector<16x1xf32>
    %275 = vector.broadcast %267 : vector<16x1xf32> to vector<16x32xf32>
    %276 = arith.subf %261, %275 : vector<16x32xf32>
    %cst_140 = arith.constant 9.99999974E-6 : f32
    %277 = vector.broadcast %cst_140 : f32 to vector<16x1xf32>
    %278 = arith.addf %274, %277 : vector<16x1xf32>
    %279 = math.rsqrt %278 : vector<16x1xf32>
    %280 = vector.broadcast %279 : vector<16x1xf32> to vector<16x32xf32>
    %281 = arith.mulf %276, %280 : vector<16x32xf32>
    %282 = vector.broadcast %262 : vector<1x32xf32> to vector<16x32xf32>
    %283 = arith.mulf %281, %282 : vector<16x32xf32>
    %284 = vector.broadcast %263 : vector<1x32xf32> to vector<16x32xf32>
    %285 = arith.addf %283, %284 : vector<16x32xf32>
    %c40 = arith.constant 40 : index
    %c0_141 = arith.constant 0 : index
    %286 = vector.load %arg4[%c40, %c0_141] : memref<72x128xf32, #tpu.memory_space<vmem>>, vector<32x128xf32>
    %cst_142 = arith.constant dense<0.000000e+00> : vector<16x128xf32>
    %287 = tpu.matmul %285, %286, %cst_142 {dimension_numbers = #tpu.dot_dimension_numbers<[1], [0], [0], [1], [0, 0, 1, 1], [], []>} : vector<16x32xf32>, vector<32x128xf32>, vector<16x128xf32> -> vector<16x128xf32>
    %c4_143 = arith.constant 4 : index
    %c0_144 = arith.constant 0 : index
    %288 = vector.load %arg6[%c4_143, %c0_144] : memref<8x128xf32, #tpu.memory_space<vmem>>, vector<1x128xf32>
    %289 = vector.broadcast %288 : vector<1x128xf32> to vector<16x128xf32>
    %290 = arith.addf %287, %289 : vector<16x128xf32>
    %c0_145 = arith.constant 0 : index
    %c0_146 = arith.constant 0 : index
    %291 = vector.load %arg8[%c0_145, %c0_146] : memref<16x128xf32, #tpu.memory_space<vmem>>, vector<16x128xf32>
    tpu.vector_store %arg8[%c0_145, %c0_146], %290 {strides = array<i32>} : memref<16x128xf32, #tpu.memory_space<vmem>>, vector<16x128xf32>,
    return
  }
  func.func @transform_0(%arg0: i32) -> (i32, i32) {
    %c0_i32 = arith.constant 0 : i32
    %c0_i32_0 = arith.constant 0 : i32
    return %arg0, %c0_i32 : i32, i32
  }
  func.func @transform_1(%arg0: i32) -> (i32, i32) {
    %c0_i32 = arith.constant 0 : i32
    %c0_i32_0 = arith.constant 0 : i32
    %c0_i32_1 = arith.constant 0 : i32
    return %c0_i32, %c0_i32_0 : i32, i32
  }
  func.func @transform_2(%arg0: i32) -> (i32, i32) {
    %c0_i32 = arith.constant 0 : i32
    %c0_i32_0 = arith.constant 0 : i32
    %c0_i32_1 = arith.constant 0 : i32
    return %c0_i32, %c0_i32_0 : i32, i32
  }
  func.func @transform_3(%arg0: i32) -> (i32, i32) {
    %c0_i32 = arith.constant 0 : i32
    %c0_i32_0 = arith.constant 0 : i32
    %c0_i32_1 = arith.constant 0 : i32
    return %c0_i32, %c0_i32_0 : i32, i32
  }
  func.func @transform_4(%arg0: i32) -> (i32, i32, i32) {
    %c0_i32 = arith.constant 0 : i32
    %c0_i32_0 = arith.constant 0 : i32
    %c0_i32_1 = arith.constant 0 : i32
    %c0_i32_2 = arith.constant 0 : i32
    return %c0_i32, %c0_i32_0, %c0_i32_1 : i32, i32, i32
  }
  func.func @transform_5(%arg0: i32) -> (i32, i32) {
    %c0_i32 = arith.constant 0 : i32
    %c0_i32_0 = arith.constant 0 : i32
    %c0_i32_1 = arith.constant 0 : i32
    return %c0_i32, %c0_i32_0 : i32, i32
  }
  func.func @transform_6(%arg0: i32) -> (i32, i32, i32) {
    %c0_i32 = arith.constant 0 : i32
    %c0_i32_0 = arith.constant 0 : i32
    %c0_i32_1 = arith.constant 0 : i32
    %c0_i32_2 = arith.constant 0 : i32
    return %c0_i32, %c0_i32_0, %c0_i32_1 : i32, i32, i32
  }
  func.func @transform_7(%arg0: i32) -> (i32, i32) {
    %c0_i32 = arith.constant 0 : i32
    %c0_i32_0 = arith.constant 0 : i32
    return %arg0, %c0_i32 : i32, i32
  }
}

</mosaic_0001>

<bundles_post_ra>
// kernel: tpu_custom_call.1
= control target key start
LH: loop header
LB: loop body
LE: loop exit
PB: predicated region body
PF: predicated region fallthrough
CT: control target
= control target key end

     0   :  { %12 = vsyncpa [#allocation3], 0  ;;  %s11351_s0 = inlined_call_operand.vmem [shape: f32[512,8], index: 0, kind: input, shape index: {}]   ;;  %s11352_s1 = inlined_call_operand.vmem [shape: f32[128,128], index: 1, kind: input, shape index: {}]   ;;  %s11353_s2 = inlined_call_operand.vmem [shape: f32[16,128], index: 2, kind: input, shape index: {}]   ;;  %s11354_s3 = inlined_call_operand.vmem [shape: f32[72,128], index: 3, kind: input, shape index: {}]   ;;  %s11355_s4 = inlined_call_operand.vmem [shape: f32[2,128,128], index: 4, kind: input, shape index: {}]   ;;  %s11356_s5 = inlined_call_operand.vmem [shape: f32[8,128], index: 5, kind: input, shape index: {}]   ;;  %s11357_s6 = inlined_call_operand.vmem [shape: f32[2,8,128], index: 6, kind: input, shape index: {}]   ;;  %s11358_s7 = inlined_call_operand.hbm [shape: f32[64,128], index: 7, kind: output, shape index: {}]  }
   0x1   :  { %14 = vsyncpa [#allocation3 + $0x1], 0  ;;  %s8432_s24 = smov 0   ;;  %s8434_s25 = smov 0  }
   0x2   :  { %s8436_s26 = smov 0   ;;  %s8438_s27 = smov 0  }
   0x3 LB: > { %s8453_s28 = sadd.s32 4294967295, %s8384_s27   ;;  %s6319_s29 = sadd.s32 4294967294, %s8384_s27   ;;  %s8384_s27 = sphi %s8438_s27, %s11364_s27   ;;  %s8380_s26 = sphi %s8436_s26, %s11363_s26   ;;  %s8376_s25 = sphi %s8434_s25, %s11362_s25   ;;  %s8372_s24 = sphi %s8432_s24, %s11361_s24  }
   0x4   : > { %s8457_s30 = sadd.s32 1, %s8384_s27   ;;  %s179_s8 = sadd.s32 1, %s8380_s26 }
   0x5   : > { %s176_s9 = ssub.s32 %s8384_s27, %s8457_s30  ;;  %p189_p0 = scmp.ne.s32.totalorder %s8380_s26, %s8376_s25 }
   0x6   : > { %p177_p1 = scmp.eq.s32.totalorder %s176_s9, 0  ;;  %p190_p2 = scmp.eq.s32.totalorder %s8453_s28, 3 }
   0x7   : > { %p195_p3 = scmp.ne.s32.totalorder %s8376_s25, %s8372_s24  ;;  %p196_p4 = scmp.eq.s32.totalorder %s6319_s29, 3 }
   0x8   : > { %s8468_s10 = scalar_select %p177_p1, %s8380_s26, %s179_s8  }
   0x9   : > { %p8470_p5 = por %p190_p2, %p189_p0  ;;  %p8474_p6 = por %p196_p4, %p195_p3 }
   0xa   : > { %p6322_p7 = scmp.ge.s32.totalorder %s8384_s27, 1  ;;  %p241_p8 = scmp.lt.s32.totalorder %s8384_s27, 5 }
   0xc   : > { %p242_p9 = pnand %p6322_p7, %p241_p8 }
   0xd   : > { %s6324_s15 = sshll.u32 (!%p242_p9), %s8453_s28, 4  ;;  %s8386_s16 = smov (!%p242_p9), 32  }
   0xe   : > { %245 = sbr.rel (%p242_p9) target bundleno = 5005 (0x138d), region = 48  ;;  %p274_p10 = scmp.lt.s32.totalorder (!%p242_p9), %s6324_s15, 63 }
   0xf   : > { %s8387_s23 = smov (!%p242_p9), 96   ;;  %s8388_s29 = smov (!%p242_p9), 64  }
  0x10   : > { %s6624_s22 = sshll.u32 (!%p242_p9), %s8453_s28, 8  ;;  %s8389_s28 = smov (!%p242_p9), [#allocation2]  }
  0x11   : > { %s11309_s9 = scalar_lea.hbm (!%p242_p9), %s11358_s7, %s6624_s22 }
  0x13   : > { %v312_v0 = vld [vmem:[%s11354_s3] sm:$0xff]  ;;  %v515_v1 = vld [vmem:[%s11355_s4 + $0x18] sm:$0xff]  ;;  %s11366_s15 = smov (!%p274_p10, %s6324_s15), 63  ;;  %vm318_vm0 = vcmask 64512   ;;  %v514_v18 = vld [vmem:[%s11355_s4 + $0x10] sm:$0xff]  ;;  %vm521_vm1 = vcmask 261120  }
  0x14   : > { %7088 = vmatprep.subr.mxu0 %v312_v0  ;;  %7114 = vmatprep.subr.mxu1 %v515_v1  ;;  %s6325_s18 = sshll.u32 %s11366_s15, 3  ;;  %v513_v19 = vld [vmem:[%s11355_s4 + $0x8] sm:$0xff]  ;;  %v512_v20 = vld [vmem:[%s11355_s4] sm:$0xff]  ;;  %s8328_s15 = sshll.u32 %s8389_s28, 4  ;;  %s8329_s15 = int_to_ptr.vmem [resolvable:$false] %s8328_s15 }
  0x15   : > { %7089 = vmatpush3.msra.mxu0 %v312_v0  ;;  %7115 = vmatpush3.msra.mxu1 %v515_v1  ;;  %s8490_s21 = scalar_lea.vmem %s11351_s0, %s6325_s18  ;;  %v8536_v21 = vld [vmem:[%s11356_s5 + $0x5] ss:$0 sm:$0xff]  ;;  %v8543_v22 = vld [vmem:[%s11356_s5 + $0x6] ss:$0 sm:$0xff]  ;;  %v6326_v24 = vld [vmem:[%s11356_s5] ss:$0 sm:$0xff] }
  0x16   : > { %v296_v2 = vld [vmem:[%s8490_s21] sm:$0xff]  ;;  %v297_v3 = vld [vmem:[%s8490_s21 + $0x8] sm:$0xff]  ;;  %v298_v4 = vld [vmem:[%s8490_s21 + $0x10] sm:$0xff]  ;;  %7116 = vmatprep.subr.mxu1 %v514_v18  ;;  %737 = vrot.lane.b32.xlu0 %v8536_v21, %s8386_s16  ;;  %s8330_s17 = scalar_lea.vmem %s8329_s15, 512 }
  0x17   : > { %7090 = vmatprep.mubr.msk.f32.mxu0 %vm318_vm0, %v296_v2  ;;  %v299_v5 = vld [vmem:[%s8490_s21 + $0x18] sm:$0xff]  ;;  %v300_v6 = vld [vmem:[%s8490_s21 + $0x20] sm:$0xff]  ;;  %v301_v7 = vld [vmem:[%s8490_s21 + $0x28] sm:$0xff]  ;;  %7117 = vmatpush3.msra.mxu1 %v514_v18 }
  0x18   : > { %7091 = vmatmul.mubr.msk.f32.vlgmr.msra.gmra.mxu0 %vm318_vm0, %v297_v3  ;;  %v302_v8 = vld [vmem:[%s8490_s21 + $0x30] sm:$0xff]  ;;  %v303_v9 = vld [vmem:[%s8490_s21 + $0x38] sm:$0xff]  ;;  %v304_v10 = vld [vmem:[%s8490_s21 + $0x40] sm:$0xff]  ;;  %7118 = vmatprep.subr.mxu1 %v513_v19 }
  0x19   : > { %7093 = vmatprep.mubr.msk.f32.mxu0 %vm318_vm0, %v298_v4  ;;  %v305_v11 = vld [vmem:[%s8490_s21 + $0x48] sm:$0xff]  ;;  %v306_v12 = vld [vmem:[%s8490_s21 + $0x50] sm:$0xff]  ;;  %v307_v13 = vld [vmem:[%s8490_s21 + $0x58] sm:$0xff]  ;;  %7119 = vmatpush3.msra.mxu1 %v513_v19 }
  0x1a   : > { %v308_v14 = vld [vmem:[%s8490_s21 + $0x60] sm:$0xff]  ;;  %v309_v15 = vld [vmem:[%s8490_s21 + $0x68] sm:$0xff]  ;;  %v310_v16 = vld [vmem:[%s8490_s21 + $0x70] sm:$0xff]  ;;  %7120 = vmatprep.subr.mxu1 %v512_v20  ;;  %1198 = vrot.lane.b32.xlu0 %v8543_v22, %s8386_s16 }
  0x1b   : > { %v311_v17 = vld [vmem:[%s8490_s21 + $0x78] sm:$0xff]  ;;  %7121 = vmatpush3.msra.mxu1 %v512_v20  ;;  %v8617_v56 = vld [vmem:[%s11357_s6] ss:$0 sm:$0xff] }
  0x1c   : > { %7094 = vmatmul.mubr.msk.f32.gmra.mxu0 %vm318_vm0, %v299_v5 }
  0x1d   : > { %7096 = vmatprep.mubr.msk.f32.mxu0 %vm318_vm0, %v300_v6 }
  0x20   : > { %7097 = vmatmul.mubr.msk.f32.gmra.mxu0 %vm318_vm0, %v301_v7 }
  0x21   : > { %7099 = vmatprep.mubr.msk.f32.mxu0 %vm318_vm0, %v302_v8 }
  0x24   : > { %7100 = vmatmul.mubr.msk.f32.gmra.mxu0 %vm318_vm0, %v303_v9 }
  0x25   : > { %7102 = vmatprep.mubr.msk.f32.mxu0 %vm318_vm0, %v304_v10 }
  0x28   : > { %7103 = vmatmul.mubr.msk.f32.gmra.mxu0 %vm318_vm0, %v305_v11 }
  0x29   : > { %7105 = vmatprep.mubr.msk.f32.mxu0 %vm318_vm0, %v306_v12 }
  0x2c   : > { %7106 = vmatmul.mubr.msk.f32.gmra.mxu0 %vm318_vm0, %v307_v13 }
  0x2d   : > { %7108 = vmatprep.mubr.msk.f32.mxu0 %vm318_vm0, %v308_v14 }
  0x30   : > { %7109 = vmatmul.mubr.msk.f32.gmra.mxu0 %vm318_vm0, %v309_v15 }
  0x31   : > { %7111 = vmatprep.mubr.msk.f32.mxu0 %vm318_vm0, %v310_v16 }
  0x34   : > { %7112 = vmatmul.mubr.msk.f32.gmra.mxu0 %vm318_vm0, %v311_v17 }
  0x88   : > { %v8636_v12 = vpop.permute.xlu0 %737 }
  0x8c   : > { %v8652_v20 = vpop.permute.xlu0 %1198 }
  0xd8   : > { %v7092_v23 = vpop.f32.mrf.mxu0 }
  0xd9   : > { %v8552_v27 = vadd.f32 %v7092_v23, %v6326_v24 }
  0xda   : > { %v433_v25 = vpop.f32.mrf.mxu0 }
  0xdb   : > { %v8550_v26 = vadd.f32 %v6326_v24, %v433_v25 }
  0xdc   : > { %v7095_v28 = vpop.f32.mrf.mxu0 }
  0xdd   : > { %7122 = vmatprep.mubr.msk.f32.mxu1 %vm521_vm1, %v8550_v26  ;;  %v8560_v31 = vadd.f32 %v7095_v28, %v6326_v24 }
  0xde   : > { %v443_v29 = vpop.f32.mrf.mxu0  ;;  %7123 = vmatmul.mubr.msk.f32.vlgmr.msra.gmra.mxu1 %vm521_vm1, %v8552_v27 }
  0xdf   : > { %v8558_v30 = vadd.f32 %v6326_v24, %v443_v29 }
  0xe0   : > { %v7098_v32 = vpop.f32.mrf.mxu0 }
  0xe1   : > { %7125 = vmatprep.mubr.msk.f32.mxu1 %vm521_vm1, %v8558_v30  ;;  %v8568_v35 = vadd.f32 %v7098_v32, %v6326_v24 }
  0xe2   : > { %v453_v33 = vpop.f32.mrf.mxu0  ;;  %7126 = vmatmul.mubr.msk.f32.gmra.mxu1 %vm521_vm1, %v8560_v31 }
  0xe3   : > { %v8566_v34 = vadd.f32 %v6326_v24, %v453_v33 }
  0xe4   : > { %v7101_v36 = vpop.f32.mrf.mxu0 }
  0xe5   : > { %7128 = vmatprep.mubr.msk.f32.mxu1 %vm521_vm1, %v8566_v34  ;;  %v8576_v39 = vadd.f32 %v7101_v36, %v6326_v24 }
  0xe6   : > { %v463_v37 = vpop.f32.mrf.mxu0  ;;  %7129 = vmatmul.mubr.msk.f32.gmra.mxu1 %vm521_vm1, %v8568_v35 }
  0xe7   : > { %v8574_v38 = vadd.f32 %v6326_v24, %v463_v37 }
  0xe8   : > { %v7104_v40 = vpop.f32.mrf.mxu0 }
  0xe9   : > { %7131 = vmatprep.mubr.msk.f32.mxu1 %vm521_vm1, %v8574_v38  ;;  %v8584_v43 = vadd.f32 %v7104_v40, %v6326_v24 }
  0xea   : > { %v473_v41 = vpop.f32.mrf.mxu0  ;;  %7132 = vmatmul.mubr.msk.f32.gmra.mxu1 %vm521_vm1, %v8576_v39 }
  0xeb   : > { %v8582_v42 = vadd.f32 %v6326_v24, %v473_v41 }
  0xec   : > { %v7107_v44 = vpop.f32.mrf.mxu0 }
  0xed   : > { %7134 = vmatprep.mubr.msk.f32.mxu1 %vm521_vm1, %v8582_v42  ;;  %v8592_v47 = vadd.f32 %v7107_v44, %v6326_v24 }
  0xee   : > { %v483_v45 = vpop.f32.mrf.mxu0  ;;  %7135 = vmatmul.mubr.msk.f32.gmra.mxu1 %vm521_vm1, %v8584_v43 }
  0xef   : > { %v8590_v46 = vadd.f32 %v6326_v24, %v483_v45 }
  0xf0   : > { %v7110_v48 = vpop.f32.mrf.mxu0 }
  0xf1   : > { %7137 = vmatprep.mubr.msk.f32.mxu1 %vm521_vm1, %v8590_v46  ;;  %v8600_v51 = vadd.f32 %v7110_v48, %v6326_v24 }
  0xf2   : > { %v493_v49 = vpop.f32.mrf.mxu0  ;;  %7138 = vmatmul.mubr.msk.f32.gmra.mxu1 %vm521_vm1, %v8592_v47 }
  0xf3   : > { %v8598_v50 = vadd.f32 %v6326_v24, %v493_v49 }
  0xf4   : > { %v7113_v52 = vpop.f32.mrf.mxu0 }
  0xf5   : > { %7140 = vmatprep.mubr.msk.f32.mxu1 %vm521_vm1, %v8598_v50  ;;  %v8608_v55 = vadd.f32 %v7113_v52, %v6326_v24 }
  0xf6   : > { %v503_v53 = vpop.f32.mrf.mxu0  ;;  %7141 = vmatmul.mubr.msk.f32.gmra.mxu1 %vm521_vm1, %v8600_v51 }
  0xf7   : > { %v8606_v54 = vadd.f32 %v6326_v24, %v503_v53 }
  0xf9   : > { %7143 = vmatprep.mubr.msk.f32.mxu1 %vm521_vm1, %v8606_v54 }
  0xfa   : > { %7144 = vmatmul.mubr.msk.f32.gmra.mxu1 %vm521_vm1, %v8608_v55 }
 0x19e   : > { %v7124_v57 = vpop.f32.mrf.mxu1 }
 0x19f   : > { %v8620_v58 = vadd.f32 %v7124_v57, %v8617_v56 }
 0x1a0   : > { %v636_v59 = vpop.f32.mrf.mxu1 }
 0x1a1   : > { %v8623_v60 = vadd.f32 %v8617_v56, %v636_v59 }
 0x1a2   : > { %v7127_v61 = vpop.f32.mrf.mxu1 }
 0x1a3   : > { %v8626_v62 = vadd.f32 %v7127_v61, %v8617_v56  ;;  %v720_v63 = vmul.f32 %v8536_v21, %v8623_v60  ;;  %v1181_v0 = vmul.f32 %v8543_v22, %v8623_v60 }
 0x1a4   : > { %v8632_v1 = vpop.f32.mrf.mxu1 }
 0x1a5   : > { %7178 = vmatprep.mubr.msk.f32.mxu0 %vm521_vm1, %v720_v63  ;;  %7234 = vmatprep.mubr.msk.f32.mxu1 %vm521_vm1, %v1181_v0 }
 0x1a6   : > { %v7130_v2 = vpop.f32.mrf.mxu1 }
 0x1a8   : > { %v656_v3 = vpop.f32.mrf.mxu1 }
 0x1aa   : > { %v7133_v4 = vpop.f32.mrf.mxu1 }
 0x1ab   : > { %v8703_v53 = vadd.f32 %v7133_v4, %v8617_v56  ;;  %v8721_v4 = vadd.f32 %v7130_v2, %v8617_v56 }
 0x1ac   : > { %v666_v5 = vpop.f32.mrf.mxu1 }
 0x1ad   : > { %v8712_v61 = vadd.f32 %v8617_v56, %v666_v5  ;;  %v747_v63 = vmul.f32 %v8636_v12, %v8703_v53  ;;  %v1208_v5 = vmul.f32 %v8652_v20, %v8703_v53 }
 0x1ae   : > { %v7136_v6 = vpop.f32.mrf.mxu1 }
 0x1af   : > { %v8685_v41 = vadd.f32 %v7136_v6, %v8617_v56  ;;  %v746_v6 = vmul.f32 %v8636_v12, %v8712_v61  ;;  %v1207_v2 = vmul.f32 %v8652_v20, %v8712_v61 }
 0x1b0   : > { %v676_v7 = vpop.f32.mrf.mxu1 }
 0x1b1   : > { %v8694_v48 = vadd.f32 %v8617_v56, %v676_v7  ;;  %v749_v49 = vmul.f32 %v8636_v12, %v8685_v41  ;;  %v1210_v59 = vmul.f32 %v8652_v20, %v8685_v41  ;;  %v8730_v7 = vadd.f32 %v8617_v56, %v656_v3 }
 0x1b2   : > { %v7139_v8 = vpop.f32.mrf.mxu1  ;;  %v1206_v3 = vmul.f32 %v8652_v20, %v8721_v4 }
 0x1b3   : > { %v8667_v29 = vadd.f32 %v7139_v8, %v8617_v56  ;;  %v748_v57 = vmul.f32 %v8636_v12, %v8694_v48  ;;  %v1209_v0 = vmul.f32 %v8652_v20, %v8694_v48  ;;  %v745_v8 = vmul.f32 %v8636_v12, %v8721_v4 }
 0x1b4   : > { %v686_v9 = vpop.f32.mrf.mxu1 }
 0x1b5   : > { %v8676_v36 = vadd.f32 %v8617_v56, %v686_v9  ;;  %v751_v37 = vmul.f32 %v8636_v12, %v8667_v29  ;;  %v1212_v45 = vmul.f32 %v8652_v20, %v8667_v29  ;;  %v744_v9 = vmul.f32 %v8636_v12, %v8730_v7 }
 0x1b6   : > { %v7142_v10 = vpop.f32.mrf.mxu1 }
 0x1b7   : > { %v8647_v18 = vadd.f32 %v7142_v10, %v8617_v56  ;;  %v750_v44 = vmul.f32 %v8636_v12, %v8676_v36  ;;  %v1211_v52 = vmul.f32 %v8652_v20, %v8676_v36  ;;  %v8746_v10 = vadd.f32 %v8617_v56, %v8632_v1 }
 0x1b8   : > { %v696_v11 = vpop.f32.mrf.mxu1  ;;  %v741_v1 = vmul.f32 %v8636_v12, %v8620_v58 }
 0x1b9   : > { %v8658_v24 = vadd.f32 %v8617_v56, %v696_v11  ;;  %v753_v25 = vmul.f32 %v8636_v12, %v8647_v18  ;;  %v1214_v33 = vmul.f32 %v8652_v20, %v8647_v18  ;;  %v743_v11 = vmul.f32 %v8636_v12, %v8626_v62 }
 0x1ba   : > { %v7145_v13 = vpop.f32.mrf.mxu1 }
 0x1bb   : > { %v8639_v14 = vadd.f32 %v7145_v13, %v8617_v56  ;;  %v752_v32 = vmul.f32 %v8636_v12, %v8658_v24  ;;  %v1213_v40 = vmul.f32 %v8652_v20, %v8658_v24  ;;  %v1205_v13 = vmul.f32 %v8652_v20, %v8730_v7 }
 0x1bc   : > { %v706_v15 = vpop.f32.mrf.mxu1 }
 0x1bd   : > { %v8642_v16 = vadd.f32 %v8617_v56, %v706_v15  ;;  %v755_v17 = vmul.f32 %v8636_v12, %v8639_v14  ;;  %v1216_v23 = vmul.f32 %v8652_v20, %v8639_v14  ;;  %v742_v15 = vmul.f32 %v8636_v12, %v8746_v10 }
 0x1be   : > { %v1204_v56 = vmul.f32 %v8652_v20, %v8626_v62 }
 0x1bf   : > { %802 = vrot.lane.b32.xlu1 %v755_v17, %s8387_s23  ;;  %v754_v19 = vmul.f32 %v8636_v12, %v8642_v16  ;;  %v1215_v28 = vmul.f32 %v8652_v20, %v8642_v16  ;;  %v1203_v17 = vmul.f32 %v8652_v20, %v8746_v10 }
 0x1c1   : > { %800 = vrot.lane.b32.xlu0 %v754_v19, %s8387_s23  ;;  %v740_v19 = vmul.f32 %v8636_v12, %v8623_v60 }
 0x1c3   : > { %1263 = vrot.lane.b32.xlu1 %v1216_v23, %s8387_s23  ;;  %v1202_v23 = vmul.f32 %v8652_v20, %v8620_v58 }
 0x1c5   : > { %798 = vrot.lane.b32.xlu0 %v753_v25, %s8387_s23  ;;  %v1201_v25 = vmul.f32 %v8652_v20, %v8623_v60 }
 0x1c7   : > { %1261 = vrot.lane.b32.xlu1 %v1215_v28, %s8387_s23 }
 0x1c9   : > { %796 = vrot.lane.b32.xlu0 %v752_v32, %s8387_s23 }
 0x1cb   : > { %1259 = vrot.lane.b32.xlu1 %v1214_v33, %s8387_s23 }
 0x1cd   : > { %794 = vrot.lane.b32.xlu0 %v751_v37, %s8387_s23 }
 0x1cf   : > { %1257 = vrot.lane.b32.xlu1 %v1213_v40, %s8387_s23 }
 0x1d1   : > { %792 = vrot.lane.b32.xlu0 %v750_v44, %s8387_s23 }
 0x1d3   : > { %1255 = vrot.lane.b32.xlu1 %v1212_v45, %s8387_s23 }
 0x1d5   : > { %790 = vrot.lane.b32.xlu0 %v749_v49, %s8387_s23 }
 0x1d7   : > { %1253 = vrot.lane.b32.xlu1 %v1211_v52, %s8387_s23 }
 0x1d9   : > { %788 = vrot.lane.b32.xlu0 %v748_v57, %s8387_s23 }
 0x1db   : > { %1251 = vrot.lane.b32.xlu1 %v1210_v59, %s8387_s23 }
 0x1dd   : > { %786 = vrot.lane.b32.xlu0 %v747_v63, %s8387_s23 }
 0x1df   : > { %1249 = vrot.lane.b32.xlu1 %v1209_v0, %s8387_s23 }
 0x1e1   : > { %784 = vrot.lane.b32.xlu0 %v746_v6, %s8387_s23 }
 0x1e3   : > { %1247 = vrot.lane.b32.xlu1 %v1208_v5, %s8387_s23 }
 0x1e5   : > { %782 = vrot.lane.b32.xlu0 %v745_v8, %s8387_s23 }
 0x1e7   : > { %1245 = vrot.lane.b32.xlu1 %v1207_v2, %s8387_s23 }
 0x1e9   : > { %780 = vrot.lane.b32.xlu0 %v744_v9, %s8387_s23 }
 0x1eb   : > { %1243 = vrot.lane.b32.xlu1 %v1206_v3, %s8387_s23 }
 0x1ed   : > { %778 = vrot.lane.b32.xlu0 %v743_v11, %s8387_s23 }
 0x1ef   : > { %1241 = vrot.lane.b32.xlu1 %v1205_v13, %s8387_s23 }
 0x1f1   : > { %776 = vrot.lane.b32.xlu0 %v742_v15, %s8387_s23 }
 0x1f3   : > { %1239 = vrot.lane.b32.xlu1 %v1204_v56, %s8387_s23 }
 0x1f5   : > { %774 = vrot.lane.b32.xlu0 %v741_v1, %s8387_s23 }
 0x1f7   : > { %1237 = vrot.lane.b32.xlu1 %v1203_v17, %s8387_s23 }
 0x1f9   : > { %772 = vrot.lane.b32.xlu0 %v740_v19, %s8387_s23 }
 0x1fb   : > { %1235 = vrot.lane.b32.xlu1 %v1202_v23, %s8387_s23 }
 0x1fd   : > { %1157 = vrot.lane.b32.xlu0 %v8536_v21, %s8388_s29 }
 0x1ff   : > { %1233 = vrot.lane.b32.xlu1 %v1201_v25, %s8387_s23 }
 0x203   : > { %1618 = vrot.lane.b32.xlu1 %v8543_v22, %s8388_s29 }
 0x231   : > { %v803_v12 = vpop.permute.xlu1 %802 }
 0x232   : > { %7146 = vmatprep.subr.msk.mxu0 %vm521_vm1, %v803_v12 }
 0x233   : > { %7147 = vmatpush3.xpose.msk.msra.mxu0 %vm521_vm1, %v803_v12  ;;  %v801_v28 = vpop.permute.xlu0 %800 }
 0x234   : > { %7148 = vmatprep.subr.msk.mxu0 %vm521_vm1, %v801_v28 }
 0x235   : > { %v1264_v32 = vpop.permute.xlu1 %1263 }
 0x236   : > { %7202 = vmatprep.subr.msk.mxu1 %vm521_vm1, %v1264_v32 }
 0x237   : > { %7149 = vmatpush3.xpose.msk.msra.mxu0 %vm521_vm1, %v801_v28  ;;  %7203 = vmatpush3.xpose.msk.msra.mxu1 %vm521_vm1, %v1264_v32  ;;  %v799_v20 = vpop.permute.xlu0 %798 }
 0x238   : > { %7150 = vmatprep.subr.msk.mxu0 %vm521_vm1, %v799_v20 }
 0x239   : > { %v1262_v33 = vpop.permute.xlu1 %1261 }
 0x23a   : > { %7204 = vmatprep.subr.msk.mxu1 %vm521_vm1, %v1262_v33 }
 0x23b   : > { %7151 = vmatpush3.xpose.msk.msra.mxu0 %vm521_vm1, %v799_v20  ;;  %7205 = vmatpush3.xpose.msk.msra.mxu1 %vm521_vm1, %v1262_v33  ;;  %v797_v37 = vpop.permute.xlu0 %796  ;;  %v721_v33 = vmul.f32 %v8536_v21, %v8620_v58 }
 0x23c   : > { %7152 = vmatprep.subr.msk.mxu0 %vm521_vm1, %v797_v37 }
 0x23d   : > { %v1260_v40 = vpop.permute.xlu1 %1259 }
 0x23e   : > { %7206 = vmatprep.subr.msk.mxu1 %vm521_vm1, %v1260_v40 }
 0x23f   : > { %7153 = vmatpush3.xpose.msk.msra.mxu0 %vm521_vm1, %v797_v37  ;;  %7207 = vmatpush3.xpose.msk.msra.mxu1 %vm521_vm1, %v1260_v40  ;;  %v795_v44 = vpop.permute.xlu0 %794  ;;  %v722_v37 = vmul.f32 %v8536_v21, %v8746_v10  ;;  %v1182_v40 = vmul.f32 %v8543_v22, %v8620_v58 }
 0x240   : > { %7154 = vmatprep.subr.msk.mxu0 %vm521_vm1, %v795_v44 }
 0x241   : > { %v1258_v45 = vpop.permute.xlu1 %1257 }
 0x242   : > { %7208 = vmatprep.subr.msk.mxu1 %vm521_vm1, %v1258_v45 }
 0x243   : > { %7155 = vmatpush3.xpose.msk.msra.mxu0 %vm521_vm1, %v795_v44  ;;  %7209 = vmatpush3.xpose.msk.msra.mxu1 %vm521_vm1, %v1258_v45  ;;  %v793_v49 = vpop.permute.xlu0 %792  ;;  %v723_v45 = vmul.f32 %v8536_v21, %v8626_v62 }
 0x244   : > { %7156 = vmatprep.subr.msk.mxu0 %vm521_vm1, %v793_v49 }
 0x245   : > { %v1256_v52 = vpop.permute.xlu1 %1255 }
 0x246   : > { %7210 = vmatprep.subr.msk.mxu1 %vm521_vm1, %v1256_v52 }
 0x247   : > { %7157 = vmatpush3.xpose.msk.msra.mxu0 %vm521_vm1, %v793_v49  ;;  %7211 = vmatpush3.xpose.msk.msra.mxu1 %vm521_vm1, %v1256_v52  ;;  %v791_v57 = vpop.permute.xlu0 %790  ;;  %v1183_v49 = vmul.f32 %v8543_v22, %v8746_v10  ;;  %v724_v52 = vmul.f32 %v8536_v21, %v8730_v7 }
 0x248   : > { %7158 = vmatprep.subr.msk.mxu0 %vm521_vm1, %v791_v57 }
 0x249   : > { %v1254_v59 = vpop.permute.xlu1 %1253 }
 0x24a   : > { %7212 = vmatprep.subr.msk.mxu1 %vm521_vm1, %v1254_v59 }
 0x24b   : > { %7159 = vmatpush3.xpose.msk.msra.mxu0 %vm521_vm1, %v791_v57  ;;  %7213 = vmatpush3.xpose.msk.msra.mxu1 %vm521_vm1, %v1254_v59  ;;  %v789_v63 = vpop.permute.xlu0 %788 }
 0x24c   : > { %7160 = vmatprep.subr.msk.mxu0 %vm521_vm1, %v789_v63 }
 0x24d   : > { %v1252_v0 = vpop.permute.xlu1 %1251 }
 0x24e   : > { %7214 = vmatprep.subr.msk.mxu1 %vm521_vm1, %v1252_v0 }
 0x24f   : > { %7161 = vmatpush3.xpose.msk.msra.mxu0 %vm521_vm1, %v789_v63  ;;  %7215 = vmatpush3.xpose.msk.msra.mxu1 %vm521_vm1, %v1252_v0  ;;  %v787_v6 = vpop.permute.xlu0 %786  ;;  %v1184_v63 = vmul.f32 %v8543_v22, %v8626_v62  ;;  %v725_v0 = vmul.f32 %v8536_v21, %v8721_v4 }
 0x250   : > { %7162 = vmatprep.subr.msk.mxu0 %vm521_vm1, %v787_v6 }
 0x251   : > { %v1250_v5 = vpop.permute.xlu1 %1249 }
 0x252   : > { %7216 = vmatprep.subr.msk.mxu1 %vm521_vm1, %v1250_v5 }
 0x253   : > { %7163 = vmatpush3.xpose.msk.msra.mxu0 %vm521_vm1, %v787_v6  ;;  %7217 = vmatpush3.xpose.msk.msra.mxu1 %vm521_vm1, %v1250_v5  ;;  %v785_v8 = vpop.permute.xlu0 %784  ;;  %v1185_v6 = vmul.f32 %v8543_v22, %v8730_v7  ;;  %v726_v5 = vmul.f32 %v8536_v21, %v8712_v61 }
 0x254   : > { %7164 = vmatprep.subr.msk.mxu0 %vm521_vm1, %v785_v8 }
 0x255   : > { %v1248_v2 = vpop.permute.xlu1 %1247 }
 0x256   : > { %7218 = vmatprep.subr.msk.mxu1 %vm521_vm1, %v1248_v2 }
 0x257   : > { %7165 = vmatpush3.xpose.msk.msra.mxu0 %vm521_vm1, %v785_v8  ;;  %7219 = vmatpush3.xpose.msk.msra.mxu1 %vm521_vm1, %v1248_v2  ;;  %v783_v9 = vpop.permute.xlu0 %782 }
 0x258   : > { %7166 = vmatprep.subr.msk.mxu0 %vm521_vm1, %v783_v9 }
 0x259   : > { %v1246_v3 = vpop.permute.xlu1 %1245 }
 0x25a   : > { %7220 = vmatprep.subr.msk.mxu1 %vm521_vm1, %v1246_v3 }
 0x25b   : > { %7167 = vmatpush3.xpose.msk.msra.mxu0 %vm521_vm1, %v783_v9  ;;  %7221 = vmatpush3.xpose.msk.msra.mxu1 %vm521_vm1, %v1246_v3  ;;  %v781_v11 = vpop.permute.xlu0 %780  ;;  %v1186_v9 = vmul.f32 %v8543_v22, %v8721_v4  ;;  %v727_v3 = vmul.f32 %v8536_v21, %v8703_v53 }
 0x25c   : > { %7168 = vmatprep.subr.msk.mxu0 %vm521_vm1, %v781_v11 }
 0x25d   : > { %v1244_v13 = vpop.permute.xlu1 %1243 }
 0x25e   : > { %7222 = vmatprep.subr.msk.mxu1 %vm521_vm1, %v1244_v13 }
 0x25f   : > { %7169 = vmatpush3.xpose.msk.msra.mxu0 %vm521_vm1, %v781_v11  ;;  %7223 = vmatpush3.xpose.msk.msra.mxu1 %vm521_vm1, %v1244_v13  ;;  %v779_v15 = vpop.permute.xlu0 %778  ;;  %v1187_v11 = vmul.f32 %v8543_v22, %v8712_v61  ;;  %v728_v13 = vmul.f32 %v8536_v21, %v8694_v48 }
 0x260   : > { %7170 = vmatprep.subr.msk.mxu0 %vm521_vm1, %v779_v15 }
 0x261   : > { %v1242_v56 = vpop.permute.xlu1 %1241 }
 0x262   : > { %7224 = vmatprep.subr.msk.mxu1 %vm521_vm1, %v1242_v56 }
 0x263   : > { %7171 = vmatpush3.xpose.msk.msra.mxu0 %vm521_vm1, %v779_v15  ;;  %7225 = vmatpush3.xpose.msk.msra.mxu1 %vm521_vm1, %v1242_v56  ;;  %v777_v1 = vpop.permute.xlu0 %776 }
 0x264   : > { %7172 = vmatprep.subr.msk.mxu0 %vm521_vm1, %v777_v1 }
 0x265   : > { %v1240_v17 = vpop.permute.xlu1 %1239 }
 0x266   : > { %7226 = vmatprep.subr.msk.mxu1 %vm521_vm1, %v1240_v17 }
 0x267   : > { %7173 = vmatpush3.xpose.msk.msra.mxu0 %vm521_vm1, %v777_v1  ;;  %7227 = vmatpush3.xpose.msk.msra.mxu1 %vm521_vm1, %v1240_v17  ;;  %v775_v19 = vpop.permute.xlu0 %774  ;;  %v1188_v1 = vmul.f32 %v8543_v22, %v8703_v53  ;;  %v729_v17 = vmul.f32 %v8536_v21, %v8685_v41 }
 0x268   : > { %7174 = vmatprep.subr.msk.mxu0 %vm521_vm1, %v775_v19 }
 0x269   : > { %v1238_v23 = vpop.permute.xlu1 %1237 }
 0x26a   : > { %7228 = vmatprep.subr.msk.mxu1 %vm521_vm1, %v1238_v23 }
 0x26b   : > { %7175 = vmatpush3.xpose.msk.msra.mxu0 %vm521_vm1, %v775_v19  ;;  %7229 = vmatpush3.xpose.msk.msra.mxu1 %vm521_vm1, %v1238_v23  ;;  %v773_v25 = vpop.permute.xlu0 %772  ;;  %v1189_v19 = vmul.f32 %v8543_v22, %v8694_v48  ;;  %v730_v23 = vmul.f32 %v8536_v21, %v8676_v36 }
 0x26c   : > { %7176 = vmatprep.subr.msk.mxu0 %vm521_vm1, %v773_v25 }
 0x26d   : > { %v1236_v12 = vpop.permute.xlu1 %1235 }
 0x26e   : > { %7230 = vmatprep.subr.msk.mxu1 %vm521_vm1, %v1236_v12 }
 0x26f   : > { %7177 = vmatpush3.xpose.msk.msra.mxu0 %vm521_vm1, %v773_v25  ;;  %7231 = vmatpush3.xpose.msk.msra.mxu1 %vm521_vm1, %v1236_v12  ;;  %v8842_v28 = vpop.permute.xlu0 %1157 }
 0x270   : > { %v1175_v32 = vmul.f32 %v8842_v28, %v8639_v14  ;;  %v1173_v8 = vmul.f32 %v8842_v28, %v8647_v18  ;;  %v1171_v15 = vmul.f32 %v8842_v28, %v8667_v29  ;;  %v1172_v56 = vmul.f32 %v8842_v28, %v8658_v24 }
 0x271   : > { %v1234_v20 = vpop.permute.xlu1 %1233  ;;  %v1169_v25 = vmul.f32 %v8842_v28, %v8685_v41 }
 0x272   : > { %7232 = vmatprep.subr.msk.mxu1 %vm521_vm1, %v1234_v20  ;;  %1892 = vrot.lane.b32.xlu1 %v1175_v32, %s8388_s29  ;;  %v1190_v32 = vmul.f32 %v8543_v22, %v8685_v41 }
 0x273   : > { %7179 = vmatmul.mubr.msk.f32.vlgmr.msra.gmra.mxu0 %vm521_vm1, %v721_v33  ;;  %7233 = vmatpush3.xpose.msk.msra.mxu1 %vm521_vm1, %v1234_v20  ;;  %v731_v20 = vmul.f32 %v8536_v21, %v8667_v29  ;;  %v1191_v33 = vmul.f32 %v8543_v22, %v8676_v36 }
 0x274   : > { %7181 = vmatprep.mubr.msk.f32.mxu0 %vm521_vm1, %v722_v37  ;;  %v732_v37 = vmul.f32 %v8536_v21, %v8658_v24 }
 0x275   : > { %v8857_v44 = vpop.permute.xlu1 %1618 }
 0x276   : > { %7235 = vmatmul.mubr.msk.f32.vlgmr.msra.gmra.mxu1 %vm521_vm1, %v1182_v40  ;;  %v1636_v57 = vmul.f32 %v8857_v44, %v8639_v14  ;;  %v1634_v59 = vmul.f32 %v8857_v44, %v8647_v18  ;;  %v1633_v2 = vmul.f32 %v8857_v44, %v8658_v24  ;;  %v1632_v12 = vmul.f32 %v8857_v44, %v8667_v29 }
 0x277   : > { %7182 = vmatmul.mubr.msk.f32.gmra.mxu0 %vm521_vm1, %v723_v45  ;;  %7237 = vmatprep.mubr.msk.f32.mxu1 %vm521_vm1, %v1183_v49  ;;  %v1167_v40 = vmul.f32 %v8842_v28, %v8703_v53  ;;  %v1631_v45 = vmul.f32 %v8857_v44, %v8676_v36  ;;  %v1192_v49 = vmul.f32 %v8543_v22, %v8667_v29 }
 0x278   : > { %7184 = vmatprep.mubr.msk.f32.mxu0 %vm521_vm1, %v724_v52  ;;  %1683 = vrot.lane.b32.xlu0 %v1636_v57, %s8388_s29  ;;  %v733_v52 = vmul.f32 %v8536_v21, %v8647_v18  ;;  %v1193_v57 = vmul.f32 %v8543_v22, %v8658_v24  ;;  %v1170_v29 = vmul.f32 %v8842_v28, %v8676_v36 }
 0x279   : > { %1679 = vrot.lane.b32.xlu1 %v1634_v59, %s8388_s29  ;;  %v734_v59 = vmul.f32 %v8536_v21, %v8642_v16  ;;  %v1194_v24 = vmul.f32 %v8543_v22, %v8647_v18  ;;  %v1163_v36 = vmul.f32 %v8842_v28, %v8626_v62  ;;  %v1630_v18 = vmul.f32 %v8857_v44, %v8685_v41 }
 0x27a   : > { %7238 = vmatmul.mubr.msk.f32.gmra.mxu1 %vm521_vm1, %v1184_v63  ;;  %v1165_v63 = vmul.f32 %v8842_v28, %v8721_v4  ;;  %v1635_v41 = vmul.f32 %v8857_v44, %v8642_v16 }
 0x27b   : > { %7185 = vmatmul.mubr.msk.f32.gmra.mxu0 %vm521_vm1, %v725_v0  ;;  %7240 = vmatprep.mubr.msk.f32.mxu1 %vm521_vm1, %v1185_v6  ;;  %v735_v0 = vmul.f32 %v8536_v21, %v8639_v14  ;;  %v1195_v6 = vmul.f32 %v8543_v22, %v8642_v16  ;;  %v1196_v21 = vmul.f32 %v8543_v22, %v8639_v14 }
 0x27c   : > { %7187 = vmatprep.mubr.msk.f32.mxu0 %vm521_vm1, %v726_v5  ;;  %1888 = vrot.lane.b32.xlu0 %v1173_v8, %s8388_s29  ;;  %v1161_v5 = vmul.f32 %v8842_v28, %v8620_v58  ;;  %v1629_v8 = vmul.f32 %v8857_v44, %v8694_v48  ;;  %v1168_v22 = vmul.f32 %v8842_v28, %v8694_v48 }
 0x27d   : > { %1677 = vrot.lane.b32.xlu1 %v1633_v2, %s8388_s29  ;;  %v1628_v14 = vmul.f32 %v8857_v44, %v8703_v53  ;;  %v1627_v2 = vmul.f32 %v8857_v44, %v8712_v61  ;;  %v1626_v48 = vmul.f32 %v8857_v44, %v8721_v4  ;;  %v1625_v53 = vmul.f32 %v8857_v44, %v8730_v7 }
 0x27e   : > { %7241 = vmatmul.mubr.msk.f32.gmra.mxu1 %vm521_vm1, %v1186_v9  ;;  %v1166_v9 = vmul.f32 %v8842_v28, %v8712_v61  ;;  %v1624_v61 = vmul.f32 %v8857_v44, %v8626_v62  ;;  %v1623_v4 = vmul.f32 %v8857_v44, %v8746_v10  ;;  %v1621_v62 = vmul.f32 %v8857_v44, %v8623_v60 }
 0x27f   : > { %7188 = vmatmul.mubr.msk.f32.gmra.mxu0 %vm521_vm1, %v727_v3  ;;  %7243 = vmatprep.mubr.msk.f32.mxu1 %vm521_vm1, %v1187_v11  ;;  %v1164_v3 = vmul.f32 %v8842_v28, %v8730_v7  ;;  %v1162_v11 = vmul.f32 %v8842_v28, %v8746_v10  ;;  %v1622_v7 = vmul.f32 %v8857_v44, %v8620_v58 }
 0x280   : > { %7190 = vmatprep.mubr.msk.f32.mxu0 %vm521_vm1, %v728_v13  ;;  %1884 = vrot.lane.b32.xlu0 %v1171_v15, %s8388_s29  ;;  %v1160_v13 = vmul.f32 %v8842_v28, %v8623_v60  ;;  %v1174_v10 = vmul.f32 %v8842_v28, %v8642_v16 }
 0x281   : > { %1886 = vrot.lane.b32.xlu1 %v1172_v56, %s8388_s29 }
 0x282   : > { %7244 = vmatmul.mubr.msk.f32.gmra.mxu1 %vm521_vm1, %v1188_v1 }
 0x283   : > { %7191 = vmatmul.mubr.msk.f32.gmra.mxu0 %vm521_vm1, %v729_v17  ;;  %7246 = vmatprep.mubr.msk.f32.mxu1 %vm521_vm1, %v1189_v19 }
 0x284   : > { %7193 = vmatprep.mubr.msk.f32.mxu0 %vm521_vm1, %v730_v23  ;;  %1880 = vrot.lane.b32.xlu0 %v1169_v25, %s8388_s29 }
 0x285   : > { %1675 = vrot.lane.b32.xlu1 %v1632_v12, %s8388_s29 }
 0x286   : > { %7247 = vmatmul.mubr.msk.f32.gmra.mxu1 %vm521_vm1, %v1190_v32 }
 0x287   : > { %7194 = vmatmul.mubr.msk.f32.gmra.mxu0 %vm521_vm1, %v731_v20  ;;  %7249 = vmatprep.mubr.msk.f32.mxu1 %vm521_vm1, %v1191_v33 }
 0x288   : > { %7196 = vmatprep.mubr.msk.f32.mxu0 %vm521_vm1, %v732_v37  ;;  %1876 = vrot.lane.b32.xlu0 %v1167_v40, %s8388_s29 }
 0x289   : > { %1673 = vrot.lane.b32.xlu1 %v1631_v45, %s8388_s29 }
 0x28a   : > { %7250 = vmatmul.mubr.msk.f32.gmra.mxu1 %vm521_vm1, %v1192_v49 }
 0x28b   : > { %7197 = vmatmul.mubr.msk.f32.gmra.mxu0 %vm521_vm1, %v733_v52  ;;  %7252 = vmatprep.mubr.msk.f32.mxu1 %vm521_vm1, %v1193_v57 }
 0x28c   : > { %7199 = vmatprep.mubr.msk.f32.mxu0 %vm521_vm1, %v734_v59  ;;  %1872 = vrot.lane.b32.xlu0 %v1165_v63, %s8388_s29 }
 0x28d   : > { %1882 = vrot.lane.b32.xlu1 %v1170_v29, %s8388_s29 }
 0x28e   : > { %7253 = vmatmul.mubr.msk.f32.gmra.mxu1 %vm521_vm1, %v1194_v24 }
 0x28f   : > { %7200 = vmatmul.mubr.msk.f32.gmra.mxu0 %vm521_vm1, %v735_v0  ;;  %7255 = vmatprep.mubr.msk.f32.mxu1 %vm521_vm1, %v1195_v6 }
 0x290   : > { %1868 = vrot.lane.b32.xlu0 %v1163_v36, %s8388_s29 }
 0x291   : > { %1671 = vrot.lane.b32.xlu1 %v1630_v18, %s8388_s29  ;;  %v281_v18 = vld [vmem:[%s11352_s1 + $0x8] sm:$0xff] }
 0x292   : > { %7256 = vmatmul.mubr.msk.f32.gmra.mxu1 %vm521_vm1, %v1196_v21 }
 0x294   : > { %1864 = vrot.lane.b32.xlu0 %v1161_v5, %s8388_s29 }
 0x295   : > { %1669 = vrot.lane.b32.xlu1 %v1629_v8, %s8388_s29 }
 0x298   : > { %1681 = vrot.lane.b32.xlu0 %v1635_v41, %s8388_s29 }
 0x299   : > { %1878 = vrot.lane.b32.xlu1 %v1168_v22, %s8388_s29 }
 0x29d   : > { %1667 = vrot.lane.b32.xlu1 %v1628_v14, %s8388_s29 }
 0x2a1   : > { %1665 = vrot.lane.b32.xlu1 %v1627_v2, %s8388_s29  ;;  %v280_v2 = vld [vmem:[%s11352_s1] sm:$0xff] }
 0x2a5   : > { %1874 = vrot.lane.b32.xlu1 %v1166_v9, %s8388_s29 }
 0x2a9   : > { %1663 = vrot.lane.b32.xlu1 %v1626_v48, %s8388_s29 }
 0x2ad   : > { %1661 = vrot.lane.b32.xlu1 %v1625_v53, %s8388_s29 }
 0x2b1   : > { %1870 = vrot.lane.b32.xlu1 %v1164_v3, %s8388_s29 }
 0x2b5   : > { %1659 = vrot.lane.b32.xlu1 %v1624_v61, %s8388_s29 }
 0x2b9   : > { %1657 = vrot.lane.b32.xlu1 %v1623_v4, %s8388_s29 }
 0x2bd   : > { %1866 = vrot.lane.b32.xlu1 %v1162_v11, %s8388_s29 }
 0x2c1   : > { %1655 = vrot.lane.b32.xlu1 %v1622_v7, %s8388_s29 }
 0x2c5   : > { %1653 = vrot.lane.b32.xlu1 %v1621_v62, %s8388_s29 }
 0x2c9   : > { %1862 = vrot.lane.b32.xlu1 %v1160_v13, %s8388_s29 }
 0x2cd   : > { %1890 = vrot.lane.b32.xlu1 %v1174_v10, %s8388_s29 }
 0x2e4   : > { %v1893_v15 = vpop.permute.xlu1 %1892 }
 0x2e5   : > { %7314 = vmatprep.subr.mxu1 %v1893_v15 }
 0x2e6   : > { %7315 = vmatpush3.msra.mxu1 %v1893_v15  ;;  %v283_v15 = vld [vmem:[%s11352_s1 + $0x18] sm:$0xff] }
 0x2ea   : > { %v1684_v58 = vpop.permute.xlu0 %1683 }
 0x2eb   : > { %v1680_v56 = vpop.permute.xlu1 %1679  ;;  %7258 = vmatprep.subr.mxu0 %v1684_v58 }
 0x2ec   : > { %7259 = vmatpush3.msra.mxu0 %v1684_v58 }
 0x2ee   : > { %v9034_v44 = vpop.permute.xlu0 %1888 }
 0x2ef   : > { %v1678_v1 = vpop.permute.xlu1 %1677 }
 0x2f2   : > { %v9036_v17 = vpop.permute.xlu0 %1884 }
 0x2f3   : > { %v9038_v60 = vpop.permute.xlu1 %1886 }
 0x2f6   : > { %v9040_v19 = vpop.permute.xlu0 %1880 }
 0x2f7   : > { %v1676_v23 = vpop.permute.xlu1 %1675 }
 0x2fa   : > { %v9042_v16 = vpop.permute.xlu0 %1876 }
 0x2fb   : > { %v1674_v28 = vpop.permute.xlu1 %1673 }
 0x2fe   : > { %v9044_v25 = vpop.permute.xlu0 %1872 }
 0x2ff   : > { %v9046_v12 = vpop.permute.xlu1 %1882 }
 0x302   : > { %v9048_v32 = vpop.permute.xlu0 %1868 }
 0x303   : > { %v1672_v20 = vpop.permute.xlu1 %1671 }
 0x306   : > { %v9050_v33 = vpop.permute.xlu0 %1864 }
 0x307   : > { %v1670_v37 = vpop.permute.xlu1 %1669 }
 0x30a   : > { %v1682_v40 = vpop.permute.xlu0 %1681 }
 0x30b   : > { %v9052_v45 = vpop.permute.xlu1 %1878  ;;  %7260 = vmatprep.subr.mxu0 %v1682_v40 }
 0x30c   : > { %7261 = vmatpush3.msra.mxu0 %v1682_v40  ;;  %v282_v40 = vld [vmem:[%s11352_s1 + $0x10] sm:$0xff] }
 0x30d   : > { %7262 = vmatprep.subr.mxu0 %v1680_v56 }
 0x30e   : > { %7263 = vmatpush3.msra.mxu0 %v1680_v56 }
 0x30f   : > { %v1668_v49 = vpop.permute.xlu1 %1667  ;;  %7264 = vmatprep.subr.mxu0 %v1678_v1 }
 0x310   : > { %7265 = vmatpush3.msra.mxu0 %v1678_v1 }
 0x311   : > { %7266 = vmatprep.subr.mxu0 %v1676_v23 }
 0x312   : > { %7267 = vmatpush3.msra.mxu0 %v1676_v23 }
 0x313   : > { %v1666_v52 = vpop.permute.xlu1 %1665  ;;  %7268 = vmatprep.subr.mxu0 %v1674_v28 }
 0x314   : > { %7269 = vmatpush3.msra.mxu0 %v1674_v28 }
 0x315   : > { %7270 = vmatprep.subr.mxu0 %v1672_v20 }
 0x316   : > { %7271 = vmatpush3.msra.mxu0 %v1672_v20 }
 0x317   : > { %v9054_v57 = vpop.permute.xlu1 %1874  ;;  %7272 = vmatprep.subr.mxu0 %v1670_v37 }
 0x318   : > { %7273 = vmatpush3.msra.mxu0 %v1670_v37 }
 0x319   : > { %7274 = vmatprep.subr.mxu0 %v1668_v49 }
 0x31a   : > { %7275 = vmatpush3.msra.mxu0 %v1668_v49 }
 0x31b   : > { %v1664_v59 = vpop.permute.xlu1 %1663  ;;  %7276 = vmatprep.subr.mxu0 %v1666_v52 }
 0x31c   : > { %7277 = vmatpush3.msra.mxu0 %v1666_v52 }
 0x31d   : > { %7278 = vmatprep.subr.mxu0 %v1664_v59 }
 0x31e   : > { %7279 = vmatpush3.msra.mxu0 %v1664_v59 }
 0x31f   : > { %v1662_v63 = vpop.permute.xlu1 %1661 }
 0x320   : > { %7280 = vmatprep.subr.mxu0 %v1662_v63 }
 0x321   : > { %7281 = vmatpush3.msra.mxu0 %v1662_v63 }
 0x323   : > { %v9056_v29 = vpop.permute.xlu1 %1870 }
 0x327   : > { %v1660_v24 = vpop.permute.xlu1 %1659 }
 0x328   : > { %7282 = vmatprep.subr.mxu0 %v1660_v24 }
 0x329   : > { %7283 = vmatpush3.msra.mxu0 %v1660_v24 }
 0x32b   : > { %v1658_v0 = vpop.permute.xlu1 %1657 }
 0x32c   : > { %7284 = vmatprep.subr.mxu0 %v1658_v0 }
 0x32d   : > { %7285 = vmatpush3.msra.mxu0 %v1658_v0 }
 0x32f   : > { %v9058_v6 = vpop.permute.xlu1 %1866 }
 0x333   : > { %v1656_v36 = vpop.permute.xlu1 %1655  ;;  %v7180_v21 = vpop.f32.mrf.mxu0 }
 0x334   : > { %v1030_v5 = vmul.f32 0.25, %v7180_v21  ;;  %7286 = vmatprep.subr.mxu0 %v1656_v36 }
 0x335   : > { %v950_v8 = vpop.f32.mrf.mxu0  ;;  %7287 = vmatpush3.msra.mxu0 %v1656_v36 }
 0x336   : > { %v1046_v41 = vadd.f32 %v1030_v5, %v281_v18  ;;  %v1029_v22 = vmul.f32 0.25, %v950_v8  ;;  %v7236_v14 = vpop.f32.mrf.mxu1 }
 0x337   : > { %v1491_v9 = vmul.f32 0.25, %v7236_v14  ;;  %v1654_v48 = vpop.permute.xlu1 %1653  ;;  %v7183_v53 = vpop.f32.mrf.mxu0 }
 0x338   : > { %v1063_v3 = vmul.f32 1.442695, %v1046_v41  ;;  %7288 = vmatprep.subr.mxu0 %v1654_v48  ;;  %v1411_v61 = vpop.f32.mrf.mxu1  ;;  %v1045_v7 = vadd.f32 %v1029_v22, %v280_v2  ;;  %v1032_v62 = vmul.f32 0.25, %v7183_v53  ;;  %v9077_v41 = vld [vmem:[%s11352_s1 + $0x20] sm:$0xff] }
 0x339   : > { %v1507_v4 = vadd.f32 %v1491_v9, %v281_v18  ;;  %v1490_v11 = vmul.f32 0.25, %v1411_v61  ;;  %7289 = vmatpush3.msra.mxu0 %v1654_v48  ;;  %v960_v59 = vpop.f32.mrf.mxu0 }
 0x33a   : > { %7919 = vpow2.f32 %v1063_v3  ;;  %v7239_v13 = vpop.f32.mrf.mxu1  ;;  %v1061_v20 = vmul.f32 1.442695, %v1045_v7  ;;  %v1048_v37 = vadd.f32 %v1032_v62, %v283_v15  ;;  %v1031_v5 = vmul.f32 0.25, %v960_v59  ;;  %v285_v62 = vld [vmem:[%s11352_s1 + $0x28] sm:$0xff] }
 0x33b   : > { %v1524_v10 = vmul.f32 1.442695, %v1507_v4  ;;  %v1506_v58 = vadd.f32 %v1490_v11, %v280_v2  ;;  %v9069_v56 = vpop.permute.xlu1 %1862  ;;  %v1493_v49 = vmul.f32 0.25, %v7239_v13  ;;  %v7186_v14 = vpop.f32.mrf.mxu0  ;;  %v9089_v11 = vld [vmem:[%s11352_s1 + $0x30] sm:$0xff] }
 0x33c   : > { %v1421_v1 = vpop.f32.mrf.mxu1  ;;  %v1067_v21 = vmul.f32 1.442695, %v1048_v37  ;;  %v1047_v3 = vadd.f32 %v1031_v5, %v282_v40  ;;  %v1034_v4 = vmul.f32 0.25, %v7186_v14 }
 0x33d   : > { %7921 = vpow2.f32 %v1524_v10  ;;  %v1522_v23 = vmul.f32 1.442695, %v1506_v58  ;;  %v1492_v28 = vmul.f32 0.25, %v1421_v1  ;;  %v1509_v8 = vadd.f32 %v1493_v49, %v283_v15  ;;  %v970_v37 = vpop.f32.mrf.mxu0 }
 0x33e   : > { %v7242_v52 = vpop.f32.mrf.mxu1  ;;  %v1065_v1 = vmul.f32 1.442695, %v1047_v3 }
 0x33f   : > { %7923 = vpow2.f32 %v1522_v23  ;;  %v1508_v63 = vadd.f32 %v1492_v28, %v282_v40  ;;  %v1891_v24 = vpop.permute.xlu1 %1890  ;;  %v1528_v61 = vmul.f32 1.442695, %v1509_v8  ;;  %v1050_v23 = vadd.f32 %v1034_v4, %v285_v62 }
 0x340   : > { %7316 = vmatprep.subr.mxu1 %v1891_v24  ;;  %v1431_v0 = vpop.f32.mrf.mxu1  ;;  %7925 = vpow2.f32 %v1061_v20  ;;  %v1495_v28 = vmul.f32 0.25, %v7242_v52  ;;  %v9109_v20 = vld [vmem:[%s11352_s1 + $0x40] sm:$0xff] }
 0x341   : > { %v1526_v36 = vmul.f32 1.442695, %v1508_v63  ;;  %v1494_v18 = vmul.f32 0.25, %v1431_v0  ;;  %7317 = vmatpush3.msra.mxu1 %v1891_v24  ;;  %v1071_v63 = vmul.f32 1.442695, %v1050_v23  ;;  %v1033_v24 = vmul.f32 0.25, %v970_v37 }
 0x342   : > { %7318 = vmatprep.subr.mxu1 %v9034_v44  ;;  %v9080_v22 = vpop.f32.mrf.mxu1  ;;  %v1511_v0 = vadd.f32 %v1495_v28, %v285_v62 }
 0x343   : > { %7927 = vpow2.f32 %v1526_v36  ;;  %v1510_v2 = vadd.f32 %v1494_v18, %v9077_v41  ;;  %7319 = vmatpush3.msra.mxu1 %v9034_v44 }
 0x344   : > { %7320 = vmatprep.subr.mxu1 %v9038_v60  ;;  %v1441_v9 = vpop.f32.mrf.mxu1  ;;  %7929 = vpow2.f32 %v1067_v21  ;;  %v7189_v21 = vpop.f32.mrf.mxu0 }
 0x345   : > { %v1530_v48 = vmul.f32 1.442695, %v1510_v2  ;;  %v1496_v53 = vmul.f32 0.25, %v1441_v9  ;;  %7321 = vmatpush3.msra.mxu1 %v9038_v60  ;;  %v1049_v9 = vadd.f32 %v1033_v24, %v9077_v41 }
 0x346   : > { %7322 = vmatprep.subr.mxu1 %v9036_v17  ;;  %v9092_v7 = vpop.f32.mrf.mxu1  ;;  %v980_v28 = vpop.f32.mrf.mxu0 }
 0x347   : > { %v9094_v44 = vpop.eup %7919  ;;  %7931 = vpow2.f32 %v1530_v48  ;;  %v1512_v60 = vadd.f32 %v1496_v53, %v9089_v11  ;;  %7323 = vmatpush3.msra.mxu1 %v9036_v17  ;;  %v1532_v48 = vmul.f32 1.442695, %v1511_v0  ;;  %v1036_v53 = vmul.f32 0.25, %v7189_v21 }
 0x348   : > { %7324 = vmatprep.subr.mxu1 %v9046_v12  ;;  %1095 = vadd.xlane.f32.xlu0 %v9094_v44  ;;  %v1451_v13 = vpop.f32.mrf.mxu1  ;;  %7933 = vpow2.f32 %v1528_v61 }
 0x349   : > { %v1534_v10 = vmul.f32 1.442695, %v1512_v60  ;;  %v1498_v15 = vmul.f32 0.25, %v1451_v13  ;;  %7325 = vmatpush3.msra.mxu1 %v9046_v12 }
 0x34a   : > { %v9104_v58 = vpop.eup %7921  ;;  %7326 = vmatprep.subr.mxu1 %v9040_v19  ;;  %v9112_v17 = vpop.f32.mrf.mxu1 }
 0x34b   : > { %7935 = vpow2.f32 %v1534_v10  ;;  %v1514_v40 = vadd.f32 %v1498_v15, %v9109_v20  ;;  %7327 = vmatpush3.msra.mxu1 %v9040_v19  ;;  %v9125_v19 = vld [vmem:[%s11352_s1 + $0x50] sm:$0xff]  ;;  %v1069_v10 = vmul.f32 1.442695, %v1049_v9 }
 0x34c   : > { %v9116_v12 = vpop.eup %7923  ;;  %7328 = vmatprep.subr.mxu1 %v9052_v45  ;;  %1556 = vadd.xlane.f32.xlu0 %v9104_v58  ;;  %v1461_v49 = vpop.f32.mrf.mxu1  ;;  %7937 = vpow2.f32 %v1065_v1  ;;  %v1497_v1 = vmul.f32 0.25, %v9080_v22 }
 0x34d   : > { %v1538_v52 = vmul.f32 1.442695, %v1514_v40  ;;  %v1500_v59 = vmul.f32 0.25, %v1461_v49  ;;  %7329 = vmatpush3.msra.mxu1 %v9052_v45  ;;  %1554 = vadd.xlane.f32.xlu1 %v9116_v12  ;;  %v9130_v18 = vpop.eup %7925  ;;  %v1035_v49 = vmul.f32 0.25, %v980_v28 }
 0x34e   : > { %7330 = vmatprep.subr.mxu1 %v9042_v16  ;;  %v9128_v36 = vpop.f32.mrf.mxu1 }
 0x34f   : > { %7939 = vpow2.f32 %v1538_v52  ;;  %v1516_v45 = vadd.f32 %v1500_v59, %v9125_v19  ;;  %7331 = vmatpush3.msra.mxu1 %v9042_v16  ;;  %v9144_v16 = vld [vmem:[%s11352_s1 + $0x60] sm:$0xff] }
 0x350   : > { %v9134_v5 = vpop.eup %7927  ;;  %7332 = vmatprep.subr.mxu1 %v9054_v57  ;;  %1093 = vadd.xlane.f32.xlu0 %v9130_v18  ;;  %v1471_v8 = vpop.f32.mrf.mxu1  ;;  %7941 = vpow2.f32 %v1071_v63 }
 0x351   : > { %v1542_v14 = vmul.f32 1.442695, %v1516_v45  ;;  %v1502_v2 = vmul.f32 0.25, %v1471_v8  ;;  %7333 = vmatpush3.msra.mxu1 %v9054_v57  ;;  %1558 = vadd.xlane.f32.xlu1 %v9134_v5  ;;  %v9149_v61 = vpop.eup %7929  ;;  %v287_v57 = vld [vmem:[%s11352_s1 + $0x38] sm:$0xff] }
 0x352   : > { %7334 = vmatprep.subr.mxu1 %v9044_v25  ;;  %v9147_v3 = vpop.f32.mrf.mxu1  ;;  %v1052_v15 = vadd.f32 %v1036_v53, %v287_v57  ;;  %v1513_v52 = vadd.f32 %v1497_v1, %v287_v57  ;;  %v291_v1 = vld [vmem:[%s11352_s1 + $0x58] sm:$0xff] }
 0x353   : > { %7943 = vpow2.f32 %v1542_v14  ;;  %v1518_v41 = vadd.f32 %v1502_v2, %v9144_v16  ;;  %7335 = vmatpush3.msra.mxu1 %v9044_v25  ;;  %v9166_v25 = vld [vmem:[%s11352_s1 + $0x70] sm:$0xff]  ;;  %v1499_v14 = vmul.f32 0.25, %v9092_v7 }
 0x354   : > { %v9156_v4 = vpop.eup %7931  ;;  %7336 = vmatprep.subr.mxu1 %v9056_v29  ;;  %1099 = vadd.xlane.f32.xlu0 %v9149_v61  ;;  %v1481_v62 = vpop.f32.mrf.mxu1  ;;  %7945 = vpow2.f32 %v1532_v48  ;;  %v1075_v40 = vmul.f32 1.442695, %v1052_v15  ;;  %v1536_v0 = vmul.f32 1.442695, %v1513_v52 }
 0x355   : > { %v1546_v60 = vmul.f32 1.442695, %v1518_v41  ;;  %v1504_v13 = vmul.f32 0.25, %v1481_v62  ;;  %7337 = vmatpush3.msra.mxu1 %v9056_v29  ;;  %1562 = vadd.xlane.f32.xlu1 %v9156_v4  ;;  %v9169_v23 = vpop.eup %7933 }
 0x356   : > { %7338 = vmatprep.subr.mxu1 %v9048_v32 }
 0x357   : > { %7947 = vpow2.f32 %v1546_v60  ;;  %v1520_v29 = vadd.f32 %v1504_v13, %v9166_v25  ;;  %7339 = vmatpush3.msra.mxu1 %v9048_v32  ;;  %v7192_v32 = vpop.f32.mrf.mxu0 }
 0x358   : > { %v9173_v37 = vpop.eup %7935  ;;  %7340 = vmatprep.subr.mxu1 %v9058_v6  ;;  %1560 = vadd.xlane.f32.xlu0 %v9169_v23  ;;  %7949 = vpow2.f32 %v1069_v10  ;;  %v1038_v24 = vmul.f32 0.25, %v7192_v32 }
 0x359   : > { %v1550_v22 = vmul.f32 1.442695, %v1520_v29  ;;  %7341 = vmatpush3.msra.mxu1 %v9058_v6  ;;  %1566 = vadd.xlane.f32.xlu1 %v9173_v37  ;;  %v9180_v59 = vpop.eup %7937  ;;  %v1051_v6 = vadd.f32 %v1035_v49, %v9089_v11  ;;  %v990_v2 = vpop.f32.mrf.mxu0 }
 0x35a   : > { %7342 = vmatprep.subr.mxu1 %v9050_v33  ;;  %v1037_v53 = vmul.f32 0.25, %v990_v2 }
 0x35b   : > { %7951 = vpow2.f32 %v1550_v22  ;;  %7343 = vmatpush3.msra.mxu1 %v9050_v33  ;;  %v289_v33 = vld [vmem:[%s11352_s1 + $0x48] sm:$0xff]  ;;  %v7195_v62 = vpop.f32.mrf.mxu0  ;;  %v1501_v22 = vmul.f32 0.25, %v9112_v17 }
 0x35c   : > { %v9183_v63 = vpop.eup %7939  ;;  %7344 = vmatprep.subr.mxu1 %v9069_v56  ;;  %1097 = vadd.xlane.f32.xlu0 %v9180_v59  ;;  %7953 = vpow2.f32 %v1075_v40  ;;  %v1054_v8 = vadd.f32 %v1038_v24, %v289_v33  ;;  %v1515_v57 = vadd.f32 %v1499_v14, %v289_v33  ;;  %v1053_v7 = vadd.f32 %v1037_v53, %v9109_v20 }
 0x35d   : > { %7345 = vmatpush3.msra.mxu1 %v9069_v56  ;;  %1570 = vadd.xlane.f32.xlu1 %v9183_v63  ;;  %v9190_v21 = vpop.eup %7941  ;;  %v1073_v56 = vmul.f32 1.442695, %v1051_v6  ;;  %7955 = vpow2.f32 %v1536_v0  ;;  %v1040_v13 = vmul.f32 0.25, %v7195_v62  ;;  %v1000_v49 = vpop.f32.mrf.mxu0  ;;  %v1517_v32 = vadd.f32 %v1501_v22, %v291_v1 }
 0x35e   : > { %v1079_v48 = vmul.f32 1.442695, %v1054_v8  ;;  %v1540_v10 = vmul.f32 1.442695, %v1515_v57  ;;  %v1077_v28 = vmul.f32 1.442695, %v1053_v7 }
 0x35f   : > { %7957 = vpow2.f32 %v1073_v56  ;;  %v1056_v29 = vadd.f32 %v1040_v13, %v291_v1  ;;  %v1039_v52 = vmul.f32 0.25, %v1000_v49  ;;  %v7198_v24 = vpop.f32.mrf.mxu0  ;;  %v1544_v56 = vmul.f32 1.442695, %v1517_v32  ;;  %v293_v8 = vld [vmem:[%s11352_s1 + $0x68] sm:$0xff] }
 0x360   : > { %v9195_v45 = vpop.eup %7943  ;;  %1103 = vadd.xlane.f32.xlu0 %v9190_v21  ;;  %7959 = vpow2.f32 %v1079_v48  ;;  %v1042_v33 = vmul.f32 0.25, %v7198_v24  ;;  %v1503_v53 = vmul.f32 0.25, %v9128_v36  ;;  %v295_v24 = vld [vmem:[%s11352_s1 + $0x78] sm:$0xff] }
 0x361   : > { %1574 = vadd.xlane.f32.xlu1 %v9195_v45  ;;  %v9200_v11 = vpop.eup %7945  ;;  %7961 = vpow2.f32 %v1540_v10  ;;  %v1083_v20 = vmul.f32 1.442695, %v1056_v29  ;;  %v1055_v0 = vadd.f32 %v1039_v52, %v9125_v19  ;;  %v1010_v14 = vpop.f32.mrf.mxu0 }
 0x362   : > { %7963 = vpow2.f32 %v1077_v28  ;;  %v1058_v48 = vadd.f32 %v1042_v33, %v293_v8  ;;  %v1041_v7 = vmul.f32 0.25, %v1010_v14  ;;  %v1519_v13 = vadd.f32 %v1503_v53, %v293_v8 }
 0x363   : > { %7965 = vpow2.f32 %v1083_v20  ;;  %v1081_v2 = vmul.f32 1.442695, %v1055_v0  ;;  %v7201_v62 = vpop.f32.mrf.mxu0  ;;  %v1505_v33 = vmul.f32 0.25, %v9147_v3 }
 0x364   : > { %v9202_v9 = vpop.eup %7947  ;;  %1564 = vadd.xlane.f32.xlu0 %v9200_v11  ;;  %7967 = vpow2.f32 %v1544_v56  ;;  %v1087_v19 = vmul.f32 1.442695, %v1058_v48  ;;  %v1057_v28 = vadd.f32 %v1041_v7, %v9144_v16  ;;  %v1548_v29 = vmul.f32 1.442695, %v1519_v13 }
 0x365   : > { %1578 = vadd.xlane.f32.xlu1 %v9202_v9  ;;  %v9206_v41 = vpop.eup %7949  ;;  %7969 = vpow2.f32 %v1081_v2  ;;  %v1020_v1 = vpop.f32.mrf.mxu0  ;;  %v1044_v20 = vmul.f32 0.25, %v7201_v62 }
 0x366   : > { %7971 = vpow2.f32 %v1087_v19  ;;  %v1043_v22 = vmul.f32 0.25, %v1020_v1  ;;  %v1085_v49 = vmul.f32 1.442695, %v1057_v28 }
 0x367   : > { %7973 = vpow2.f32 %v1548_v29  ;;  %v1060_v16 = vadd.f32 %v1044_v20, %v295_v24 }
 0x368   : > { %v9208_v60 = vpop.eup %7951  ;;  %1101 = vadd.xlane.f32.xlu0 %v9206_v41  ;;  %v1059_v52 = vadd.f32 %v1043_v22, %v9166_v25  ;;  %7975 = vpow2.f32 %v1085_v49  ;;  %v1521_v25 = vadd.f32 %v1505_v33, %v295_v24 }
 0x369   : > { %1582 = vadd.xlane.f32.xlu1 %v9208_v60  ;;  %v9213_v15 = vpop.eup %7953  ;;  %v1091_v8 = vmul.f32 1.442695, %v1060_v16 }
 0x36a   : > { %v9220_v40 = vpop.eup %7955  ;;  %v1089_v0 = vmul.f32 1.442695, %v1059_v52  ;;  %v1552_v2 = vmul.f32 1.442695, %v1521_v25 }
 0x36c   : > { %1107 = vadd.xlane.f32.xlu0 %v9213_v15  ;;  %v9223_v6 = vpop.eup %7957  ;;  %7977 = vpow2.f32 %v1089_v0 }
 0x36d   : > { %v9227_v17 = vpop.eup %7959  ;;  %7979 = vpow2.f32 %v1091_v8 }
 0x36e   : > { %v9234_v57 = vpop.eup %7961  ;;  %7981 = vpow2.f32 %v1552_v2 }
 0x36f   : > { %v9237_v10 = vpop.eup %7963 }
 0x370   : > { %1568 = vadd.xlane.f32.xlu0 %v9220_v40  ;;  %v9241_v36 = vpop.eup %7965 }
 0x371   : > { %v9245_v32 = vpop.eup %7967 }
 0x372   : > { %v9252_v56 = vpop.eup %7969 }
 0x373   : > { %v9255_v14 = vpop.eup %7971 }
 0x374   : > { %1105 = vadd.xlane.f32.xlu0 %v9223_v6  ;;  %v9258_v48 = vpop.eup %7973 }
 0x375   : > { %v9261_v53 = vpop.eup %7975 }
 0x378   : > { %1111 = vadd.xlane.f32.xlu0 %v9227_v17 }
 0x379   : > { %v9264_v3 = vpop.eup %7977 }
 0x37a   : > { %v9267_v62 = vpop.eup %7979 }
 0x37b   : > { %v9270_v19 = vpop.eup %7981 }
 0x37c   : > { %1572 = vadd.xlane.f32.xlu0 %v9234_v57 }
 0x380   : > { %1109 = vadd.xlane.f32.xlu0 %v9237_v10 }
 0x384   : > { %1115 = vadd.xlane.f32.xlu0 %v9241_v36 }
 0x388   : > { %1576 = vadd.xlane.f32.xlu0 %v9245_v32 }
 0x38c   : > { %1113 = vadd.xlane.f32.xlu0 %v9252_v56 }
 0x390   : > { %1119 = vadd.xlane.f32.xlu0 %v9255_v14 }
 0x394   : > { %1580 = vadd.xlane.f32.xlu0 %v9258_v48 }
 0x398   : > { %1117 = vadd.xlane.f32.xlu0 %v9261_v53 }
 0x39c   : > { %1121 = vadd.xlane.f32.xlu0 %v9264_v3 }
 0x3a0   : > { %1123 = vadd.xlane.f32.xlu0 %v9267_v62 }
 0x3a4   : > { %1584 = vadd.xlane.f32.xlu0 %v9270_v19 }
 0x3d1   : > { %v1096_v7 = vpop.xlane.xlu0 %1095 }
 0x3d5   : > { %v1557_v13 = vpop.xlane.xlu0 %1556 }
 0x3d6   : > { %7983 = vrcp.f32 %v1557_v13  ;;  %v1555_v1 = vpop.xlane.xlu1 %1554 }
 0x3d7   : > { %7985 = vrcp.f32 %v1555_v1 }
 0x3d8   : > { %7987 = vrcp.f32 %v1096_v7 }
 0x3d9   : > { %v1094_v28 = vpop.xlane.xlu0 %1093 }
 0x3da   : > { %7989 = vrcp.f32 %v1094_v28  ;;  %v1559_v29 = vpop.xlane.xlu1 %1558 }
 0x3db   : > { %7991 = vrcp.f32 %v1559_v29 }
 0x3dd   : > { %v1100_v22 = vpop.xlane.xlu0 %1099 }
 0x3de   : > { %v1563_v49 = vpop.xlane.xlu1 %1562 }
 0x3df   : > { %7993 = vrcp.f32 %v1563_v49 }
 0x3e1   : > { %v1561_v20 = vpop.xlane.xlu0 %1560 }
 0x3e2   : > { %7995 = vrcp.f32 %v1561_v20  ;;  %v1567_v29 = vpop.xlane.xlu1 %1566 }
 0x3e3   : > { %v7984_v52 = vpop.eup %7983  ;;  %7997 = vrcp.f32 %v1100_v22 }
 0x3e4   : > { %v7986_v24 = vpop.eup %7985  ;;  %v1589_v8 = vmul.f32 %v7984_v52, %v9104_v58 }
 0x3e5   : > { %v1098_v16 = vpop.xlane.xlu0 %1097  ;;  %v1587_v0 = vmul.f32 %v7986_v24, %v9116_v12  ;;  %v7988_v33 = vpop.eup %7987 }
 0x3e6   : > { %7999 = vrcp.f32 %v1098_v16  ;;  %v1128_v1 = vmul.f32 %v7988_v33, %v9094_v44 }
 0x3e7   : > { %v7990_v25 = vpop.eup %7989  ;;  %7290 = vmatprep.mubr.f32.mxu0 %v1587_v0  ;;  %8001 = vrcp.f32 %v1567_v29  ;;  %v1571_v0 = vpop.xlane.xlu1 %1570 }
 0x3e8   : > { %v7992_v2 = vpop.eup %7991  ;;  %7291 = vmatmul.mubr.f32.vlgmr.msra.gmra.mxu0 %v1589_v8  ;;  %v1126_v7 = vmul.f32 %v7990_v25, %v9130_v18 }
 0x3e9   : > { %v1104_v13 = vpop.xlane.xlu0 %1103  ;;  %v1591_v28 = vmul.f32 %v7992_v2, %v9134_v5 }
 0x3ea   : > { %7346 = vmatprep.mubr.f32.mxu1 %v1126_v7 }
 0x3eb   : > { %7347 = vmatmul.mubr.f32.vlgmr.msra.gmra.mxu1 %v1128_v1  ;;  %7293 = vmatprep.mubr.f32.mxu0 %v1591_v28  ;;  %v1575_v28 = vpop.xlane.xlu1 %1574 }
 0x3ec   : > { %v7994_v22 = vpop.eup %7993 }
 0x3ed   : > { %v1565_v12 = vpop.xlane.xlu0 %1564  ;;  %v1595_v18 = vmul.f32 %v7994_v22, %v9156_v4 }
 0x3ee   : > { %8003 = vrcp.f32 %v1565_v12 }
 0x3ef   : > { %v7996_v58 = vpop.eup %7995  ;;  %8005 = vrcp.f32 %v1104_v13 }
 0x3f0   : > { %v1593_v49 = vmul.f32 %v7996_v58, %v9169_v23  ;;  %v7998_v52 = vpop.eup %7997 }
 0x3f1   : > { %v1102_v20 = vpop.xlane.xlu0 %1101  ;;  %v1132_v16 = vmul.f32 %v7998_v52, %v9149_v61  ;;  %v1579_v52 = vpop.xlane.xlu1 %1578 }
 0x3f2   : > { %8007 = vrcp.f32 %v1102_v20  ;;  %7294 = vmatmul.mubr.f32.gmra.mxu0 %v1593_v49 }
 0x3f3   : > { %v8000_v44 = vpop.eup %7999  ;;  %7296 = vmatprep.mubr.f32.mxu0 %v1595_v18  ;;  %8009 = vrcp.f32 %v1571_v0 }
 0x3f4   : > { %v1130_v5 = vmul.f32 %v8000_v44, %v9180_v59  ;;  %v8002_v23 = vpop.eup %8001 }
 0x3f5   : > { %v1108_v24 = vpop.xlane.xlu0 %1107  ;;  %v1599_v2 = vmul.f32 %v8002_v23, %v9173_v37 }
 0x3f6   : > { %7349 = vmatprep.mubr.f32.mxu1 %v1130_v5 }
 0x3f7   : > { %7350 = vmatmul.mubr.f32.gmra.mxu1 %v1132_v16 }
 0x3f9   : > { %v1569_v33 = vpop.xlane.xlu0 %1568 }
 0x3fa   : > { %8011 = vrcp.f32 %v1569_v33 }
 0x3fb   : > { %v8004_v8 = vpop.eup %8003  ;;  %8013 = vrcp.f32 %v1108_v24 }
 0x3fc   : > { %v1597_v4 = vmul.f32 %v8004_v8, %v9200_v11  ;;  %v8006_v7 = vpop.eup %8005  ;;  %v1583_v8 = vpop.xlane.xlu1 %1582 }
 0x3fd   : > { %v1106_v25 = vpop.xlane.xlu0 %1105  ;;  %v1136_v1 = vmul.f32 %v8006_v7, %v9190_v21 }
 0x3fe   : > { %8015 = vrcp.f32 %v1106_v25  ;;  %7297 = vmatmul.mubr.f32.gmra.mxu0 %v1597_v4 }
 0x3ff   : > { %v8008_v59 = vpop.eup %8007  ;;  %7299 = vmatprep.mubr.f32.mxu0 %v1599_v2  ;;  %8017 = vrcp.f32 %v1575_v28 }
 0x400   : > { %v1134_v61 = vmul.f32 %v8008_v59, %v9206_v41  ;;  %v8010_v11 = vpop.eup %8009 }
 0x401   : > { %v1112_v13 = vpop.xlane.xlu0 %1111  ;;  %v1603_v58 = vmul.f32 %v8010_v11, %v9183_v63 }
 0x402   : > { %7352 = vmatprep.mubr.f32.mxu1 %v1134_v61 }
 0x403   : > { %7353 = vmatmul.mubr.f32.gmra.mxu1 %v1136_v1 }
 0x405   : > { %v1573_v29 = vpop.xlane.xlu0 %1572 }
 0x406   : > { %8019 = vrcp.f32 %v1573_v29 }
 0x407   : > { %v8012_v12 = vpop.eup %8011  ;;  %8021 = vrcp.f32 %v1112_v13 }
 0x408   : > { %v1601_v37 = vmul.f32 %v8012_v12, %v9220_v40  ;;  %v8014_v49 = vpop.eup %8013 }
 0x409   : > { %v1110_v22 = vpop.xlane.xlu0 %1109  ;;  %v1140_v18 = vmul.f32 %v8014_v49, %v9213_v15 }
 0x40a   : > { %8023 = vrcp.f32 %v1110_v22  ;;  %7300 = vmatmul.mubr.f32.gmra.mxu0 %v1601_v37  ;;  %v2056_v37 = vld [vmem:[%s11355_s4 + $0x68] sm:$0xff] }
 0x40b   : > { %v8016_v41 = vpop.eup %8015  ;;  %7302 = vmatprep.mubr.f32.mxu0 %v1603_v58  ;;  %8025 = vrcp.f32 %v1579_v52 }
 0x40c   : > { %v1138_v21 = vmul.f32 %v8016_v41, %v9223_v6  ;;  %v8018_v40 = vpop.eup %8017 }
 0x40d   : > { %v1116_v20 = vpop.xlane.xlu0 %1115  ;;  %v1607_v16 = vmul.f32 %v8018_v40, %v9195_v45 }
 0x40e   : > { %7355 = vmatprep.mubr.f32.mxu1 %v1138_v21 }
 0x40f   : > { %7356 = vmatmul.mubr.f32.gmra.mxu1 %v1140_v18 }
 0x411   : > { %v1577_v44 = vpop.xlane.xlu0 %1576 }
 0x412   : > { %8027 = vrcp.f32 %v1577_v44 }
 0x413   : > { %v8020_v5 = vpop.eup %8019  ;;  %8029 = vrcp.f32 %v1116_v20 }
 0x414   : > { %v1605_v63 = vmul.f32 %v8020_v5, %v9234_v57  ;;  %v8022_v0 = vpop.eup %8021 }
 0x415   : > { %v1114_v24 = vpop.xlane.xlu0 %1113  ;;  %v1144_v23 = vmul.f32 %v8022_v0, %v9227_v17 }
 0x416   : > { %8031 = vrcp.f32 %v1114_v24  ;;  %7303 = vmatmul.mubr.f32.gmra.mxu0 %v1605_v63 }
 0x417   : > { %v8024_v6 = vpop.eup %8023  ;;  %7305 = vmatprep.mubr.f32.mxu0 %v1607_v16  ;;  %8033 = vrcp.f32 %v1583_v8 }
 0x418   : > { %v1142_v15 = vmul.f32 %v8024_v6, %v9237_v10  ;;  %v8026_v57 = vpop.eup %8025 }
 0x419   : > { %v1120_v33 = vpop.xlane.xlu0 %1119  ;;  %v1611_v7 = vmul.f32 %v8026_v57, %v9202_v9 }
 0x41a   : > { %7358 = vmatprep.mubr.f32.mxu1 %v1142_v15 }
 0x41b   : > { %7359 = vmatmul.mubr.f32.gmra.mxu1 %v1144_v23 }
 0x41d   : > { %v1581_v4 = vpop.xlane.xlu0 %1580 }
 0x41e   : > { %8035 = vrcp.f32 %v1581_v4 }
 0x41f   : > { %v8028_v25 = vpop.eup %8027  ;;  %8037 = vrcp.f32 %v1120_v33 }
 0x420   : > { %v1609_v45 = vmul.f32 %v8028_v25, %v9245_v32  ;;  %v8030_v59 = vpop.eup %8029  ;;  %v2058_v32 = vld [vmem:[%s11355_s4 + $0x78] sm:$0xff] }
 0x421   : > { %v1118_v2 = vpop.xlane.xlu0 %1117  ;;  %v1148_v13 = vmul.f32 %v8030_v59, %v9241_v36  ;;  %7370 = vmatprep.subr.mxu0 %v2058_v32 }
 0x422   : > { %8039 = vrcp.f32 %v1118_v2  ;;  %7306 = vmatmul.mubr.f32.gmra.mxu0 %v1609_v45 }
 0x423   : > { %v8032_v10 = vpop.eup %8031  ;;  %7308 = vmatprep.mubr.f32.mxu0 %v1611_v7  ;;  %7371 = vmatpush3.msra.mxu0 %v2058_v32 }
 0x424   : > { %v1146_v17 = vmul.f32 %v8032_v10, %v9252_v56  ;;  %v8034_v9 = vpop.eup %8033  ;;  %v2057_v56 = vld [vmem:[%s11355_s4 + $0x70] sm:$0xff] }
 0x425   : > { %v1122_v61 = vpop.xlane.xlu0 %1121  ;;  %v1615_v11 = vmul.f32 %v8034_v9, %v9208_v60  ;;  %7372 = vmatprep.subr.mxu0 %v2057_v56 }
 0x426   : > { %8041 = vrcp.f32 %v1122_v61  ;;  %7361 = vmatprep.mubr.f32.mxu1 %v1146_v17  ;;  %7373 = vmatpush3.msra.mxu0 %v2057_v56 }
 0x427   : > { %7362 = vmatmul.mubr.f32.gmra.mxu1 %v1148_v13  ;;  %7374 = vmatprep.subr.mxu0 %v2056_v37 }
 0x428   : > { %7375 = vmatpush3.msra.mxu0 %v2056_v37 }
 0x429   : > { %v1124_v1 = vpop.xlane.xlu0 %1123 }
 0x42a   : > { %8043 = vrcp.f32 %v1124_v1 }
 0x42b   : > { %v8036_v28 = vpop.eup %8035 }
 0x42c   : > { %v1613_v29 = vmul.f32 %v8036_v28, %v9258_v48  ;;  %v8038_v12 = vpop.eup %8037  ;;  %v2055_v48 = vld [vmem:[%s11355_s4 + $0x60] sm:$0xff] }
 0x42d   : > { %v1585_v36 = vpop.xlane.xlu0 %1584  ;;  %v1152_v60 = vmul.f32 %v8038_v12, %v9255_v14  ;;  %7376 = vmatprep.subr.mxu0 %v2055_v48 }
 0x42e   : > { %8045 = vrcp.f32 %v1585_v36  ;;  %7309 = vmatmul.mubr.f32.gmra.mxu0 %v1613_v29 }
 0x42f   : > { %v8040_v22 = vpop.eup %8039  ;;  %7311 = vmatprep.mubr.f32.mxu0 %v1615_v11  ;;  %7377 = vmatpush3.msra.mxu0 %v2055_v48 }
 0x430   : > { %v1150_v58 = vmul.f32 %v8040_v22, %v9261_v53 }
 0x432   : > { %7364 = vmatprep.mubr.f32.mxu1 %v1150_v58 }
 0x433   : > { %v8042_v49 = vpop.eup %8041  ;;  %7365 = vmatmul.mubr.f32.gmra.mxu1 %v1152_v60 }
 0x434   : > { %v1154_v41 = vmul.f32 %v8042_v49, %v9264_v3 }
 0x436   : > { %7367 = vmatprep.mubr.f32.mxu1 %v1154_v41 }
 0x437   : > { %v8044_v21 = vpop.eup %8043 }
 0x438   : > { %v1156_v20 = vmul.f32 %v8044_v21, %v9267_v62 }
 0x43a   : > { %7368 = vmatmul.mubr.f32.gmra.mxu1 %v1156_v20 }
 0x43b   : > { %v8046_v18 = vpop.eup %8045 }
 0x43c   : > { %v1617_v52 = vmul.f32 %v8046_v18, %v9270_v19 }
 0x43e   : > { %7312 = vmatmul.mubr.f32.gmra.mxu0 %v1617_v52 }
 0x4a8   : > { %v7292_v53 = vpop.f32.mrf.mxu0 }
 0x4aa   : > { %v1767_v14 = vpop.f32.mrf.mxu0 }
 0x4ab   : > { %v7348_v44 = vpop.f32.mrf.mxu1 }
 0x4ac   : > { %v1982_v63 = vadd.f32 %v7348_v44, %v7292_v53  ;;  %v9336_v53 = vld [vmem:[%s11357_s6 + $0x1] ss:$0 sm:$0xff] }
 0x4ad   : > { %v1976_v40 = vpop.f32.mrf.mxu1 }
 0x4ae   : > { %v1977_v5 = vadd.f32 %v1976_v40, %v1767_v14 }
 0x4b0   : > { %7378 = vmatprep.mubr.msk.f32.mxu0 %vm521_vm1, %v1977_v5 }
 0x4b1   : > { %7379 = vmatmul.mubr.msk.f32.vlgmr.msra.gmra.mxu0 %vm521_vm1, %v1982_v63 }
 0x4b2   : > { %v7295_v3 = vpop.f32.mrf.mxu0 }
 0x4b4   : > { %v1777_v16 = vpop.f32.mrf.mxu0 }
 0x4b7   : > { %v7351_v24 = vpop.f32.mrf.mxu1 }
 0x4b8   : > { %v1992_v6 = vadd.f32 %v7351_v24, %v7295_v3 }
 0x4b9   : > { %v1986_v0 = vpop.f32.mrf.mxu1 }
 0x4ba   : > { %v1987_v62 = vadd.f32 %v1986_v0, %v1777_v16 }
 0x4bc   : > { %7381 = vmatprep.mubr.msk.f32.mxu0 %vm521_vm1, %v1987_v62 }
 0x4bd   : > { %7382 = vmatmul.mubr.msk.f32.gmra.mxu0 %vm521_vm1, %v1992_v6 }
 0x4be   : > { %v7298_v19 = vpop.f32.mrf.mxu0 }
 0x4c0   : > { %v1787_v33 = vpop.f32.mrf.mxu0 }
 0x4c3   : > { %v7354_v15 = vpop.f32.mrf.mxu1 }
 0x4c4   : > { %v2002_v4 = vadd.f32 %v7354_v15, %v7298_v19 }
 0x4c5   : > { %v1996_v23 = vpop.f32.mrf.mxu1 }
 0x4c6   : > { %v1997_v8 = vadd.f32 %v1996_v23, %v1787_v33 }
 0x4c8   : > { %7384 = vmatprep.mubr.msk.f32.mxu0 %vm521_vm1, %v1997_v8 }
 0x4c9   : > { %7385 = vmatmul.mubr.msk.f32.gmra.mxu0 %vm521_vm1, %v2002_v4 }
 0x4ca   : > { %v7301_v57 = vpop.f32.mrf.mxu0 }
 0x4cc   : > { %v1797_v45 = vpop.f32.mrf.mxu0 }
 0x4cf   : > { %v7357_v25 = vpop.f32.mrf.mxu1 }
 0x4d0   : > { %v2012_v59 = vadd.f32 %v7357_v25, %v7301_v57 }
 0x4d1   : > { %v2006_v2 = vpop.f32.mrf.mxu1 }
 0x4d2   : > { %v2007_v7 = vadd.f32 %v2006_v2, %v1797_v45 }
 0x4d4   : > { %7387 = vmatprep.mubr.msk.f32.mxu0 %vm521_vm1, %v2007_v7 }
 0x4d5   : > { %7388 = vmatmul.mubr.msk.f32.gmra.mxu0 %vm521_vm1, %v2012_v59 }
 0x4d6   : > { %v7304_v10 = vpop.f32.mrf.mxu0 }
 0x4d8   : > { %v1807_v61 = vpop.f32.mrf.mxu0 }
 0x4db   : > { %v7360_v17 = vpop.f32.mrf.mxu1 }
 0x4dc   : > { %v2022_v1 = vadd.f32 %v7360_v17, %v7304_v10 }
 0x4dd   : > { %v2016_v13 = vpop.f32.mrf.mxu1 }
 0x4de   : > { %v2017_v32 = vadd.f32 %v2016_v13, %v1807_v61 }
 0x4e0   : > { %7390 = vmatprep.mubr.msk.f32.mxu0 %vm521_vm1, %v2017_v32 }
 0x4e1   : > { %7391 = vmatmul.mubr.msk.f32.gmra.mxu0 %vm521_vm1, %v2022_v1 }
 0x4e2   : > { %v7307_v9 = vpop.f32.mrf.mxu0 }
 0x4e4   : > { %v1817_v29 = vpop.f32.mrf.mxu0 }
 0x4e7   : > { %v7363_v28 = vpop.f32.mrf.mxu1 }
 0x4e8   : > { %v2032_v11 = vadd.f32 %v7363_v28, %v7307_v9 }
 0x4e9   : > { %v2026_v56 = vpop.f32.mrf.mxu1 }
 0x4ea   : > { %v2027_v36 = vadd.f32 %v2026_v56, %v1817_v29 }
 0x4ec   : > { %7393 = vmatprep.mubr.msk.f32.mxu0 %vm521_vm1, %v2027_v36 }
 0x4ed   : > { %7394 = vmatmul.mubr.msk.f32.gmra.mxu0 %vm521_vm1, %v2032_v11 }
 0x4ee   : > { %v7310_v12 = vpop.f32.mrf.mxu0 }
 0x4f0   : > { %v1827_v22 = vpop.f32.mrf.mxu0 }
 0x4f3   : > { %v7366_v37 = vpop.f32.mrf.mxu1 }
 0x4f4   : > { %v2042_v60 = vadd.f32 %v7366_v37, %v7310_v12 }
 0x4f5   : > { %v2036_v48 = vpop.f32.mrf.mxu1 }
 0x4f6   : > { %v2037_v58 = vadd.f32 %v2036_v48, %v1827_v22  ;;  %v2559_v48 = vld [vmem:[%s11355_s4 + $0x38] sm:$0xff] }
 0x4f7   : > { %7402 = vmatprep.subr.mxu1 %v2559_v48 }
 0x4f8   : > { %7396 = vmatprep.mubr.msk.f32.mxu0 %vm521_vm1, %v2037_v58  ;;  %7403 = vmatpush3.msra.mxu1 %v2559_v48 }
 0x4f9   : > { %7397 = vmatmul.mubr.msk.f32.gmra.mxu0 %vm521_vm1, %v2042_v60 }
 0x4fa   : > { %v7369_v49 = vpop.f32.mrf.mxu1 }
 0x4fc   : > { %v2046_v21 = vpop.f32.mrf.mxu1 }
 0x4fe   : > { %v7313_v41 = vpop.f32.mrf.mxu0 }
 0x4ff   : > { %v2052_v52 = vadd.f32 %v7369_v49, %v7313_v41  ;;  %v2557_v41 = vld [vmem:[%s11355_s4 + $0x28] sm:$0xff] }
 0x500   : > { %v1837_v20 = vpop.f32.mrf.mxu0 }
 0x501   : > { %v2047_v18 = vadd.f32 %v2046_v21, %v1837_v20 }
 0x503   : > { %7399 = vmatprep.mubr.msk.f32.mxu0 %vm521_vm1, %v2047_v18  ;;  %v2556_v18 = vld [vmem:[%s11355_s4 + $0x20] sm:$0xff] }
 0x504   : > { %7400 = vmatmul.mubr.msk.f32.gmra.mxu0 %vm521_vm1, %v2052_v52 }
 0x571   : > { %v7380_v44 = vpop.f32.mrf.mxu0 }
 0x572   : > { %v2184_v14 = vadd.f32 %v7380_v44, %v9336_v53 }
 0x573   : > { %v2178_v40 = vpop.f32.mrf.mxu0 }
 0x574   : > { %v9340_v5 = vadd.f32 %v2184_v14, %v8552_v27  ;;  %v2179_v63 = vadd.f32 %v9336_v53, %v2178_v40 }
 0x576   : > { %v9344_v3 = vadd.f32 %v2179_v63, %v8550_v26  ;;  %v2278_v24 = vsel %vm521_vm1, %v9340_v5, 0.0  ;;  %v2341_v16 = vmul.f32 %v9340_v5, %v9340_v5 }
 0x577   : > { %2279 = vadd.xlane.f32.xlu0 %v2278_v24 }
 0x578   : > { %v2275_v0 = vsel %vm521_vm1, %v9344_v3, 0.0  ;;  %v2340_v62 = vmul.f32 %v9344_v3, %v9344_v3  ;;  %v2359_v27 = vsel %vm521_vm1, %v2341_v16, 0.0 }
 0x579   : > { %2276 = vadd.xlane.f32.xlu1 %v2275_v0 }
 0x57a   : > { %v2356_v26 = vsel %vm521_vm1, %v2340_v62, 0.0 }
 0x57b   : > { %2360 = vadd.xlane.f32.xlu0 %v2359_v27 }
 0x57d   : > { %v7383_v6 = vpop.f32.mrf.mxu0  ;;  %2357 = vadd.xlane.f32.xlu1 %v2356_v26 }
 0x57e   : > { %v2194_v19 = vadd.f32 %v7383_v6, %v9336_v53 }
 0x57f   : > { %v2188_v15 = vpop.f32.mrf.mxu0 }
 0x580   : > { %v9358_v33 = vadd.f32 %v2194_v19, %v8560_v31  ;;  %v2189_v23 = vadd.f32 %v9336_v53, %v2188_v15 }
 0x582   : > { %v9362_v8 = vadd.f32 %v2189_v23, %v8558_v30  ;;  %v2284_v4 = vsel %vm521_vm1, %v9358_v33, 0.0  ;;  %v2343_v57 = vmul.f32 %v9358_v33, %v9358_v33 }
 0x583   : > { %2285 = vadd.xlane.f32.xlu0 %v2284_v4 }
 0x584   : > { %v2281_v25 = vsel %vm521_vm1, %v9362_v8, 0.0  ;;  %v2342_v45 = vmul.f32 %v9362_v8, %v9362_v8  ;;  %v2365_v31 = vsel %vm521_vm1, %v2343_v57, 0.0 }
 0x585   : > { %2282 = vadd.xlane.f32.xlu1 %v2281_v25 }
 0x586   : > { %v2362_v30 = vsel %vm521_vm1, %v2342_v45, 0.0 }
 0x587   : > { %2366 = vadd.xlane.f32.xlu0 %v2365_v31 }
 0x589   : > { %v7386_v2 = vpop.f32.mrf.mxu0  ;;  %2363 = vadd.xlane.f32.xlu1 %v2362_v30 }
 0x58a   : > { %v2204_v7 = vadd.f32 %v7386_v2, %v9336_v53 }
 0x58b   : > { %v2198_v59 = vpop.f32.mrf.mxu0 }
 0x58c   : > { %v9376_v10 = vadd.f32 %v2204_v7, %v8568_v35  ;;  %v2199_v17 = vadd.f32 %v9336_v53, %v2198_v59 }
 0x58e   : > { %v9380_v61 = vadd.f32 %v2199_v17, %v8566_v34  ;;  %v2290_v13 = vsel %vm521_vm1, %v9376_v10, 0.0  ;;  %v2345_v32 = vmul.f32 %v9376_v10, %v9376_v10 }
 0x58f   : > { %2291 = vadd.xlane.f32.xlu0 %v2290_v13 }
 0x590   : > { %v2287_v1 = vsel %vm521_vm1, %v9380_v61, 0.0  ;;  %v2344_v9 = vmul.f32 %v9380_v61, %v9380_v61  ;;  %v2371_v35 = vsel %vm521_vm1, %v2345_v32, 0.0 }
 0x591   : > { %2288 = vadd.xlane.f32.xlu1 %v2287_v1 }
 0x592   : > { %v2368_v34 = vsel %vm521_vm1, %v2344_v9, 0.0 }
 0x593   : > { %2372 = vadd.xlane.f32.xlu0 %v2371_v35 }
 0x595   : > { %v7389_v28 = vpop.f32.mrf.mxu0  ;;  %2369 = vadd.xlane.f32.xlu1 %v2368_v34 }
 0x596   : > { %v2214_v29 = vadd.f32 %v7389_v28, %v9336_v53 }
 0x597   : > { %v2208_v56 = vpop.f32.mrf.mxu0 }
 0x598   : > { %v9394_v36 = vadd.f32 %v2214_v29, %v8576_v39  ;;  %v2209_v11 = vadd.f32 %v9336_v53, %v2208_v56 }
 0x59a   : > { %v9398_v12 = vadd.f32 %v2209_v11, %v8574_v38  ;;  %v2296_v37 = vsel %vm521_vm1, %v9394_v36, 0.0  ;;  %v2347_v22 = vmul.f32 %v9394_v36, %v9394_v36  ;;  %v2558_v38 = vld [vmem:[%s11355_s4 + $0x30] sm:$0xff] }
 0x59b   : > { %2297 = vadd.xlane.f32.xlu0 %v2296_v37  ;;  %7404 = vmatprep.subr.mxu1 %v2558_v38 }
 0x59c   : > { %v2293_v39 = vsel %vm521_vm1, %v9398_v12, 0.0  ;;  %v2346_v58 = vmul.f32 %v9398_v12, %v9398_v12  ;;  %v2377_v60 = vsel %vm521_vm1, %v2347_v22, 0.0  ;;  %7405 = vmatpush3.msra.mxu1 %v2558_v38 }
 0x59d   : > { %2294 = vadd.xlane.f32.xlu1 %v2293_v39  ;;  %7406 = vmatprep.subr.mxu1 %v2557_v41  ;;  %v2776_v39 = vld [vmem:[%s11355_s4 + $0x50] sm:$0xff] }
 0x59e   : > { %v2374_v49 = vsel %vm521_vm1, %v2346_v58, 0.0  ;;  %7407 = vmatpush3.msra.mxu1 %v2557_v41 }
 0x59f   : > { %2378 = vadd.xlane.f32.xlu0 %v2377_v60  ;;  %7408 = vmatprep.subr.mxu1 %v2556_v18 }
 0x5a0   : > { %7409 = vmatpush3.msra.mxu1 %v2556_v18 }
 0x5a1   : > { %v7392_v21 = vpop.f32.mrf.mxu0  ;;  %2375 = vadd.xlane.f32.xlu1 %v2374_v49 }
 0x5a2   : > { %v2224_v20 = vadd.f32 %v7392_v21, %v9336_v53 }
 0x5a3   : > { %v2218_v52 = vpop.f32.mrf.mxu0 }
 0x5a4   : > { %v9424_v44 = vadd.f32 %v2224_v20, %v8584_v43  ;;  %v2219_v14 = vadd.f32 %v9336_v53, %v2218_v52 }
 0x5a6   : > { %v9428_v40 = vadd.f32 %v2219_v14, %v8582_v42  ;;  %v2302_v63 = vsel %vm521_vm1, %v9424_v44, 0.0  ;;  %v2349_v24 = vmul.f32 %v9424_v44, %v9424_v44 }
 0x5a7   : > { %2303 = vadd.xlane.f32.xlu0 %v2302_v63 }
 0x5a8   : > { %v2299_v16 = vsel %vm521_vm1, %v9428_v40, 0.0  ;;  %v2348_v43 = vmul.f32 %v9428_v40, %v9428_v40  ;;  %v2383_v0 = vsel %vm521_vm1, %v2349_v24, 0.0 }
 0x5a9   : > { %2300 = vadd.xlane.f32.xlu1 %v2299_v16 }
 0x5aa   : > { %v2380_v42 = vsel %vm521_vm1, %v2348_v43, 0.0 }
 0x5ab   : > { %2384 = vadd.xlane.f32.xlu0 %v2383_v0 }
 0x5ad   : > { %v7395_v62 = vpop.f32.mrf.mxu0  ;;  %2381 = vadd.xlane.f32.xlu1 %v2380_v42 }
 0x5ae   : > { %v2234_v27 = vadd.f32 %v7395_v62, %v9336_v53 }
 0x5af   : > { %v2228_v26 = vpop.f32.mrf.mxu0 }
 0x5b0   : > { %v9442_v6 = vadd.f32 %v2234_v27, %v8592_v47  ;;  %v2229_v19 = vadd.f32 %v9336_v53, %v2228_v26 }
 0x5b2   : > { %v9446_v15 = vadd.f32 %v2229_v19, %v8590_v46  ;;  %v2308_v23 = vsel %vm521_vm1, %v9442_v6, 0.0  ;;  %v2351_v4 = vmul.f32 %v9442_v6, %v9442_v6 }
 0x5b3   : > { %2309 = vadd.xlane.f32.xlu0 %v2308_v23 }
 0x5b4   : > { %v2305_v57 = vsel %vm521_vm1, %v9446_v15, 0.0  ;;  %v2350_v25 = vmul.f32 %v9446_v15, %v9446_v15  ;;  %v2389_v47 = vsel %vm521_vm1, %v2351_v4, 0.0 }
 0x5b5   : > { %2306 = vadd.xlane.f32.xlu1 %v2305_v57 }
 0x5b6   : > { %v2386_v46 = vsel %vm521_vm1, %v2350_v25, 0.0 }
 0x5b7   : > { %2390 = vadd.xlane.f32.xlu0 %v2389_v47 }
 0x5b9   : > { %v7398_v45 = vpop.f32.mrf.mxu0  ;;  %2387 = vadd.xlane.f32.xlu1 %v2386_v46 }
 0x5ba   : > { %v2244_v31 = vadd.f32 %v7398_v45, %v9336_v53 }
 0x5bb   : > { %v2238_v30 = vpop.f32.mrf.mxu0 }
 0x5bc   : > { %v9460_v2 = vadd.f32 %v2244_v31, %v8600_v51  ;;  %v2239_v7 = vadd.f32 %v9336_v53, %v2238_v30 }
 0x5be   : > { %v9464_v59 = vadd.f32 %v2239_v7, %v8598_v50  ;;  %v2314_v17 = vsel %vm521_vm1, %v9460_v2, 0.0  ;;  %v2353_v13 = vmul.f32 %v9460_v2, %v9460_v2 }
 0x5bf   : > { %2315 = vadd.xlane.f32.xlu0 %v2314_v17 }
 0x5c0   : > { %v2311_v32 = vsel %vm521_vm1, %v9464_v59, 0.0  ;;  %v2352_v1 = vmul.f32 %v9464_v59, %v9464_v59  ;;  %v2395_v51 = vsel %vm521_vm1, %v2353_v13, 0.0 }
 0x5c1   : > { %2312 = vadd.xlane.f32.xlu1 %v2311_v32 }
 0x5c2   : > { %v2392_v50 = vsel %vm521_vm1, %v2352_v1, 0.0 }
 0x5c3   : > { %2396 = vadd.xlane.f32.xlu0 %v2395_v51  ;;  %v9505_v51 = vld [vmem:[%s11357_s6 + $0x2] ss:$0 sm:$0xff] }
 0x5c4   : > { %v7401_v9 = vpop.f32.mrf.mxu0 }
 0x5c5   : > { %v2254_v35 = vadd.f32 %v7401_v9, %v9336_v53  ;;  %2393 = vadd.xlane.f32.xlu1 %v2392_v50 }
 0x5c6   : > { %v2248_v34 = vpop.f32.mrf.mxu0 }
 0x5c7   : > { %v9478_v28 = vadd.f32 %v2254_v35, %v8608_v55  ;;  %v2249_v29 = vadd.f32 %v9336_v53, %v2248_v34  ;;  %v2777_v53 = vld [vmem:[%s11355_s4 + $0x58] sm:$0xff] }
 0x5c8   : > { %7434 = vmatprep.subr.mxu0 %v2777_v53 }
 0x5c9   : > { %v9482_v56 = vadd.f32 %v2249_v29, %v8606_v54  ;;  %v2320_v11 = vsel %vm521_vm1, %v9478_v28, 0.0  ;;  %v2355_v37 = vmul.f32 %v9478_v28, %v9478_v28  ;;  %7435 = vmatpush3.xpose.msra.mxu0 %v2777_v53 }
 0x5ca   : > { %2321 = vadd.xlane.f32.xlu0 %v2320_v11  ;;  %7436 = vmatprep.subr.mxu0 %v2776_v39 }
 0x5cb   : > { %v2317_v22 = vsel %vm521_vm1, %v9482_v56, 0.0  ;;  %v2354_v48 = vmul.f32 %v9482_v56, %v9482_v56  ;;  %v2401_v55 = vsel %vm521_vm1, %v2355_v37, 0.0 }
 0x5cc   : > { %2318 = vadd.xlane.f32.xlu1 %v2317_v22 }
 0x5cd   : > { %v2398_v54 = vsel %vm521_vm1, %v2354_v48, 0.0  ;;  %7437 = vmatpush3.xpose.msra.mxu0 %v2776_v39 }
 0x5ce   : > { %2402 = vadd.xlane.f32.xlu0 %v2401_v55 }
 0x5d0   : > { %2399 = vadd.xlane.f32.xlu1 %v2398_v54 }
 0x600   : > { %v2280_v58 = vpop.xlane.xlu0 %2279 }
 0x601   : > { %v2325_v38 = vmul.f32 0.03125, %v2280_v58 }
 0x602   : > { %v2277_v60 = vpop.xlane.xlu1 %2276 }
 0x603   : > { %v2324_v49 = vmul.f32 0.03125, %v2277_v60  ;;  %v2421_v21 = vmul.f32 %v2325_v38, %v2325_v38  ;;  %v2453_v31 = vsub.f32 %v9340_v5, %v2325_v38 }
 0x604   : > { %v2361_v41 = vpop.xlane.xlu0 %2360 }
 0x605   : > { %v2405_v20 = vmul.f32 0.03125, %v2361_v41  ;;  %v2420_v52 = vmul.f32 %v2324_v49, %v2324_v49  ;;  %v2452_v13 = vsub.f32 %v9344_v3, %v2324_v49  ;;  %v9511_v3 = vld [vmem:[%s11357_s6 + $0x3] ss:$0 sm:$0xff] }
 0x606   : > { %v2358_v18 = vpop.xlane.xlu1 %2357 }
 0x607   : > { %v2437_v14 = vsub.f32 %v2405_v20, %v2421_v21  ;;  %v2404_v63 = vmul.f32 0.03125, %v2358_v18 }
 0x609   : > { %v2469_v24 = vadd.f32 1e-05, %v2437_v14  ;;  %v2436_v16 = vsub.f32 %v2404_v63, %v2420_v52 }
 0x60b   : > { %8047 = vrsqrt.f32 %v2469_v24  ;;  %v2468_v43 = vadd.f32 1e-05, %v2436_v16 }
 0x60c   : > { %v2286_v0 = vpop.xlane.xlu0 %2285 }
 0x60d   : > { %8049 = vrsqrt.f32 %v2468_v43  ;;  %v2327_v42 = vmul.f32 0.03125, %v2286_v0 }
 0x60e   : > { %v2283_v62 = vpop.xlane.xlu1 %2282 }
 0x60f   : > { %v2326_v27 = vmul.f32 0.03125, %v2283_v62  ;;  %v2423_v19 = vmul.f32 %v2327_v42, %v2327_v42  ;;  %v2455_v49 = vsub.f32 %v9358_v33, %v2327_v42 }
 0x610   : > { %v2367_v26 = vpop.xlane.xlu0 %2366 }
 0x611   : > { %v2407_v23 = vmul.f32 0.03125, %v2367_v26  ;;  %v2422_v57 = vmul.f32 %v2326_v27, %v2326_v27  ;;  %v2454_v18 = vsub.f32 %v9362_v8, %v2326_v27 }
 0x612   : > { %v2364_v4 = vpop.xlane.xlu1 %2363 }
 0x613   : > { %v2439_v25 = vsub.f32 %v2407_v23, %v2423_v19  ;;  %v2406_v47 = vmul.f32 0.03125, %v2364_v4 }
 0x615   : > { %v2471_v46 = vadd.f32 1e-05, %v2439_v25  ;;  %v2438_v45 = vsub.f32 %v2406_v47, %v2422_v57 }
 0x617   : > { %8051 = vrsqrt.f32 %v2471_v46  ;;  %v2470_v30 = vadd.f32 1e-05, %v2438_v45 }
 0x618   : > { %v8048_v7 = vpop.eup %8047  ;;  %v2292_v17 = vpop.xlane.xlu0 %2291 }
 0x619   : > { %v2501_v32 = vmul.f32 %v8048_v7, %v2453_v31  ;;  %8053 = vrsqrt.f32 %v2470_v30  ;;  %v2329_v1 = vmul.f32 0.03125, %v2292_v17 }
 0x61a   : > { %v8050_v9 = vpop.eup %8049  ;;  %v2289_v50 = vpop.xlane.xlu1 %2288 }
 0x61b   : > { %v2328_v35 = vmul.f32 0.03125, %v2289_v50  ;;  %v2500_v34 = vmul.f32 %v8050_v9, %v2452_v13  ;;  %v2521_v5 = vmul.f32 %v9505_v51, %v2501_v32  ;;  %v2425_v11 = vmul.f32 %v2329_v1, %v2329_v1 }
 0x61c   : > { %v2373_v29 = vpop.xlane.xlu0 %2372  ;;  %v2457_v46 = vsub.f32 %v9376_v10, %v2329_v1 }
 0x61d   : > { %v2409_v37 = vmul.f32 0.03125, %v2373_v29  ;;  %v2520_v22 = vmul.f32 %v9505_v51, %v2500_v34  ;;  %v2424_v55 = vmul.f32 %v2328_v35, %v2328_v35  ;;  %v9518_v58 = vadd.f32 %v9511_v3, %v2521_v5 }
 0x61e   : > { %v2370_v48 = vpop.xlane.xlu1 %2369  ;;  %v2456_v7 = vsub.f32 %v9380_v61, %v2328_v35 }
 0x61f   : > { %v2441_v54 = vsub.f32 %v2409_v37, %v2425_v11  ;;  %v2408_v53 = vmul.f32 0.03125, %v2370_v48  ;;  %v9515_v39 = vadd.f32 %v9511_v3, %v2520_v22 }
 0x621   : > { %v2473_v38 = vadd.f32 1e-05, %v2441_v54  ;;  %v2440_v60 = vsub.f32 %v2408_v53, %v2424_v55  ;;  %7410 = vmatprep.mubr.msk.f32.mxu1 %vm521_vm1, %v9515_v39 }
 0x622   : > { %7411 = vmatmul.mubr.msk.f32.vlgmr.msra.gmra.mxu1 %vm521_vm1, %v9518_v58 }
 0x623   : > { %8055 = vrsqrt.f32 %v2473_v38  ;;  %v2472_v41 = vadd.f32 1e-05, %v2440_v60 }
 0x624   : > { %v8052_v21 = vpop.eup %8051  ;;  %v2298_v20 = vpop.xlane.xlu0 %2297 }
 0x625   : > { %8057 = vrsqrt.f32 %v2472_v41  ;;  %v2331_v52 = vmul.f32 0.03125, %v2298_v20  ;;  %v2503_v14 = vmul.f32 %v8052_v21, %v2455_v49 }
 0x626   : > { %v8054_v63 = vpop.eup %8053  ;;  %v2295_v24 = vpop.xlane.xlu1 %2294 }
 0x627   : > { %v2330_v16 = vmul.f32 0.03125, %v2295_v24  ;;  %v2502_v43 = vmul.f32 %v8054_v63, %v2454_v18  ;;  %v2523_v62 = vmul.f32 %v9505_v51, %v2503_v14  ;;  %v2427_v26 = vmul.f32 %v2331_v52, %v2331_v52 }
 0x628   : > { %v2379_v0 = vpop.xlane.xlu0 %2378  ;;  %v2459_v38 = vsub.f32 %v9394_v36, %v2331_v52 }
 0x629   : > { %v2411_v19 = vmul.f32 0.03125, %v2379_v0  ;;  %v2522_v33 = vmul.f32 %v9505_v51, %v2502_v43  ;;  %v2426_v23 = vmul.f32 %v2330_v16, %v2330_v16  ;;  %v9532_v27 = vadd.f32 %v9511_v3, %v2523_v62 }
 0x62a   : > { %v2376_v42 = vpop.xlane.xlu1 %2375  ;;  %v2458_v21 = vsub.f32 %v9398_v12, %v2330_v16 }
 0x62b   : > { %v2443_v4 = vsub.f32 %v2411_v19, %v2427_v26  ;;  %v2410_v57 = vmul.f32 0.03125, %v2376_v42  ;;  %v9529_v8 = vadd.f32 %v9511_v3, %v2522_v33 }
 0x62d   : > { %v2475_v25 = vadd.f32 1e-05, %v2443_v4  ;;  %v2442_v47 = vsub.f32 %v2410_v57, %v2426_v23  ;;  %7413 = vmatprep.mubr.msk.f32.mxu1 %vm521_vm1, %v9529_v8 }
 0x62e   : > { %7414 = vmatmul.mubr.msk.f32.gmra.mxu1 %vm521_vm1, %v9532_v27 }
 0x62f   : > { %8059 = vrsqrt.f32 %v2475_v25  ;;  %v2474_v45 = vadd.f32 1e-05, %v2442_v47 }
 0x630   : > { %v8056_v31 = vpop.eup %8055  ;;  %v2304_v30 = vpop.xlane.xlu0 %2303 }
 0x631   : > { %8061 = vrsqrt.f32 %v2474_v45  ;;  %v2333_v17 = vmul.f32 0.03125, %v2304_v30  ;;  %v2505_v13 = vmul.f32 %v8056_v31, %v2457_v46 }
 0x632   : > { %v8058_v32 = vpop.eup %8057  ;;  %v2301_v9 = vpop.xlane.xlu1 %2300 }
 0x633   : > { %v2332_v50 = vmul.f32 0.03125, %v2301_v9  ;;  %v2504_v34 = vmul.f32 %v8058_v32, %v2456_v7  ;;  %v2525_v5 = vmul.f32 %v9505_v51, %v2505_v13  ;;  %v2429_v11 = vmul.f32 %v2333_v17, %v2333_v17 }
 0x634   : > { %v2385_v29 = vpop.xlane.xlu0 %2384  ;;  %v2461_v25 = vsub.f32 %v9424_v44, %v2333_v17 }
 0x635   : > { %v2413_v37 = vmul.f32 0.03125, %v2385_v29  ;;  %v2524_v10 = vmul.f32 %v9505_v51, %v2504_v34  ;;  %v2428_v22 = vmul.f32 %v2332_v50, %v2332_v50  ;;  %v9546_v35 = vadd.f32 %v9511_v3, %v2525_v5 }
 0x636   : > { %v2382_v1 = vpop.xlane.xlu1 %2381  ;;  %v2460_v31 = vsub.f32 %v9428_v40, %v2332_v50 }
 0x637   : > { %v2445_v48 = vsub.f32 %v2413_v37, %v2429_v11  ;;  %v2412_v55 = vmul.f32 0.03125, %v2382_v1  ;;  %v9543_v61 = vadd.f32 %v9511_v3, %v2524_v10 }
 0x639   : > { %v2477_v54 = vadd.f32 1e-05, %v2445_v48  ;;  %v2444_v53 = vsub.f32 %v2412_v55, %v2428_v22  ;;  %7416 = vmatprep.mubr.msk.f32.mxu1 %vm521_vm1, %v9543_v61 }
 0x63a   : > { %7417 = vmatmul.mubr.msk.f32.gmra.mxu1 %vm521_vm1, %v9546_v35 }
 0x63b   : > { %8063 = vrsqrt.f32 %v2477_v54  ;;  %v2476_v60 = vadd.f32 1e-05, %v2444_v53 }
 0x63c   : > { %v8060_v49 = vpop.eup %8059  ;;  %v2310_v41 = vpop.xlane.xlu0 %2309 }
 0x63d   : > { %8065 = vrsqrt.f32 %v2476_v60  ;;  %v2335_v20 = vmul.f32 0.03125, %v2310_v41  ;;  %v2507_v18 = vmul.f32 %v8060_v49, %v2459_v38 }
 0x63e   : > { %v8062_v14 = vpop.eup %8061  ;;  %v2307_v63 = vpop.xlane.xlu1 %2306 }
 0x63f   : > { %v2334_v24 = vmul.f32 0.03125, %v2307_v63  ;;  %v2506_v43 = vmul.f32 %v8062_v14, %v2458_v21  ;;  %v2527_v62 = vmul.f32 %v9505_v51, %v2507_v18  ;;  %v2431_v26 = vmul.f32 %v2335_v20, %v2335_v20 }
 0x640   : > { %v2391_v0 = vpop.xlane.xlu0 %2390  ;;  %v2463_v54 = vsub.f32 %v9442_v6, %v2335_v20 }
 0x641   : > { %v2415_v19 = vmul.f32 0.03125, %v2391_v0  ;;  %v2526_v36 = vmul.f32 %v9505_v51, %v2506_v43  ;;  %v2430_v33 = vmul.f32 %v2334_v24, %v2334_v24  ;;  %v9560_v16 = vadd.f32 %v9511_v3, %v2527_v62 }
 0x642   : > { %v2388_v52 = vpop.xlane.xlu1 %2387  ;;  %v2462_v41 = vsub.f32 %v9446_v15, %v2334_v24 }
 0x643   : > { %v2447_v42 = vsub.f32 %v2415_v19, %v2431_v26  ;;  %v2414_v23 = vmul.f32 0.03125, %v2388_v52  ;;  %v9557_v12 = vadd.f32 %v9511_v3, %v2526_v36 }
 0x645   : > { %v2479_v4 = vadd.f32 1e-05, %v2447_v42  ;;  %v2446_v57 = vsub.f32 %v2414_v23, %v2430_v33  ;;  %7419 = vmatprep.mubr.msk.f32.mxu1 %vm521_vm1, %v9557_v12 }
 0x646   : > { %7420 = vmatmul.mubr.msk.f32.gmra.mxu1 %vm521_vm1, %v9560_v16 }
 0x647   : > { %8067 = vrsqrt.f32 %v2479_v4  ;;  %v2478_v47 = vadd.f32 1e-05, %v2446_v57 }
 0x648   : > { %v8064_v46 = vpop.eup %8063  ;;  %v2316_v45 = vpop.xlane.xlu0 %2315 }
 0x649   : > { %8069 = vrsqrt.f32 %v2478_v47  ;;  %v2337_v30 = vmul.f32 0.03125, %v2316_v45  ;;  %v2509_v7 = vmul.f32 %v8064_v46, %v2461_v25 }
 0x64a   : > { %v8066_v13 = vpop.eup %8065  ;;  %v2313_v32 = vpop.xlane.xlu1 %2312 }
 0x64b   : > { %v2336_v9 = vmul.f32 0.03125, %v2313_v32  ;;  %v2508_v34 = vmul.f32 %v8066_v13, %v2460_v31  ;;  %v2529_v5 = vmul.f32 %v9505_v51, %v2509_v7  ;;  %v2433_v11 = vmul.f32 %v2337_v30, %v2337_v30  ;;  %v2775_v13 = vld [vmem:[%s11355_s4 + $0x48] sm:$0xff] }
 0x64c   : > { %v2397_v29 = vpop.xlane.xlu0 %2396  ;;  %v2465_v57 = vsub.f32 %v9460_v2, %v2337_v30  ;;  %7438 = vmatprep.subr.mxu0 %v2775_v13  ;;  %v2774_v2 = vld [vmem:[%s11355_s4 + $0x40] sm:$0xff] }
 0x64d   : > { %v2417_v37 = vmul.f32 0.03125, %v2397_v29  ;;  %v2528_v44 = vmul.f32 %v9505_v51, %v2508_v34  ;;  %v2432_v10 = vmul.f32 %v2336_v9, %v2336_v9  ;;  %v9574_v50 = vadd.f32 %v9511_v3, %v2529_v5  ;;  %7439 = vmatpush3.xpose.msra.mxu0 %v2775_v13 }
 0x64e   : > { %v2394_v17 = vpop.xlane.xlu1 %2393  ;;  %v2464_v47 = vsub.f32 %v9464_v59, %v2336_v9  ;;  %7440 = vmatprep.subr.mxu0 %v2774_v2 }
 0x64f   : > { %v2449_v1 = vsub.f32 %v2417_v37, %v2433_v11  ;;  %v2416_v22 = vmul.f32 0.03125, %v2394_v17  ;;  %v9571_v40 = vadd.f32 %v9511_v3, %v2528_v44 }
 0x651   : > { %v2481_v48 = vadd.f32 1e-05, %v2449_v1  ;;  %v2448_v55 = vsub.f32 %v2416_v22, %v2432_v10  ;;  %7422 = vmatprep.mubr.msk.f32.mxu1 %vm521_vm1, %v9571_v40  ;;  %7441 = vmatpush3.xpose.msra.mxu0 %v2774_v2 }
 0x652   : > { %7423 = vmatmul.mubr.msk.f32.gmra.mxu1 %vm521_vm1, %v9574_v50 }
 0x653   : > { %8071 = vrsqrt.f32 %v2481_v48  ;;  %v2480_v53 = vadd.f32 1e-05, %v2448_v55  ;;  %v2322_v38 = vpop.xlane.xlu0 %2321 }
 0x654   : > { %v8068_v60 = vpop.eup %8067  ;;  %v2339_v49 = vmul.f32 0.03125, %v2322_v38 }
 0x655   : > { %8073 = vrsqrt.f32 %v2480_v53  ;;  %v2319_v21 = vpop.xlane.xlu1 %2318  ;;  %v2511_v18 = vmul.f32 %v8068_v60, %v2463_v54 }
 0x656   : > { %v8070_v14 = vpop.eup %8069  ;;  %v2338_v63 = vmul.f32 0.03125, %v2319_v21  ;;  %v2435_v62 = vmul.f32 %v2339_v49, %v2339_v49  ;;  %v2467_v30 = vsub.f32 %v9478_v28, %v2339_v49  ;;  %v6445_v28 = vld [vmem:[%s11357_s6 + $0x6] ss:$0 sm:$0xff] }
 0x657   : > { %v2403_v43 = vpop.xlane.xlu0 %2402  ;;  %v2510_v0 = vmul.f32 %v8070_v14, %v2462_v41  ;;  %v2531_v19 = vmul.f32 %v9505_v51, %v2511_v18 }
 0x658   : > { %v2419_v26 = vmul.f32 0.03125, %v2403_v43  ;;  %v2434_v20 = vmul.f32 %v2338_v63, %v2338_v63  ;;  %v2466_v29 = vsub.f32 %v9482_v56, %v2338_v63 }
 0x659   : > { %v2400_v36 = vpop.xlane.xlu1 %2399  ;;  %v2530_v6 = vmul.f32 %v9505_v51, %v2510_v0  ;;  %v9588_v23 = vadd.f32 %v9511_v3, %v2531_v19 }
 0x65a   : > { %v2451_v52 = vsub.f32 %v2419_v26, %v2435_v62  ;;  %v2418_v33 = vmul.f32 0.03125, %v2400_v36 }
 0x65b   : > { %v9585_v42 = vadd.f32 %v9511_v3, %v2530_v6 }
 0x65c   : > { %v2483_v15 = vadd.f32 1e-05, %v2451_v52  ;;  %v2450_v24 = vsub.f32 %v2418_v33, %v2434_v20 }
 0x65d   : > { %7425 = vmatprep.mubr.msk.f32.mxu1 %vm521_vm1, %v9585_v42 }
 0x65e   : > { %8075 = vrsqrt.f32 %v2483_v15  ;;  %v2482_v4 = vadd.f32 1e-05, %v2450_v24  ;;  %7426 = vmatmul.mubr.msk.f32.gmra.mxu1 %vm521_vm1, %v9588_v23 }
 0x660   : > { %v8072_v25 = vpop.eup %8071  ;;  %8077 = vrsqrt.f32 %v2482_v4 }
 0x661   : > { %v2513_v46 = vmul.f32 %v8072_v25, %v2465_v57 }
 0x662   : > { %v8074_v45 = vpop.eup %8073 }
 0x663   : > { %v2512_v31 = vmul.f32 %v8074_v45, %v2464_v47  ;;  %v2533_v7 = vmul.f32 %v9505_v51, %v2513_v46 }
 0x665   : > { %v2532_v32 = vmul.f32 %v9505_v51, %v2512_v31  ;;  %v9608_v59 = vadd.f32 %v9511_v3, %v2533_v7 }
 0x667   : > { %v9602_v34 = vadd.f32 %v9511_v3, %v2532_v32 }
 0x669   : > { %7428 = vmatprep.mubr.msk.f32.mxu1 %vm521_vm1, %v9602_v34 }
 0x66a   : > { %7429 = vmatmul.mubr.msk.f32.gmra.mxu1 %vm521_vm1, %v9608_v59 }
 0x66b   : > { %v8076_v9 = vpop.eup %8075 }
 0x66c   : > { %v2515_v5 = vmul.f32 %v8076_v9, %v2467_v30 }
 0x66d   : > { %v8078_v11 = vpop.eup %8077 }
 0x66e   : > { %v2514_v37 = vmul.f32 %v8078_v11, %v2466_v29  ;;  %v2535_v44 = vmul.f32 %v9505_v51, %v2515_v5 }
 0x670   : > { %v2534_v17 = vmul.f32 %v9505_v51, %v2514_v37  ;;  %v9622_v1 = vadd.f32 %v9511_v3, %v2535_v44 }
 0x672   : > { %v9619_v10 = vadd.f32 %v9511_v3, %v2534_v17 }
 0x674   : > { %7431 = vmatprep.mubr.msk.f32.mxu1 %vm521_vm1, %v9619_v10 }
 0x675   : > { %7432 = vmatmul.mubr.msk.f32.gmra.mxu1 %vm521_vm1, %v9622_v1 }
 0x6e2   : > { %v7412_v56 = vpop.f32.mrf.mxu1 }
 0x6e3   : > { %v2685_v22 = vadd.f32 %v7412_v56, %v6445_v28 }
 0x6e4   : > { %v2679_v48 = vpop.f32.mrf.mxu1 }
 0x6e5   : > { %v2680_v51 = vadd.f32 %v6445_v28, %v2679_v48  ;;  %v2759_v54 = vmax.f32 %v2685_v22, 0.0  ;;  %v9634_v22 = vld [vmem:[%s11357_s6 + $0x7] ss:$0 sm:$0xff] }
 0x6e7   : > { %v2758_v55 = vmax.f32 %v2680_v51, 0.0 }
 0x6e9   : > { %7442 = vmatprep.mubr.f32.mxu0 %v2758_v55 }
 0x6ea   : > { %7443 = vmatmul.mubr.f32.vlgmr.msra.gmra.mxu0 %v2759_v54 }
 0x6ee   : > { %v7415_v3 = vpop.f32.mrf.mxu1 }
 0x6ef   : > { %v2695_v53 = vadd.f32 %v7415_v3, %v6445_v28 }
 0x6f0   : > { %v2689_v38 = vpop.f32.mrf.mxu1 }
 0x6f1   : > { %v2690_v60 = vadd.f32 %v6445_v28, %v2689_v38  ;;  %v2761_v41 = vmax.f32 %v2695_v53, 0.0 }
 0x6f3   : > { %v2760_v49 = vmax.f32 %v2690_v60, 0.0 }
 0x6f5   : > { %7445 = vmatprep.mubr.f32.mxu0 %v2760_v49 }
 0x6f6   : > { %7446 = vmatmul.mubr.f32.gmra.mxu0 %v2761_v41 }
 0x6fa   : > { %v7418_v21 = vpop.f32.mrf.mxu1 }
 0x6fb   : > { %v2705_v18 = vadd.f32 %v7418_v21, %v6445_v28 }
 0x6fc   : > { %v2699_v14 = vpop.f32.mrf.mxu1 }
 0x6fd   : > { %v2700_v63 = vadd.f32 %v6445_v28, %v2699_v14  ;;  %v2763_v0 = vmax.f32 %v2705_v18, 0.0 }
 0x6ff   : > { %v2762_v43 = vmax.f32 %v2700_v63, 0.0 }
 0x701   : > { %7448 = vmatprep.mubr.f32.mxu0 %v2762_v43 }
 0x702   : > { %7449 = vmatmul.mubr.f32.gmra.mxu0 %v2763_v0 }
 0x706   : > { %v7421_v62 = vpop.f32.mrf.mxu1 }
 0x707   : > { %v2715_v26 = vadd.f32 %v7421_v62, %v6445_v28 }
 0x708   : > { %v2709_v19 = vpop.f32.mrf.mxu1 }
 0x709   : > { %v2710_v36 = vadd.f32 %v6445_v28, %v2709_v19  ;;  %v2765_v20 = vmax.f32 %v2715_v26, 0.0 }
 0x70b   : > { %v2764_v6 = vmax.f32 %v2710_v36, 0.0 }
 0x70d   : > { %7451 = vmatprep.mubr.f32.mxu0 %v2764_v6 }
 0x70e   : > { %7452 = vmatmul.mubr.f32.gmra.mxu0 %v2765_v20 }
 0x712   : > { %v7424_v52 = vpop.f32.mrf.mxu1 }
 0x713   : > { %v2725_v33 = vadd.f32 %v7424_v52, %v6445_v28 }
 0x714   : > { %v2719_v15 = vpop.f32.mrf.mxu1 }
 0x715   : > { %v2720_v24 = vadd.f32 %v6445_v28, %v2719_v15  ;;  %v2767_v57 = vmax.f32 %v2725_v33, 0.0 }
 0x717   : > { %v2766_v4 = vmax.f32 %v2720_v24, 0.0 }
 0x719   : > { %7454 = vmatprep.mubr.f32.mxu0 %v2766_v4 }
 0x71a   : > { %7455 = vmatmul.mubr.f32.gmra.mxu0 %v2767_v57 }
 0x71e   : > { %v7427_v25 = vpop.f32.mrf.mxu1 }
 0x71f   : > { %v2735_v47 = vadd.f32 %v7427_v25, %v6445_v28 }
 0x720   : > { %v2729_v46 = vpop.f32.mrf.mxu1 }
 0x721   : > { %v2730_v45 = vadd.f32 %v6445_v28, %v2729_v46  ;;  %v2769_v7 = vmax.f32 %v2735_v47, 0.0 }
 0x723   : > { %v2768_v31 = vmax.f32 %v2730_v45, 0.0 }
 0x725   : > { %7457 = vmatprep.mubr.f32.mxu0 %v2768_v31 }
 0x726   : > { %7458 = vmatmul.mubr.f32.gmra.mxu0 %v2769_v7 }
 0x72a   : > { %v7430_v13 = vpop.f32.mrf.mxu1 }
 0x72b   : > { %v2745_v32 = vadd.f32 %v7430_v13, %v6445_v28 }
 0x72c   : > { %v2739_v2 = vpop.f32.mrf.mxu1 }
 0x72d   : > { %v2740_v30 = vadd.f32 %v6445_v28, %v2739_v2  ;;  %v2771_v29 = vmax.f32 %v2745_v32, 0.0 }
 0x72f   : > { %v2770_v9 = vmax.f32 %v2740_v30, 0.0  ;;  %v6468_v30 = vld [vmem:[%s11355_s4 + $0x98] sm:$0xff] }
 0x730   : > { %7466 = vmatprep.subr.mxu1 %v6468_v30 }
 0x731   : > { %7460 = vmatprep.mubr.f32.mxu0 %v2770_v9  ;;  %7467 = vmatpush3.msra.mxu1 %v6468_v30 }
 0x732   : > { %7461 = vmatmul.mubr.f32.gmra.mxu0 %v2771_v29 }
 0x735   : > { %v7433_v5 = vpop.f32.mrf.mxu1 }
 0x736   : > { %v2755_v11 = vadd.f32 %v7433_v5, %v6445_v28 }
 0x737   : > { %v2749_v37 = vpop.f32.mrf.mxu1 }
 0x738   : > { %v2750_v44 = vadd.f32 %v6445_v28, %v2749_v37  ;;  %v2773_v56 = vmax.f32 %v2755_v11, 0.0  ;;  %v6466_v11 = vld [vmem:[%s11355_s4 + $0x88] sm:$0xff] }
 0x73a   : > { %v2772_v17 = vmax.f32 %v2750_v44, 0.0 }
 0x73c   : > { %7463 = vmatprep.mubr.f32.mxu0 %v2772_v17  ;;  %v6465_v17 = vld [vmem:[%s11355_s4 + $0x80] sm:$0xff] }
 0x73d   : > { %7464 = vmatmul.mubr.f32.gmra.mxu0 %v2773_v56 }
 0x7aa   : > { %v7444_v48 = vpop.f32.mrf.mxu0 }
 0x7ab   : > { %v2855_v51 = vadd.f32 %v7444_v48, %v9634_v22 }
 0x7ac   : > { %v2849_v55 = vpop.f32.mrf.mxu0 }
 0x7ad   : > { %v9638_v54 = vadd.f32 %v2855_v51, %v9518_v58  ;;  %v2850_v3 = vadd.f32 %v9634_v22, %v2849_v55 }
 0x7af   : > { %v9642_v28 = vadd.f32 %v2850_v3, %v9515_v39  ;;  %v2949_v53 = vsel %vm521_vm1, %v9638_v54, 0.0  ;;  %v3011_v38 = vmul.f32 %v9638_v54, %v9638_v54 }
 0x7b0   : > { %2950 = vadd.xlane.f32.xlu0 %v2949_v53 }
 0x7b1   : > { %v2946_v60 = vsel %vm521_vm1, %v9642_v28, 0.0  ;;  %v3010_v49 = vmul.f32 %v9642_v28, %v9642_v28  ;;  %v3029_v58 = vsel %vm521_vm1, %v3011_v38, 0.0 }
 0x7b2   : > { %2947 = vadd.xlane.f32.xlu1 %v2946_v60 }
 0x7b3   : > { %v3026_v39 = vsel %vm521_vm1, %v3010_v49, 0.0 }
 0x7b4   : > { %3030 = vadd.xlane.f32.xlu0 %v3029_v58 }
 0x7b6   : > { %v7447_v41 = vpop.f32.mrf.mxu0  ;;  %3027 = vadd.xlane.f32.xlu1 %v3026_v39 }
 0x7b7   : > { %v2865_v21 = vadd.f32 %v7447_v41, %v9634_v22 }
 0x7b8   : > { %v2859_v18 = vpop.f32.mrf.mxu0 }
 0x7b9   : > { %v9656_v14 = vadd.f32 %v2865_v21, %v9532_v27  ;;  %v2860_v63 = vadd.f32 %v9634_v22, %v2859_v18 }
 0x7bb   : > { %v9660_v43 = vadd.f32 %v2860_v63, %v9529_v8  ;;  %v2955_v0 = vsel %vm521_vm1, %v9656_v14, 0.0  ;;  %v3013_v62 = vmul.f32 %v9656_v14, %v9656_v14 }
 0x7bc   : > { %2956 = vadd.xlane.f32.xlu0 %v2955_v0 }
 0x7bd   : > { %v2952_v26 = vsel %vm521_vm1, %v9660_v43, 0.0  ;;  %v3012_v19 = vmul.f32 %v9660_v43, %v9660_v43  ;;  %v3035_v27 = vsel %vm521_vm1, %v3013_v62, 0.0 }
 0x7be   : > { %2953 = vadd.xlane.f32.xlu1 %v2952_v26 }
 0x7bf   : > { %v3032_v8 = vsel %vm521_vm1, %v3012_v19, 0.0 }
 0x7c0   : > { %3036 = vadd.xlane.f32.xlu0 %v3035_v27 }
 0x7c2   : > { %v7450_v36 = vpop.f32.mrf.mxu0  ;;  %3033 = vadd.xlane.f32.xlu1 %v3032_v8 }
 0x7c3   : > { %v2875_v6 = vadd.f32 %v7450_v36, %v9634_v22 }
 0x7c4   : > { %v2869_v20 = vpop.f32.mrf.mxu0 }
 0x7c5   : > { %v9674_v52 = vadd.f32 %v2875_v6, %v9546_v35  ;;  %v2870_v33 = vadd.f32 %v9634_v22, %v2869_v20 }
 0x7c7   : > { %v9678_v15 = vadd.f32 %v2870_v33, %v9543_v61  ;;  %v2961_v24 = vsel %vm521_vm1, %v9674_v52, 0.0  ;;  %v3015_v4 = vmul.f32 %v9674_v52, %v9674_v52 }
 0x7c8   : > { %2962 = vadd.xlane.f32.xlu0 %v2961_v24 }
 0x7c9   : > { %v2958_v57 = vsel %vm521_vm1, %v9678_v15, 0.0  ;;  %v3014_v25 = vmul.f32 %v9678_v15, %v9678_v15  ;;  %v3041_v35 = vsel %vm521_vm1, %v3015_v4, 0.0 }
 0x7ca   : > { %2959 = vadd.xlane.f32.xlu1 %v2958_v57 }
 0x7cb   : > { %v3038_v61 = vsel %vm521_vm1, %v3014_v25, 0.0 }
 0x7cc   : > { %3042 = vadd.xlane.f32.xlu0 %v3041_v35 }
 0x7ce   : > { %v7453_v47 = vpop.f32.mrf.mxu0  ;;  %3039 = vadd.xlane.f32.xlu1 %v3038_v61 }
 0x7cf   : > { %v2885_v46 = vadd.f32 %v7453_v47, %v9634_v22 }
 0x7d0   : > { %v2879_v45 = vpop.f32.mrf.mxu0 }
 0x7d1   : > { %v9692_v31 = vadd.f32 %v2885_v46, %v9560_v16  ;;  %v2880_v7 = vadd.f32 %v9634_v22, %v2879_v45 }
 0x7d3   : > { %v9696_v13 = vadd.f32 %v2880_v7, %v9557_v12  ;;  %v2967_v32 = vsel %vm521_vm1, %v9692_v31, 0.0  ;;  %v3017_v2 = vmul.f32 %v9692_v31, %v9692_v31  ;;  %v6467_v12 = vld [vmem:[%s11355_s4 + $0x90] sm:$0xff] }
 0x7d4   : > { %2968 = vadd.xlane.f32.xlu0 %v2967_v32  ;;  %7468 = vmatprep.subr.mxu1 %v6467_v12 }
 0x7d5   : > { %v2964_v16 = vsel %vm521_vm1, %v9696_v13, 0.0  ;;  %v3016_v9 = vmul.f32 %v9696_v13, %v9696_v13  ;;  %v3047_v29 = vsel %vm521_vm1, %v3017_v2, 0.0  ;;  %7469 = vmatpush3.msra.mxu1 %v6467_v12 }
 0x7d6   : > { %2965 = vadd.xlane.f32.xlu1 %v2964_v16  ;;  %7470 = vmatprep.subr.mxu1 %v6466_v11  ;;  %v9800_v16 = vld [vmem:[%s11356_s5 + $0x5] ss:$0 sm:$0xff] }
 0x7d7   : > { %v3044_v5 = vsel %vm521_vm1, %v3016_v9, 0.0  ;;  %7471 = vmatpush3.msra.mxu1 %v6466_v11 }
 0x7d8   : > { %3048 = vadd.xlane.f32.xlu0 %v3047_v29  ;;  %7472 = vmatprep.subr.mxu1 %v6465_v17 }
 0x7d9   : > { %7473 = vmatpush3.msra.mxu1 %v6465_v17 }
 0x7da   : > { %v7456_v37 = vpop.f32.mrf.mxu0  ;;  %3045 = vadd.xlane.f32.xlu1 %v3044_v5 }
 0x7db   : > { %v2895_v44 = vadd.f32 %v7456_v37, %v9634_v22 }
 0x7dc   : > { %v2889_v56 = vpop.f32.mrf.mxu0 }
 0x7dd   : > { %v9722_v48 = vadd.f32 %v2895_v44, %v9574_v50  ;;  %v2890_v51 = vadd.f32 %v9634_v22, %v2889_v56 }
 0x7df   : > { %v9726_v55 = vadd.f32 %v2890_v51, %v9571_v40  ;;  %v2973_v3 = vsel %vm521_vm1, %v9722_v48, 0.0  ;;  %v3019_v53 = vmul.f32 %v9722_v48, %v9722_v48 }
 0x7e0   : > { %2974 = vadd.xlane.f32.xlu0 %v2973_v3 }
 0x7e1   : > { %v2970_v38 = vsel %vm521_vm1, %v9726_v55, 0.0  ;;  %v3018_v50 = vmul.f32 %v9726_v55, %v9726_v55  ;;  %v3053_v60 = vsel %vm521_vm1, %v3019_v53, 0.0 }
 0x7e2   : > { %2971 = vadd.xlane.f32.xlu1 %v2970_v38 }
 0x7e3   : > { %v3050_v40 = vsel %vm521_vm1, %v3018_v50, 0.0 }
 0x7e4   : > { %3054 = vadd.xlane.f32.xlu0 %v3053_v60 }
 0x7e6   : > { %v7459_v49 = vpop.f32.mrf.mxu0  ;;  %3051 = vadd.xlane.f32.xlu1 %v3050_v40 }
 0x7e7   : > { %v2905_v58 = vadd.f32 %v7459_v49, %v9634_v22 }
 0x7e8   : > { %v2899_v39 = vpop.f32.mrf.mxu0 }
 0x7e9   : > { %v9740_v41 = vadd.f32 %v2905_v58, %v9588_v23  ;;  %v2900_v21 = vadd.f32 %v9634_v22, %v2899_v39 }
 0x7eb   : > { %v9744_v18 = vadd.f32 %v2900_v21, %v9585_v42  ;;  %v2979_v63 = vsel %vm521_vm1, %v9740_v41, 0.0  ;;  %v3021_v0 = vmul.f32 %v9740_v41, %v9740_v41 }
 0x7ec   : > { %2980 = vadd.xlane.f32.xlu0 %v2979_v63 }
 0x7ed   : > { %v2976_v62 = vsel %vm521_vm1, %v9744_v18, 0.0  ;;  %v3020_v26 = vmul.f32 %v9744_v18, %v9744_v18  ;;  %v3059_v23 = vsel %vm521_vm1, %v3021_v0, 0.0 }
 0x7ee   : > { %2977 = vadd.xlane.f32.xlu1 %v2976_v62 }
 0x7ef   : > { %v3056_v42 = vsel %vm521_vm1, %v3020_v26, 0.0 }
 0x7f0   : > { %3060 = vadd.xlane.f32.xlu0 %v3059_v23 }
 0x7f2   : > { %v7462_v19 = vpop.f32.mrf.mxu0  ;;  %3057 = vadd.xlane.f32.xlu1 %v3056_v42 }
 0x7f3   : > { %v2915_v27 = vadd.f32 %v7462_v19, %v9634_v22 }
 0x7f4   : > { %v2909_v8 = vpop.f32.mrf.mxu0 }
 0x7f5   : > { %v9758_v36 = vadd.f32 %v2915_v27, %v9608_v59  ;;  %v2910_v6 = vadd.f32 %v9634_v22, %v2909_v8 }
 0x7f7   : > { %v9762_v20 = vadd.f32 %v2910_v6, %v9602_v34  ;;  %v2985_v33 = vsel %vm521_vm1, %v9758_v36, 0.0  ;;  %v3023_v24 = vmul.f32 %v9758_v36, %v9758_v36 }
 0x7f8   : > { %2986 = vadd.xlane.f32.xlu0 %v2985_v33 }
 0x7f9   : > { %v2982_v4 = vsel %vm521_vm1, %v9762_v20, 0.0  ;;  %v3022_v57 = vmul.f32 %v9762_v20, %v9762_v20  ;;  %v3065_v59 = vsel %vm521_vm1, %v3023_v24, 0.0 }
 0x7fa   : > { %2983 = vadd.xlane.f32.xlu1 %v2982_v4 }
 0x7fb   : > { %v3062_v34 = vsel %vm521_vm1, %v3022_v57, 0.0 }
 0x7fc   : > { %3066 = vadd.xlane.f32.xlu0 %v3065_v59  ;;  %v9811_v59 = vld [vmem:[%s11357_s6 + $0x4] ss:$0 sm:$0xff] }
 0x7fd   : > { %v7465_v25 = vpop.f32.mrf.mxu0 }
 0x7fe   : > { %v2925_v35 = vadd.f32 %v7465_v25, %v9634_v22  ;;  %3063 = vadd.xlane.f32.xlu1 %v3062_v34 }
 0x7ff   : > { %v2919_v61 = vpop.f32.mrf.mxu0 }
 0x800   : > { %v9776_v47 = vadd.f32 %v2925_v35, %v9622_v1  ;;  %v2920_v46 = vadd.f32 %v9634_v22, %v2919_v61  ;;  %v9795_v22 = vld [vmem:[%s11356_s5 + $0x6] ss:$0 sm:$0xff] }
 0x802   : > { %v9780_v45 = vadd.f32 %v2920_v46, %v9619_v10  ;;  %v2991_v7 = vsel %vm521_vm1, %v9776_v47, 0.0  ;;  %v3025_v32 = vmul.f32 %v9776_v47, %v9776_v47 }
 0x803   : > { %2992 = vadd.xlane.f32.xlu0 %v2991_v7 }
 0x804   : > { %v2988_v2 = vsel %vm521_vm1, %v9780_v45, 0.0  ;;  %v3024_v30 = vmul.f32 %v9780_v45, %v9780_v45  ;;  %v3071_v1 = vsel %vm521_vm1, %v3025_v32, 0.0 }
 0x805   : > { %2989 = vadd.xlane.f32.xlu1 %v2988_v2 }
 0x806   : > { %v3068_v10 = vsel %vm521_vm1, %v3024_v30, 0.0 }
 0x807   : > { %3072 = vadd.xlane.f32.xlu0 %v3071_v1 }
 0x809   : > { %3069 = vadd.xlane.f32.xlu1 %v3068_v10 }
 0x81a   : > { %3452 = vrot.lane.b32.xlu1 %v9800_v16, %s8386_s16 }
 0x81d   : > { %3913 = vrot.lane.b32.xlu0 %v9795_v22, %s8386_s16 }
 0x839   : > { %v2951_v9 = vpop.xlane.xlu0 %2950 }
 0x83a   : > { %v2995_v12 = vmul.f32 0.03125, %v2951_v9 }
 0x83b   : > { %v2948_v29 = vpop.xlane.xlu1 %2947 }
 0x83c   : > { %v2994_v5 = vmul.f32 0.03125, %v2948_v29  ;;  %v3091_v37 = vmul.f32 %v2995_v12, %v2995_v12  ;;  %v3123_v27 = vsub.f32 %v9638_v54, %v2995_v12 }
 0x83d   : > { %v3031_v11 = vpop.xlane.xlu0 %3030 }
 0x83e   : > { %v3075_v44 = vmul.f32 0.03125, %v3031_v11  ;;  %v3090_v56 = vmul.f32 %v2994_v5, %v2994_v5  ;;  %v3122_v24 = vsub.f32 %v9642_v28, %v2994_v5  ;;  %v9817_v28 = vld [vmem:[%s11357_s6 + $0x5] ss:$0 sm:$0xff] }
 0x83f   : > { %v3028_v17 = vpop.xlane.xlu1 %3027 }
 0x840   : > { %v3107_v51 = vsub.f32 %v3075_v44, %v3091_v37  ;;  %v3074_v3 = vmul.f32 0.03125, %v3028_v17 }
 0x842   : > { %v3139_v53 = vadd.f32 1e-05, %v3107_v51  ;;  %v3106_v38 = vsub.f32 %v3074_v3, %v3090_v56 }
 0x844   : > { %8079 = vrsqrt.f32 %v3139_v53  ;;  %v3138_v50 = vadd.f32 1e-05, %v3106_v38 }
 0x845   : > { %v2957_v60 = vpop.xlane.xlu0 %2956 }
 0x846   : > { %8081 = vrsqrt.f32 %v3138_v50  ;;  %v2997_v40 = vmul.f32 0.03125, %v2957_v60 }
 0x847   : > { %v2954_v49 = vpop.xlane.xlu1 %2953 }
 0x848   : > { %v2996_v58 = vmul.f32 0.03125, %v2954_v49  ;;  %v3093_v21 = vmul.f32 %v2997_v40, %v2997_v40  ;;  %v3125_v37 = vsub.f32 %v9656_v14, %v2997_v40 }
 0x849   : > { %v3037_v39 = vpop.xlane.xlu0 %3036 }
 0x84a   : > { %v3077_v63 = vmul.f32 0.03125, %v3037_v39  ;;  %v3092_v62 = vmul.f32 %v2996_v58, %v2996_v58  ;;  %v3124_v51 = vsub.f32 %v9660_v43, %v2996_v58 }
 0x84b   : > { %v3034_v0 = vpop.xlane.xlu1 %3033 }
 0x84c   : > { %v3109_v26 = vsub.f32 %v3077_v63, %v3093_v21  ;;  %v3076_v23 = vmul.f32 0.03125, %v3034_v0 }
 0x84e   : > { %v3141_v42 = vadd.f32 1e-05, %v3109_v26  ;;  %v3108_v19 = vsub.f32 %v3076_v23, %v3092_v62 }
 0x850   : > { %8083 = vrsqrt.f32 %v3141_v42  ;;  %v3140_v8 = vadd.f32 1e-05, %v3108_v19 }
 0x851   : > { %v8080_v6 = vpop.eup %8079  ;;  %v2963_v33 = vpop.xlane.xlu0 %2962 }
 0x852   : > { %v3171_v4 = vmul.f32 %v8080_v6, %v3123_v27  ;;  %8085 = vrsqrt.f32 %v3140_v8  ;;  %v2999_v57 = vmul.f32 0.03125, %v2963_v33 }
 0x853   : > { %v8082_v25 = vpop.eup %8081  ;;  %v2960_v34 = vpop.xlane.xlu1 %2959 }
 0x854   : > { %v2998_v35 = vmul.f32 0.03125, %v2960_v34  ;;  %v3170_v61 = vmul.f32 %v8082_v25, %v3122_v24  ;;  %v3191_v54 = vmul.f32 %v9811_v59, %v3171_v4  ;;  %v3095_v7 = vmul.f32 %v2999_v57, %v2999_v57 }
 0x855   : > { %v3043_v46 = vpop.xlane.xlu0 %3042  ;;  %v3127_v27 = vsub.f32 %v9674_v52, %v2999_v57 }
 0x856   : > { %v3079_v32 = vmul.f32 0.03125, %v3043_v46  ;;  %v3190_v2 = vmul.f32 %v9811_v59, %v3170_v61  ;;  %v3094_v1 = vmul.f32 %v2998_v35, %v2998_v35  ;;  %v9824_v29 = vadd.f32 %v9817_v28, %v3191_v54 }
 0x857   : > { %v3040_v30 = vpop.xlane.xlu1 %3039  ;;  %v3126_v24 = vsub.f32 %v9678_v15, %v2998_v35 }
 0x858   : > { %v3111_v10 = vsub.f32 %v3079_v32, %v3095_v7  ;;  %v3078_v9 = vmul.f32 0.03125, %v3040_v30  ;;  %v9821_v12 = vadd.f32 %v9817_v28, %v3190_v2 }
 0x85a   : > { %v3143_v5 = vadd.f32 1e-05, %v3111_v10  ;;  %v3110_v11 = vsub.f32 %v3078_v9, %v3094_v1  ;;  %7474 = vmatprep.mubr.msk.f32.mxu1 %vm521_vm1, %v9821_v12 }
 0x85b   : > { %7475 = vmatmul.mubr.msk.f32.vlgmr.msra.gmra.mxu1 %vm521_vm1, %v9824_v29 }
 0x85c   : > { %8087 = vrsqrt.f32 %v3143_v5  ;;  %v3142_v44 = vadd.f32 1e-05, %v3110_v11 }
 0x85d   : > { %v8084_v17 = vpop.eup %8083  ;;  %v2969_v56 = vpop.xlane.xlu0 %2968 }
 0x85e   : > { %8089 = vrsqrt.f32 %v3142_v44  ;;  %v3001_v3 = vmul.f32 0.03125, %v2969_v56  ;;  %v3173_v53 = vmul.f32 %v8084_v17, %v3125_v37 }
 0x85f   : > { %v8086_v38 = vpop.eup %8085  ;;  %v2966_v50 = vpop.xlane.xlu1 %2965 }
 0x860   : > { %v3000_v60 = vmul.f32 0.03125, %v2966_v50  ;;  %v3172_v49 = vmul.f32 %v8086_v38, %v3124_v51  ;;  %v3193_v21 = vmul.f32 %v9811_v59, %v3173_v53  ;;  %v3097_v63 = vmul.f32 %v3001_v3, %v3001_v3 }
 0x861   : > { %v3049_v39 = vpop.xlane.xlu0 %3048  ;;  %v3129_v37 = vsub.f32 %v9692_v31, %v3001_v3 }
 0x862   : > { %v3081_v0 = vmul.f32 0.03125, %v3049_v39  ;;  %v3192_v14 = vmul.f32 %v9811_v59, %v3172_v49  ;;  %v3096_v62 = vmul.f32 %v3000_v60, %v3000_v60  ;;  %v9838_v58 = vadd.f32 %v9817_v28, %v3193_v21 }
 0x863   : > { %v3046_v40 = vpop.xlane.xlu1 %3045  ;;  %v3128_v51 = vsub.f32 %v9696_v13, %v3000_v60 }
 0x864   : > { %v3113_v26 = vsub.f32 %v3081_v0, %v3097_v63  ;;  %v3080_v23 = vmul.f32 0.03125, %v3046_v40  ;;  %v9835_v43 = vadd.f32 %v9817_v28, %v3192_v14 }
 0x866   : > { %v3145_v42 = vadd.f32 1e-05, %v3113_v26  ;;  %v3112_v19 = vsub.f32 %v3080_v23, %v3096_v62  ;;  %7477 = vmatprep.mubr.msk.f32.mxu1 %vm521_vm1, %v9835_v43 }
 0x867   : > { %7478 = vmatmul.mubr.msk.f32.gmra.mxu1 %vm521_vm1, %v9838_v58 }
 0x868   : > { %8091 = vrsqrt.f32 %v3145_v42  ;;  %v3144_v8 = vadd.f32 1e-05, %v3112_v19 }
 0x869   : > { %v8088_v6 = vpop.eup %8087  ;;  %v2975_v33 = vpop.xlane.xlu0 %2974 }
 0x86a   : > { %8093 = vrsqrt.f32 %v3144_v8  ;;  %v3003_v4 = vmul.f32 0.03125, %v2975_v33  ;;  %v3175_v25 = vmul.f32 %v8088_v6, %v3127_v27 }
 0x86b   : > { %v8090_v34 = vpop.eup %8089  ;;  %v2972_v61 = vpop.xlane.xlu1 %2971 }
 0x86c   : > { %v3002_v46 = vmul.f32 0.03125, %v2972_v61  ;;  %v3174_v54 = vmul.f32 %v8090_v34, %v3126_v24  ;;  %v3195_v32 = vmul.f32 %v9811_v59, %v3175_v25  ;;  %v3099_v2 = vmul.f32 %v3003_v4, %v3003_v4 }
 0x86d   : > { %v3055_v7 = vpop.xlane.xlu0 %3054  ;;  %v3131_v27 = vsub.f32 %v9722_v48, %v3003_v4 }
 0x86e   : > { %v3083_v30 = vmul.f32 0.03125, %v3055_v7  ;;  %v3194_v52 = vmul.f32 %v9811_v59, %v3174_v54  ;;  %v3098_v1 = vmul.f32 %v3002_v46, %v3002_v46  ;;  %v9852_v35 = vadd.f32 %v9817_v28, %v3195_v32 }
 0x86f   : > { %v3052_v57 = vpop.xlane.xlu1 %3051  ;;  %v3130_v24 = vsub.f32 %v9726_v55, %v3002_v46 }
 0x870   : > { %v3115_v10 = vsub.f32 %v3083_v30, %v3099_v2  ;;  %v3082_v9 = vmul.f32 0.03125, %v3052_v57  ;;  %v9849_v15 = vadd.f32 %v9817_v28, %v3194_v52 }
 0x872   : > { %v3147_v5 = vadd.f32 1e-05, %v3115_v10  ;;  %v3114_v11 = vsub.f32 %v3082_v9, %v3098_v1  ;;  %7480 = vmatprep.mubr.msk.f32.mxu1 %vm521_vm1, %v9849_v15 }
 0x873   : > { %7481 = vmatmul.mubr.msk.f32.gmra.mxu1 %vm521_vm1, %v9852_v35 }
 0x874   : > { %8095 = vrsqrt.f32 %v3147_v5  ;;  %v3146_v44 = vadd.f32 1e-05, %v3114_v11 }
 0x875   : > { %v8092_v17 = vpop.eup %8091  ;;  %v2981_v56 = vpop.xlane.xlu0 %2980 }
 0x876   : > { %8097 = vrsqrt.f32 %v3146_v44  ;;  %v3005_v53 = vmul.f32 0.03125, %v2981_v56  ;;  %v3177_v38 = vmul.f32 %v8092_v17, %v3129_v37 }
 0x877   : > { %v8094_v50 = vpop.eup %8093  ;;  %v2978_v49 = vpop.xlane.xlu1 %2977 }
 0x878   : > { %v3004_v39 = vmul.f32 0.03125, %v2978_v49  ;;  %v3176_v21 = vmul.f32 %v8094_v50, %v3128_v51  ;;  %v3197_v0 = vmul.f32 %v9811_v59, %v3177_v38  ;;  %v3101_v14 = vmul.f32 %v3005_v53, %v3005_v53 }
 0x879   : > { %v3061_v63 = vpop.xlane.xlu0 %3060  ;;  %v3133_v37 = vsub.f32 %v9740_v41, %v3005_v53 }
 0x87a   : > { %v3085_v40 = vmul.f32 0.03125, %v3061_v63  ;;  %v3196_v31 = vmul.f32 %v9811_v59, %v3176_v21  ;;  %v3100_v62 = vmul.f32 %v3004_v39, %v3004_v39  ;;  %v9866_v60 = vadd.f32 %v9817_v28, %v3197_v0 }
 0x87b   : > { %v3058_v3 = vpop.xlane.xlu1 %3057  ;;  %v3132_v38 = vsub.f32 %v9744_v18, %v3004_v39 }
 0x87c   : > { %v3117_v26 = vsub.f32 %v3085_v40, %v3101_v14  ;;  %v3084_v23 = vmul.f32 0.03125, %v3058_v3  ;;  %v9863_v13 = vadd.f32 %v9817_v28, %v3196_v31 }
 0x87e   : > { %v3149_v42 = vadd.f32 1e-05, %v3117_v26  ;;  %v3116_v19 = vsub.f32 %v3084_v23, %v3100_v62  ;;  %7483 = vmatprep.mubr.msk.f32.mxu1 %vm521_vm1, %v9863_v13 }
 0x87f   : > { %7484 = vmatmul.mubr.msk.f32.gmra.mxu1 %vm521_vm1, %v9866_v60 }
 0x880   : > { %8099 = vrsqrt.f32 %v3149_v42  ;;  %v3148_v8 = vadd.f32 1e-05, %v3116_v19 }
 0x881   : > { %v8096_v6 = vpop.eup %8095  ;;  %v2987_v33 = vpop.xlane.xlu0 %2986 }
 0x882   : > { %8101 = vrsqrt.f32 %v3148_v8  ;;  %v3007_v25 = vmul.f32 0.03125, %v2987_v33  ;;  %v3179_v34 = vmul.f32 %v8096_v6, %v3131_v27 }
 0x883   : > { %v8098_v61 = vpop.eup %8097  ;;  %v2984_v54 = vpop.xlane.xlu1 %2983 }
 0x884   : > { %v3006_v7 = vmul.f32 0.03125, %v2984_v54  ;;  %v3178_v32 = vmul.f32 %v8098_v61, %v3130_v24  ;;  %v3199_v30 = vmul.f32 %v9811_v59, %v3179_v34  ;;  %v3103_v52 = vmul.f32 %v3007_v25, %v3007_v25 }
 0x885   : > { %v3067_v2 = vpop.xlane.xlu0 %3066  ;;  %v3135_v8 = vsub.f32 %v9758_v36, %v3007_v25 }
 0x886   : > { %v3087_v57 = vmul.f32 0.03125, %v3067_v2  ;;  %v3198_v48 = vmul.f32 %v9811_v59, %v3178_v32  ;;  %v3102_v1 = vmul.f32 %v3006_v7, %v3006_v7  ;;  %v9880_v46 = vadd.f32 %v9817_v28, %v3199_v30 }
 0x887   : > { %v3064_v4 = vpop.xlane.xlu1 %3063  ;;  %v3134_v33 = vsub.f32 %v9762_v20, %v3006_v7 }
 0x888   : > { %v3119_v10 = vsub.f32 %v3087_v57, %v3103_v52  ;;  %v3086_v9 = vmul.f32 0.03125, %v3064_v4  ;;  %v9877_v55 = vadd.f32 %v9817_v28, %v3198_v48 }
 0x88a   : > { %v3151_v5 = vadd.f32 1e-05, %v3119_v10  ;;  %v3118_v11 = vsub.f32 %v3086_v9, %v3102_v1  ;;  %7486 = vmatprep.mubr.msk.f32.mxu1 %vm521_vm1, %v9877_v55 }
 0x88b   : > { %7487 = vmatmul.mubr.msk.f32.gmra.mxu1 %vm521_vm1, %v9880_v46 }
 0x88c   : > { %8103 = vrsqrt.f32 %v3151_v5  ;;  %v3150_v44 = vadd.f32 1e-05, %v3118_v11  ;;  %v2993_v17 = vpop.xlane.xlu0 %2992 }
 0x88d   : > { %v8100_v56 = vpop.eup %8099  ;;  %v3009_v51 = vmul.f32 0.03125, %v2993_v17 }
 0x88e   : > { %8105 = vrsqrt.f32 %v3150_v44  ;;  %v2990_v50 = vpop.xlane.xlu1 %2989  ;;  %v3181_v49 = vmul.f32 %v8100_v56, %v3133_v37 }
 0x88f   : > { %v8102_v21 = vpop.eup %8101  ;;  %v3008_v63 = vmul.f32 0.03125, %v2990_v50  ;;  %v3105_v40 = vmul.f32 %v3009_v51, %v3009_v51  ;;  %v3137_v36 = vsub.f32 %v9776_v47, %v3009_v51 }
 0x890   : > { %v3073_v0 = vpop.xlane.xlu0 %3072  ;;  %v3180_v14 = vmul.f32 %v8102_v21, %v3132_v38  ;;  %v3201_v3 = vmul.f32 %v9811_v59, %v3181_v49 }
 0x891   : > { %v3089_v31 = vmul.f32 0.03125, %v3073_v0  ;;  %v3104_v53 = vmul.f32 %v3008_v63, %v3008_v63  ;;  %v3136_v25 = vsub.f32 %v9780_v45, %v3008_v63  ;;  %v9933_v45 = vld [vmem:[%s11357_s6 + $0x8] ss:$0 sm:$0xff] }
 0x892   : > { %v3070_v62 = vpop.xlane.xlu1 %3069  ;;  %v3200_v41 = vmul.f32 %v9811_v59, %v3180_v14  ;;  %v9894_v19 = vadd.f32 %v9817_v28, %v3201_v3 }
 0x893   : > { %v3121_v26 = vsub.f32 %v3089_v31, %v3105_v40  ;;  %v3088_v23 = vmul.f32 0.03125, %v3070_v62 }
 0x894   : > { %v9891_v42 = vadd.f32 %v9817_v28, %v3200_v41 }
 0x895   : > { %v3153_v18 = vadd.f32 1e-05, %v3121_v26  ;;  %v3120_v39 = vsub.f32 %v3088_v23, %v3104_v53  ;;  %v9964_v23 = vpop.permute.xlu0 %3913 }
 0x896   : > { %7489 = vmatprep.mubr.msk.f32.mxu1 %vm521_vm1, %v9891_v42  ;;  %v9951_v31 = vpop.permute.xlu1 %3452 }
 0x897   : > { %8107 = vrsqrt.f32 %v3153_v18  ;;  %v3152_v27 = vadd.f32 1e-05, %v3120_v39  ;;  %7490 = vmatmul.mubr.msk.f32.gmra.mxu1 %vm521_vm1, %v9894_v19 }
 0x899   : > { %v8104_v6 = vpop.eup %8103  ;;  %8109 = vrsqrt.f32 %v3152_v27 }
 0x89a   : > { %v3183_v24 = vmul.f32 %v8104_v6, %v3135_v8 }
 0x89b   : > { %v8106_v34 = vpop.eup %8105 }
 0x89c   : > { %v3182_v61 = vmul.f32 %v8106_v34, %v3134_v33  ;;  %v3203_v54 = vmul.f32 %v9811_v59, %v3183_v24 }
 0x89e   : > { %v3202_v32 = vmul.f32 %v9811_v59, %v3182_v61  ;;  %v9908_v30 = vadd.f32 %v9817_v28, %v3203_v54 }
 0x8a0   : > { %v9905_v2 = vadd.f32 %v9817_v28, %v3202_v32 }
 0x8a2   : > { %7492 = vmatprep.mubr.msk.f32.mxu1 %vm521_vm1, %v9905_v2 }
 0x8a3   : > { %7493 = vmatmul.mubr.msk.f32.gmra.mxu1 %vm521_vm1, %v9908_v30 }
 0x8a4   : > { %v8108_v20 = vpop.eup %8107 }
 0x8a5   : > { %v3185_v7 = vmul.f32 %v8108_v20, %v3137_v36 }
 0x8a6   : > { %v8110_v52 = vpop.eup %8109 }
 0x8a7   : > { %v3184_v57 = vmul.f32 %v8110_v52, %v3136_v25  ;;  %v3205_v48 = vmul.f32 %v9811_v59, %v3185_v7 }
 0x8a9   : > { %v3204_v4 = vmul.f32 %v9811_v59, %v3184_v57  ;;  %v9922_v10 = vadd.f32 %v9817_v28, %v3205_v48 }
 0x8ab   : > { %v9919_v1 = vadd.f32 %v9817_v28, %v3204_v4 }
 0x8ad   : > { %7495 = vmatprep.mubr.msk.f32.mxu1 %vm521_vm1, %v9919_v1 }
 0x8ae   : > { %7496 = vmatmul.mubr.msk.f32.gmra.mxu1 %vm521_vm1, %v9922_v10 }
 0x91b   : > { %v9928_v47 = vpop.f32.mrf.mxu1 }
 0x91d   : > { %v3351_v59 = vpop.f32.mrf.mxu1 }
 0x91e   : > { %v9936_v9 = vadd.f32 %v9933_v45, %v3351_v59 }
 0x920   : > { %v3435_v28 = vmul.f32 %v9800_v16, %v9936_v9  ;;  %v3896_v5 = vmul.f32 %v9795_v22, %v9936_v9 }
 0x922   : > { %7530 = vmatprep.mubr.msk.f32.mxu0 %vm521_vm1, %v3435_v28  ;;  %7586 = vmatprep.mubr.msk.f32.mxu1 %vm521_vm1, %v3896_v5 }
 0x927   : > { %v9944_v11 = vpop.f32.mrf.mxu1 }
 0x929   : > { %v9946_v37 = vpop.f32.mrf.mxu1 }
 0x933   : > { %v7482_v44 = vpop.f32.mrf.mxu1 }
 0x935   : > { %v3371_v17 = vpop.f32.mrf.mxu1 }
 0x93f   : > { %v7485_v56 = vpop.f32.mrf.mxu1 }
 0x940   : > { %v10015_v57 = vadd.f32 %v7485_v56, %v9933_v45  ;;  %v10033_v56 = vadd.f32 %v7482_v44, %v9933_v45 }
 0x941   : > { %v3381_v51 = vpop.f32.mrf.mxu1 }
 0x942   : > { %v10024_v59 = vadd.f32 %v9933_v45, %v3381_v51  ;;  %v3462_v28 = vmul.f32 %v9951_v31, %v10015_v57  ;;  %v3923_v51 = vmul.f32 %v9964_v23, %v10015_v57 }
 0x944   : > { %v3922_v44 = vmul.f32 %v9964_v23, %v10024_v59 }
 0x94b   : > { %v7488_v38 = vpop.f32.mrf.mxu1 }
 0x94c   : > { %v9997_v32 = vadd.f32 %v7488_v38, %v9933_v45  ;;  %v3461_v38 = vmul.f32 %v9951_v31, %v10024_v59 }
 0x94d   : > { %v3391_v50 = vpop.f32.mrf.mxu1 }
 0x94e   : > { %v10006_v25 = vadd.f32 %v9933_v45, %v3391_v50  ;;  %v3464_v7 = vmul.f32 %v9951_v31, %v9997_v32  ;;  %v3925_v4 = vmul.f32 %v9964_v23, %v9997_v32  ;;  %v10042_v50 = vadd.f32 %v9933_v45, %v3371_v17 }
 0x950   : > { %v3463_v48 = vmul.f32 %v9951_v31, %v10006_v25  ;;  %v3924_v5 = vmul.f32 %v9964_v23, %v10006_v25  ;;  %v3459_v17 = vmul.f32 %v9951_v31, %v10042_v50 }
 0x957   : > { %v7491_v49 = vpop.f32.mrf.mxu1 }
 0x958   : > { %v9979_v6 = vadd.f32 %v7491_v49, %v9933_v45  ;;  %v3460_v49 = vmul.f32 %v9951_v31, %v10033_v56 }
 0x959   : > { %v3401_v21 = vpop.f32.mrf.mxu1 }
 0x95a   : > { %v9988_v34 = vadd.f32 %v9933_v45, %v3401_v21  ;;  %v3466_v61 = vmul.f32 %v9951_v31, %v9979_v6  ;;  %v3927_v20 = vmul.f32 %v9964_v23, %v9979_v6  ;;  %v10052_v21 = vadd.f32 %v9944_v11, %v9933_v45 }
 0x95c   : > { %v3465_v36 = vmul.f32 %v9951_v31, %v9988_v34  ;;  %v3926_v52 = vmul.f32 %v9964_v23, %v9988_v34  ;;  %v3458_v11 = vmul.f32 %v9951_v31, %v10052_v21 }
 0x963   : > { %v7494_v63 = vpop.f32.mrf.mxu1 }
 0x964   : > { %v9959_v53 = vadd.f32 %v7494_v63, %v9933_v45  ;;  %v3921_v63 = vmul.f32 %v9964_v23, %v10033_v56 }
 0x965   : > { %v3411_v0 = vpop.f32.mrf.mxu1 }
 0x966   : > { %v9970_v39 = vadd.f32 %v9933_v45, %v3411_v0  ;;  %v3468_v27 = vmul.f32 %v9951_v31, %v9959_v53  ;;  %v3929_v24 = vmul.f32 %v9964_v23, %v9959_v53  ;;  %v10062_v0 = vadd.f32 %v9933_v45, %v9946_v37 }
 0x968   : > { %v3467_v33 = vmul.f32 %v9951_v31, %v9970_v39  ;;  %v3928_v54 = vmul.f32 %v9964_v23, %v9970_v39  ;;  %v3457_v37 = vmul.f32 %v9951_v31, %v10062_v0 }
 0x96e   : > { %v7497_v14 = vpop.f32.mrf.mxu1 }
 0x96f   : > { %v9949_v40 = vadd.f32 %v7497_v14, %v9933_v45  ;;  %v3920_v14 = vmul.f32 %v9964_v23, %v10042_v50 }
 0x970   : > { %v3421_v3 = vpop.f32.mrf.mxu1 }
 0x971   : > { %v9954_v62 = vadd.f32 %v9933_v45, %v3421_v3  ;;  %v3470_v41 = vmul.f32 %v9951_v31, %v9949_v40  ;;  %v3931_v18 = vmul.f32 %v9964_v23, %v9949_v40  ;;  %v10072_v3 = vadd.f32 %v9928_v47, %v9933_v45 }
 0x972   : > { %v3918_v47 = vmul.f32 %v9964_v23, %v10062_v0  ;;  %v3455_v45 = vmul.f32 %v9951_v31, %v9936_v9 }
 0x973   : > { %3517 = vrot.lane.b32.xlu1 %v3470_v41, %s8387_s23  ;;  %v3469_v26 = vmul.f32 %v9951_v31, %v9954_v62  ;;  %v3930_v8 = vmul.f32 %v9964_v23, %v9954_v62  ;;  %v3919_v41 = vmul.f32 %v9964_v23, %v10052_v21 }
 0x975   : > { %3515 = vrot.lane.b32.xlu0 %v3469_v26, %s8387_s23  ;;  %v3456_v26 = vmul.f32 %v9951_v31, %v10072_v3 }
 0x977   : > { %3978 = vrot.lane.b32.xlu1 %v3931_v18, %s8387_s23  ;;  %v3917_v18 = vmul.f32 %v9964_v23, %v10072_v3 }
 0x979   : > { %3513 = vrot.lane.b32.xlu0 %v3468_v27, %s8387_s23  ;;  %v3916_v27 = vmul.f32 %v9964_v23, %v9936_v9 }
 0x97b   : > { %3976 = vrot.lane.b32.xlu1 %v3930_v8, %s8387_s23 }
 0x97d   : > { %3511 = vrot.lane.b32.xlu0 %v3467_v33, %s8387_s23 }
 0x97f   : > { %3974 = vrot.lane.b32.xlu1 %v3929_v24, %s8387_s23 }
 0x981   : > { %3509 = vrot.lane.b32.xlu0 %v3466_v61, %s8387_s23 }
 0x983   : > { %3972 = vrot.lane.b32.xlu1 %v3928_v54, %s8387_s23 }
 0x985   : > { %3507 = vrot.lane.b32.xlu0 %v3465_v36, %s8387_s23 }
 0x987   : > { %3970 = vrot.lane.b32.xlu1 %v3927_v20, %s8387_s23 }
 0x989   : > { %3505 = vrot.lane.b32.xlu0 %v3464_v7, %s8387_s23 }
 0x98b   : > { %3968 = vrot.lane.b32.xlu1 %v3926_v52, %s8387_s23 }
 0x98d   : > { %3503 = vrot.lane.b32.xlu0 %v3463_v48, %s8387_s23 }
 0x98f   : > { %3966 = vrot.lane.b32.xlu1 %v3925_v4, %s8387_s23 }
 0x991   : > { %3501 = vrot.lane.b32.xlu0 %v3462_v28, %s8387_s23 }
 0x993   : > { %3964 = vrot.lane.b32.xlu1 %v3924_v5, %s8387_s23 }
 0x995   : > { %3499 = vrot.lane.b32.xlu0 %v3461_v38, %s8387_s23 }
 0x997   : > { %3962 = vrot.lane.b32.xlu1 %v3923_v51, %s8387_s23 }
 0x999   : > { %3497 = vrot.lane.b32.xlu0 %v3460_v49, %s8387_s23 }
 0x99b   : > { %3960 = vrot.lane.b32.xlu1 %v3922_v44, %s8387_s23 }
 0x99d   : > { %3495 = vrot.lane.b32.xlu0 %v3459_v17, %s8387_s23 }
 0x99f   : > { %3958 = vrot.lane.b32.xlu1 %v3921_v63, %s8387_s23 }
 0x9a1   : > { %3493 = vrot.lane.b32.xlu0 %v3458_v11, %s8387_s23 }
 0x9a3   : > { %3956 = vrot.lane.b32.xlu1 %v3920_v14, %s8387_s23 }
 0x9a5   : > { %3491 = vrot.lane.b32.xlu0 %v3457_v37, %s8387_s23 }
 0x9a7   : > { %3954 = vrot.lane.b32.xlu1 %v3919_v41, %s8387_s23 }
 0x9a9   : > { %3489 = vrot.lane.b32.xlu0 %v3456_v26, %s8387_s23 }
 0x9ab   : > { %3952 = vrot.lane.b32.xlu1 %v3918_v47, %s8387_s23 }
 0x9ad   : > { %3487 = vrot.lane.b32.xlu0 %v3455_v45, %s8387_s23 }
 0x9af   : > { %3950 = vrot.lane.b32.xlu1 %v3917_v18, %s8387_s23 }
 0x9b1   : > { %3872 = vrot.lane.b32.xlu0 %v9800_v16, %s8388_s29 }
 0x9b3   : > { %3948 = vrot.lane.b32.xlu1 %v3916_v27, %s8387_s23  ;;  %s270_s23 = sand.u32 1, %s8376_s25  }
 0x9b4   : > { %s6323_s18 = sshll.u32 %s270_s23, 4  ;;  %s11311_s13 = scalar_lea.sflag [#allocation3], %s270_s23 }
 0x9b5   : > { %s272_s20 = scalar_lea.vmem [#allocation2], %s6323_s18 }
 0x9b6   : > { %s6257_s21 = sshll.u32 %s272_s20, 4  ;;  %s11304_s21 = int_to_ptr.vmem [resolvable:$true] %s6257_s21 }
 0x9b7   : > { %4333 = vrot.lane.b32.xlu1 %v9795_v22, %s8388_s29  ;;  %s8324_s14 = scalar_lea.vmem %s11304_s21, 256  ;;  %p8331_p0 = scmp.lt.s32.totalorder %s11304_s21, %s8329_s15 }
 0x9b8   : > { %p8325_p11 = scmp.ne.s32.totalorder %s11304_s21, %s8324_s14  ;;  %p8332_p1 = scmp.lt.s32.totalorder %s8330_s17, %s8324_s14 }
 0x9ba   : > { %p8326_p12 = pnand %p8325_p11, %p8470_p5  ;;  %p8333_p2 = por %p8332_p1, %p8331_p0 }
 0x9bc   : > { %p8327_p13 = pneg %p8326_p12 }
 0x9be   : > { %p8334_p3 = pnand %p8333_p2, %p8327_p13 }
 0x9e5   : > { %v3518_v8 = vpop.permute.xlu1 %3517 }
 0x9e6   : > { %7498 = vmatprep.subr.msk.mxu0 %vm521_vm1, %v3518_v8 }
 0x9e7   : > { %7499 = vmatpush3.xpose.msk.msra.mxu0 %vm521_vm1, %v3518_v8  ;;  %v3516_v31 = vpop.permute.xlu0 %3515 }
 0x9e8   : > { %7500 = vmatprep.subr.msk.mxu0 %vm521_vm1, %v3516_v31 }
 0x9e9   : > { %v3979_v33 = vpop.permute.xlu1 %3978 }
 0x9ea   : > { %7554 = vmatprep.subr.msk.mxu1 %vm521_vm1, %v3979_v33 }
 0x9eb   : > { %7501 = vmatpush3.xpose.msk.msra.mxu0 %vm521_vm1, %v3516_v31  ;;  %7555 = vmatpush3.xpose.msk.msra.mxu1 %vm521_vm1, %v3979_v33  ;;  %v3514_v23 = vpop.permute.xlu0 %3513  ;;  %v3436_v33 = vmul.f32 %v9800_v16, %v10072_v3 }
 0x9ec   : > { %7502 = vmatprep.subr.msk.mxu0 %vm521_vm1, %v3514_v23 }
 0x9ed   : > { %v3977_v24 = vpop.permute.xlu1 %3976 }
 0x9ee   : > { %7556 = vmatprep.subr.msk.mxu1 %vm521_vm1, %v3977_v24 }
 0x9ef   : > { %7503 = vmatpush3.xpose.msk.msra.mxu0 %vm521_vm1, %v3514_v23  ;;  %7557 = vmatpush3.xpose.msk.msra.mxu1 %vm521_vm1, %v3977_v24  ;;  %v3512_v61 = vpop.permute.xlu0 %3511 }
 0x9f0   : > { %7504 = vmatprep.subr.msk.mxu0 %vm521_vm1, %v3512_v61 }
 0x9f1   : > { %v3975_v54 = vpop.permute.xlu1 %3974 }
 0x9f2   : > { %7558 = vmatprep.subr.msk.mxu1 %vm521_vm1, %v3975_v54 }
 0x9f3   : > { %7505 = vmatpush3.xpose.msk.msra.mxu0 %vm521_vm1, %v3512_v61  ;;  %7559 = vmatpush3.xpose.msk.msra.mxu1 %vm521_vm1, %v3975_v54  ;;  %v3510_v36 = vpop.permute.xlu0 %3509  ;;  %v3437_v61 = vmul.f32 %v9800_v16, %v10062_v0  ;;  %v3438_v54 = vmul.f32 %v9800_v16, %v10052_v21 }
 0x9f4   : > { %7506 = vmatprep.subr.msk.mxu0 %vm521_vm1, %v3510_v36 }
 0x9f5   : > { %v3973_v20 = vpop.permute.xlu1 %3972 }
 0x9f6   : > { %7560 = vmatprep.subr.msk.mxu1 %vm521_vm1, %v3973_v20 }
 0x9f7   : > { %7507 = vmatpush3.xpose.msk.msra.mxu0 %vm521_vm1, %v3510_v36  ;;  %7561 = vmatpush3.xpose.msk.msra.mxu1 %vm521_vm1, %v3973_v20  ;;  %v3508_v7 = vpop.permute.xlu0 %3507  ;;  %v3897_v20 = vmul.f32 %v9795_v22, %v10072_v3 }
 0x9f8   : > { %7508 = vmatprep.subr.msk.mxu0 %vm521_vm1, %v3508_v7 }
 0x9f9   : > { %v3971_v52 = vpop.permute.xlu1 %3970 }
 0x9fa   : > { %7562 = vmatprep.subr.msk.mxu1 %vm521_vm1, %v3971_v52 }
 0x9fb   : > { %7509 = vmatpush3.xpose.msk.msra.mxu0 %vm521_vm1, %v3508_v7  ;;  %7563 = vmatpush3.xpose.msk.msra.mxu1 %vm521_vm1, %v3971_v52  ;;  %v3506_v48 = vpop.permute.xlu0 %3505  ;;  %v3439_v7 = vmul.f32 %v9800_v16, %v10042_v50  ;;  %v3898_v52 = vmul.f32 %v9795_v22, %v10062_v0 }
 0x9fc   : > { %7510 = vmatprep.subr.msk.mxu0 %vm521_vm1, %v3506_v48 }
 0x9fd   : > { %v3969_v4 = vpop.permute.xlu1 %3968 }
 0x9fe   : > { %7564 = vmatprep.subr.msk.mxu1 %vm521_vm1, %v3969_v4 }
 0x9ff   : > { %7511 = vmatpush3.xpose.msk.msra.mxu0 %vm521_vm1, %v3506_v48  ;;  %7565 = vmatpush3.xpose.msk.msra.mxu1 %vm521_vm1, %v3969_v4  ;;  %v3504_v28 = vpop.permute.xlu0 %3503 }
 0xa00   : > { %7512 = vmatprep.subr.msk.mxu0 %vm521_vm1, %v3504_v28 }
 0xa01   : > { %v3967_v5 = vpop.permute.xlu1 %3966 }
 0xa02   : > { %7566 = vmatprep.subr.msk.mxu1 %vm521_vm1, %v3967_v5 }
 0xa03   : > { %7513 = vmatpush3.xpose.msk.msra.mxu0 %vm521_vm1, %v3504_v28  ;;  %7567 = vmatpush3.xpose.msk.msra.mxu1 %vm521_vm1, %v3967_v5  ;;  %v3502_v38 = vpop.permute.xlu0 %3501  ;;  %v3440_v28 = vmul.f32 %v9800_v16, %v10033_v56  ;;  %v3899_v5 = vmul.f32 %v9795_v22, %v10052_v21 }
 0xa04   : > { %7514 = vmatprep.subr.msk.mxu0 %vm521_vm1, %v3502_v38 }
 0xa05   : > { %v3965_v51 = vpop.permute.xlu1 %3964 }
 0xa06   : > { %7568 = vmatprep.subr.msk.mxu1 %vm521_vm1, %v3965_v51 }
 0xa07   : > { %7515 = vmatpush3.xpose.msk.msra.mxu0 %vm521_vm1, %v3502_v38  ;;  %7569 = vmatpush3.xpose.msk.msra.mxu1 %vm521_vm1, %v3965_v51  ;;  %v3500_v49 = vpop.permute.xlu0 %3499  ;;  %v3441_v38 = vmul.f32 %v9800_v16, %v10024_v59  ;;  %v3900_v51 = vmul.f32 %v9795_v22, %v10042_v50 }
 0xa08   : > { %7516 = vmatprep.subr.msk.mxu0 %vm521_vm1, %v3500_v49 }
 0xa09   : > { %v3963_v44 = vpop.permute.xlu1 %3962 }
 0xa0a   : > { %7570 = vmatprep.subr.msk.mxu1 %vm521_vm1, %v3963_v44 }
 0xa0b   : > { %7517 = vmatpush3.xpose.msk.msra.mxu0 %vm521_vm1, %v3500_v49  ;;  %7571 = vmatpush3.xpose.msk.msra.mxu1 %vm521_vm1, %v3963_v44  ;;  %v3498_v17 = vpop.permute.xlu0 %3497 }
 0xa0c   : > { %7518 = vmatprep.subr.msk.mxu0 %vm521_vm1, %v3498_v17 }
 0xa0d   : > { %v3961_v63 = vpop.permute.xlu1 %3960 }
 0xa0e   : > { %7572 = vmatprep.subr.msk.mxu1 %vm521_vm1, %v3961_v63 }
 0xa0f   : > { %7519 = vmatpush3.xpose.msk.msra.mxu0 %vm521_vm1, %v3498_v17  ;;  %7573 = vmatpush3.xpose.msk.msra.mxu1 %vm521_vm1, %v3961_v63  ;;  %v3496_v11 = vpop.permute.xlu0 %3495  ;;  %v3442_v17 = vmul.f32 %v9800_v16, %v10015_v57  ;;  %v3901_v63 = vmul.f32 %v9795_v22, %v10033_v56 }
 0xa10   : > { %7520 = vmatprep.subr.msk.mxu0 %vm521_vm1, %v3496_v11 }
 0xa11   : > { %v3959_v14 = vpop.permute.xlu1 %3958 }
 0xa12   : > { %7574 = vmatprep.subr.msk.mxu1 %vm521_vm1, %v3959_v14 }
 0xa13   : > { %7521 = vmatpush3.xpose.msk.msra.mxu0 %vm521_vm1, %v3496_v11  ;;  %7575 = vmatpush3.xpose.msk.msra.mxu1 %vm521_vm1, %v3959_v14  ;;  %v3494_v37 = vpop.permute.xlu0 %3493  ;;  %v3443_v11 = vmul.f32 %v9800_v16, %v10006_v25  ;;  %v3902_v14 = vmul.f32 %v9795_v22, %v10024_v59 }
 0xa14   : > { %7522 = vmatprep.subr.msk.mxu0 %vm521_vm1, %v3494_v37 }
 0xa15   : > { %v3957_v41 = vpop.permute.xlu1 %3956 }
 0xa16   : > { %7576 = vmatprep.subr.msk.mxu1 %vm521_vm1, %v3957_v41 }
 0xa17   : > { %7523 = vmatpush3.xpose.msk.msra.mxu0 %vm521_vm1, %v3494_v37  ;;  %7577 = vmatpush3.xpose.msk.msra.mxu1 %vm521_vm1, %v3957_v41  ;;  %v3492_v26 = vpop.permute.xlu0 %3491 }
 0xa18   : > { %7524 = vmatprep.subr.msk.mxu0 %vm521_vm1, %v3492_v26 }
 0xa19   : > { %v3955_v47 = vpop.permute.xlu1 %3954 }
 0xa1a   : > { %7578 = vmatprep.subr.msk.mxu1 %vm521_vm1, %v3955_v47 }
 0xa1b   : > { %7525 = vmatpush3.xpose.msk.msra.mxu0 %vm521_vm1, %v3492_v26  ;;  %7579 = vmatpush3.xpose.msk.msra.mxu1 %vm521_vm1, %v3955_v47  ;;  %v3490_v45 = vpop.permute.xlu0 %3489  ;;  %v3444_v26 = vmul.f32 %v9800_v16, %v9997_v32  ;;  %v3903_v47 = vmul.f32 %v9795_v22, %v10015_v57 }
 0xa1c   : > { %7526 = vmatprep.subr.msk.mxu0 %vm521_vm1, %v3490_v45 }
 0xa1d   : > { %v3953_v18 = vpop.permute.xlu1 %3952 }
 0xa1e   : > { %7580 = vmatprep.subr.msk.mxu1 %vm521_vm1, %v3953_v18 }
 0xa1f   : > { %7527 = vmatpush3.xpose.msk.msra.mxu0 %vm521_vm1, %v3490_v45  ;;  %7581 = vmatpush3.xpose.msk.msra.mxu1 %vm521_vm1, %v3953_v18  ;;  %v3488_v27 = vpop.permute.xlu0 %3487  ;;  %v3445_v45 = vmul.f32 %v9800_v16, %v9988_v34  ;;  %v3904_v18 = vmul.f32 %v9795_v22, %v10006_v25 }
 0xa20   : > { %7528 = vmatprep.subr.msk.mxu0 %vm521_vm1, %v3488_v27 }
 0xa21   : > { %v3951_v8 = vpop.permute.xlu1 %3950 }
 0xa22   : > { %7582 = vmatprep.subr.msk.mxu1 %vm521_vm1, %v3951_v8 }
 0xa23   : > { %7529 = vmatpush3.xpose.msk.msra.mxu0 %vm521_vm1, %v3488_v27  ;;  %7583 = vmatpush3.xpose.msk.msra.mxu1 %vm521_vm1, %v3951_v8  ;;  %v10162_v31 = vpop.permute.xlu0 %3872 }
 0xa24   : > { %v3890_v23 = vmul.f32 %v10162_v31, %v9949_v40  ;;  %v3888_v49 = vmul.f32 %v10162_v31, %v9959_v53  ;;  %v3886_v37 = vmul.f32 %v10162_v31, %v9979_v6  ;;  %v3887_v41 = vmul.f32 %v10162_v31, %v9970_v39 }
 0xa25   : > { %v3949_v24 = vpop.permute.xlu1 %3948  ;;  %v3884_v27 = vmul.f32 %v10162_v31, %v9997_v32 }
 0xa26   : > { %7531 = vmatmul.mubr.msk.f32.vlgmr.msra.gmra.mxu0 %vm521_vm1, %v3436_v33  ;;  %7584 = vmatprep.subr.msk.mxu1 %vm521_vm1, %v3949_v24  ;;  %v3446_v33 = vmul.f32 %v9800_v16, %v9979_v6 }
 0xa27   : > { %4607 = vrot.lane.b32.xlu1 %v3890_v23, %s8388_s29  ;;  %7533 = vmatprep.mubr.msk.f32.mxu0 %vm521_vm1, %v3437_v61  ;;  %v3905_v23 = vmul.f32 %v9795_v22, %v9997_v32  ;;  %v3906_v61 = vmul.f32 %v9795_v22, %v9988_v34 }
 0xa28   : > { %7585 = vmatpush3.xpose.msk.msra.mxu1 %vm521_vm1, %v3949_v24  ;;  %v3447_v24 = vmul.f32 %v9800_v16, %v9970_v39 }
 0xa29   : > { %v10177_v36 = vpop.permute.xlu1 %4333 }
 0xa2a   : > { %7534 = vmatmul.mubr.msk.f32.gmra.mxu0 %vm521_vm1, %v3438_v54  ;;  %v4351_v48 = vmul.f32 %v10177_v36, %v9949_v40  ;;  %v4349_v4 = vmul.f32 %v10177_v36, %v9959_v53  ;;  %v4348_v44 = vmul.f32 %v10177_v36, %v9970_v39  ;;  %v4347_v8 = vmul.f32 %v10177_v36, %v9979_v6 }
 0xa2b   : > { %7587 = vmatmul.mubr.msk.f32.vlgmr.msra.gmra.mxu1 %vm521_vm1, %v3897_v20  ;;  %7536 = vmatprep.mubr.msk.f32.mxu0 %vm521_vm1, %v3439_v7  ;;  %v3882_v54 = vmul.f32 %v10162_v31, %v10015_v57  ;;  %v4346_v20 = vmul.f32 %v10177_v36, %v9988_v34  ;;  %v3448_v7 = vmul.f32 %v9800_v16, %v9959_v53 }
 0xa2c   : > { %7589 = vmatprep.mubr.msk.f32.mxu1 %vm521_vm1, %v3898_v52  ;;  %4398 = vrot.lane.b32.xlu0 %v4351_v48, %s8388_s29  ;;  %v3907_v52 = vmul.f32 %v9795_v22, %v9979_v6  ;;  %v3449_v48 = vmul.f32 %v9800_v16, %v9954_v62  ;;  %v3450_v6 = vmul.f32 %v9800_v16, %v9949_v40 }
 0xa2d   : > { %4394 = vrot.lane.b32.xlu1 %v4349_v4, %s8388_s29  ;;  %v3908_v4 = vmul.f32 %v9795_v22, %v9970_v39  ;;  %v8307_v22 = vld [vmem:[%s11356_s5 + $0x6] ss:$0 sm:$0xff]  ;;  %v4345_v16 = vmul.f32 %v10177_v36, %v9997_v32  ;;  %v4350_v32 = vmul.f32 %v10177_v36, %v9954_v62 }
 0xa2e   : > { %7537 = vmatmul.mubr.msk.f32.gmra.mxu0 %vm521_vm1, %v3440_v28  ;;  %v3880_v28 = vmul.f32 %v10162_v31, %v10033_v56  ;;  %v3909_v39 = vmul.f32 %v8307_v22, %v9959_v53  ;;  %v3911_v53 = vmul.f32 %v8307_v22, %v9949_v40  ;;  %v4343_v40 = vmul.f32 %v10177_v36, %v10015_v57 }
 0xa2f   : > { %7590 = vmatmul.mubr.msk.f32.gmra.mxu1 %vm521_vm1, %v3899_v5  ;;  %7539 = vmatprep.mubr.msk.f32.mxu0 %vm521_vm1, %v3441_v38  ;;  %v3885_v5 = vmul.f32 %v10162_v31, %v9988_v34  ;;  %v3910_v38 = vmul.f32 %v8307_v22, %v9954_v62  ;;  %v3878_v34 = vmul.f32 %v10162_v31, %v10052_v21 }
 0xa30   : > { %7592 = vmatprep.mubr.msk.f32.mxu1 %vm521_vm1, %v3900_v51  ;;  %4603 = vrot.lane.b32.xlu0 %v3888_v49, %s8388_s29  ;;  %v3876_v51 = vmul.f32 %v10162_v31, %v10072_v3  ;;  %v4344_v49 = vmul.f32 %v10177_v36, %v10006_v25  ;;  %v4340_v57 = vmul.f32 %v10177_v36, %v10042_v50 }
 0xa31   : > { %4392 = vrot.lane.b32.xlu1 %v4348_v44, %s8388_s29  ;;  %v3883_v44 = vmul.f32 %v10162_v31, %v10006_v25  ;;  %v4341_v25 = vmul.f32 %v10177_v36, %v10033_v56  ;;  %v4338_v56 = vmul.f32 %v10177_v36, %v10062_v0 }
 0xa32   : > { %7540 = vmatmul.mubr.msk.f32.gmra.mxu0 %vm521_vm1, %v3442_v17  ;;  %v4342_v17 = vmul.f32 %v10177_v36, %v10024_v59 }
 0xa33   : > { %7593 = vmatmul.mubr.msk.f32.gmra.mxu1 %vm521_vm1, %v3901_v63  ;;  %7542 = vmatprep.mubr.msk.f32.mxu0 %vm521_vm1, %v3443_v11  ;;  %v3881_v63 = vmul.f32 %v10162_v31, %v10024_v59  ;;  %v3879_v11 = vmul.f32 %v10162_v31, %v10042_v50  ;;  %v4339_v59 = vmul.f32 %v10177_v36, %v10052_v21 }
 0xa34   : > { %7595 = vmatprep.mubr.msk.f32.mxu1 %vm521_vm1, %v3902_v14  ;;  %4599 = vrot.lane.b32.xlu0 %v3886_v37, %s8388_s29  ;;  %v3877_v14 = vmul.f32 %v10162_v31, %v10062_v0  ;;  %v4337_v50 = vmul.f32 %v10177_v36, %v10072_v3  ;;  %v4336_v21 = vmul.f32 %v10177_v36, %v9936_v9 }
 0xa35   : > { %4601 = vrot.lane.b32.xlu1 %v3887_v41, %s8388_s29  ;;  %v3875_v37 = vmul.f32 %v10162_v31, %v9936_v9  ;;  %v3889_v0 = vmul.f32 %v10162_v31, %v9954_v62 }
 0xa36   : > { %7543 = vmatmul.mubr.msk.f32.gmra.mxu0 %vm521_vm1, %v3444_v26 }
 0xa37   : > { %7596 = vmatmul.mubr.msk.f32.gmra.mxu1 %vm521_vm1, %v3903_v47  ;;  %7545 = vmatprep.mubr.msk.f32.mxu0 %vm521_vm1, %v3445_v45 }
 0xa38   : > { %7598 = vmatprep.mubr.msk.f32.mxu1 %vm521_vm1, %v3904_v18  ;;  %4595 = vrot.lane.b32.xlu0 %v3884_v27, %s8388_s29 }
 0xa39   : > { %4390 = vrot.lane.b32.xlu1 %v4347_v8, %s8388_s29 }
 0xa3a   : > { %7546 = vmatmul.mubr.msk.f32.gmra.mxu0 %vm521_vm1, %v3446_v33 }
 0xa3b   : > { %7599 = vmatmul.mubr.msk.f32.gmra.mxu1 %vm521_vm1, %v3905_v23  ;;  %7548 = vmatprep.mubr.msk.f32.mxu0 %vm521_vm1, %v3447_v24 }
 0xa3c   : > { %7601 = vmatprep.mubr.msk.f32.mxu1 %vm521_vm1, %v3906_v61  ;;  %4591 = vrot.lane.b32.xlu0 %v3882_v54, %s8388_s29 }
 0xa3d   : > { %4388 = vrot.lane.b32.xlu1 %v4346_v20, %s8388_s29 }
 0xa3e   : > { %7549 = vmatmul.mubr.msk.f32.gmra.mxu0 %vm521_vm1, %v3448_v7 }
 0xa3f   : > { %7602 = vmatmul.mubr.msk.f32.gmra.mxu1 %vm521_vm1, %v3907_v52  ;;  %7551 = vmatprep.mubr.msk.f32.mxu0 %vm521_vm1, %v3449_v48 }
 0xa40   : > { %7604 = vmatprep.mubr.msk.f32.mxu1 %vm521_vm1, %v3908_v4  ;;  %4587 = vrot.lane.b32.xlu0 %v3880_v28, %s8388_s29 }
 0xa41   : > { %4597 = vrot.lane.b32.xlu1 %v3885_v5, %s8388_s29 }
 0xa42   : > { %7552 = vmatmul.mubr.msk.f32.gmra.mxu0 %vm521_vm1, %v3450_v6 }
 0xa43   : > { %7605 = vmatmul.mubr.msk.f32.gmra.mxu1 %vm521_vm1, %v3909_v39 }
 0xa44   : > { %7607 = vmatprep.mubr.msk.f32.mxu1 %vm521_vm1, %v3910_v38  ;;  %4583 = vrot.lane.b32.xlu0 %v3878_v34, %s8388_s29 }
 0xa45   : > { %4386 = vrot.lane.b32.xlu1 %v4345_v16, %s8388_s29 }
 0xa47   : > { %7608 = vmatmul.mubr.msk.f32.gmra.mxu1 %vm521_vm1, %v3911_v53 }
 0xa48   : > { %4579 = vrot.lane.b32.xlu0 %v3876_v51, %s8388_s29 }
 0xa49   : > { %4384 = vrot.lane.b32.xlu1 %v4344_v49, %s8388_s29  ;;  %v8308_v49 = vld [vmem:[%s11352_s1 + $0x8] sm:$0xff] }
 0xa4c   : > { %4396 = vrot.lane.b32.xlu0 %v4350_v32, %s8388_s29 }
 0xa4d   : > { %4593 = vrot.lane.b32.xlu1 %v3883_v44, %s8388_s29 }
 0xa51   : > { %4382 = vrot.lane.b32.xlu1 %v4343_v40, %s8388_s29 }
 0xa55   : > { %4380 = vrot.lane.b32.xlu1 %v4342_v17, %s8388_s29 }
 0xa59   : > { %4589 = vrot.lane.b32.xlu1 %v3881_v63, %s8388_s29 }
 0xa5d   : > { %4378 = vrot.lane.b32.xlu1 %v4341_v25, %s8388_s29 }
 0xa61   : > { %4376 = vrot.lane.b32.xlu1 %v4340_v57, %s8388_s29 }
 0xa65   : > { %4585 = vrot.lane.b32.xlu1 %v3879_v11, %s8388_s29  ;;  %v8309_v11 = vld [vmem:[%s11352_s1] sm:$0xff] }
 0xa69   : > { %4374 = vrot.lane.b32.xlu1 %v4339_v59, %s8388_s29 }
 0xa6d   : > { %4372 = vrot.lane.b32.xlu1 %v4338_v56, %s8388_s29 }
 0xa71   : > { %4581 = vrot.lane.b32.xlu1 %v3877_v14, %s8388_s29 }
 0xa75   : > { %4370 = vrot.lane.b32.xlu1 %v4337_v50, %s8388_s29 }
 0xa79   : > { %4368 = vrot.lane.b32.xlu1 %v4336_v21, %s8388_s29 }
 0xa7d   : > { %4577 = vrot.lane.b32.xlu1 %v3875_v37, %s8388_s29 }
 0xa81   : > { %4605 = vrot.lane.b32.xlu1 %v3889_v0, %s8388_s29 }
 0xa99   : > { %v4608_v41 = vpop.permute.xlu1 %4607 }
 0xa9a   : > { %7666 = vmatprep.subr.mxu1 %v4608_v41 }
 0xa9b   : > { %7667 = vmatpush3.msra.mxu1 %v4608_v41 }
 0xa9e   : > { %v4399_v3 = vpop.permute.xlu0 %4398 }
 0xa9f   : > { %v4395_v26 = vpop.permute.xlu1 %4394  ;;  %7610 = vmatprep.subr.mxu0 %v4399_v3 }
 0xaa0   : > { %7611 = vmatpush3.msra.mxu0 %v4399_v3 }
 0xaa2   : > { %v10354_v36 = vpop.permute.xlu0 %4603 }
 0xaa3   : > { %v4393_v47 = vpop.permute.xlu1 %4392 }
 0xaa6   : > { %v10356_v45 = vpop.permute.xlu0 %4599 }
 0xaa7   : > { %v10358_v9 = vpop.permute.xlu1 %4601 }
 0xaaa   : > { %v10360_v18 = vpop.permute.xlu0 %4595 }
 0xaab   : > { %v4391_v27 = vpop.permute.xlu1 %4390 }
 0xaae   : > { %v10362_v62 = vpop.permute.xlu0 %4591 }
 0xaaf   : > { %v4389_v31 = vpop.permute.xlu1 %4388 }
 0xab2   : > { %v10364_v8 = vpop.permute.xlu0 %4587 }
 0xab3   : > { %v10366_v33 = vpop.permute.xlu1 %4597 }
 0xab6   : > { %v10368_v23 = vpop.permute.xlu0 %4583 }
 0xab7   : > { %v4387_v24 = vpop.permute.xlu1 %4386 }
 0xaba   : > { %v10370_v61 = vpop.permute.xlu0 %4579 }
 0xabb   : > { %v4385_v54 = vpop.permute.xlu1 %4384 }
 0xabe   : > { %v4397_v20 = vpop.permute.xlu0 %4396 }
 0xabf   : > { %v10372_v7 = vpop.permute.xlu1 %4593  ;;  %7612 = vmatprep.subr.mxu0 %v4397_v20 }
 0xac0   : > { %7613 = vmatpush3.msra.mxu0 %v4397_v20 }
 0xac1   : > { %7614 = vmatprep.subr.mxu0 %v4395_v26 }
 0xac2   : > { %7615 = vmatpush3.msra.mxu0 %v4395_v26 }
 0xac3   : > { %v4383_v52 = vpop.permute.xlu1 %4382  ;;  %7616 = vmatprep.subr.mxu0 %v4393_v47 }
 0xac4   : > { %7617 = vmatpush3.msra.mxu0 %v4393_v47  ;;  %v8310_v47 = vld [vmem:[%s11352_s1 + $0x18] sm:$0xff] }
 0xac5   : > { %7618 = vmatprep.subr.mxu0 %v4391_v27 }
 0xac6   : > { %7619 = vmatpush3.msra.mxu0 %v4391_v27 }
 0xac7   : > { %v4381_v48 = vpop.permute.xlu1 %4380  ;;  %7620 = vmatprep.subr.mxu0 %v4389_v31 }
 0xac8   : > { %7621 = vmatpush3.msra.mxu0 %v4389_v31 }
 0xac9   : > { %7622 = vmatprep.subr.mxu0 %v4387_v24 }
 0xaca   : > { %7623 = vmatpush3.msra.mxu0 %v4387_v24 }
 0xacb   : > { %v10374_v4 = vpop.permute.xlu1 %4589  ;;  %7624 = vmatprep.subr.mxu0 %v4385_v54 }
 0xacc   : > { %7625 = vmatpush3.msra.mxu0 %v4385_v54 }
 0xacd   : > { %7626 = vmatprep.subr.mxu0 %v4383_v52 }
 0xace   : > { %7627 = vmatpush3.msra.mxu0 %v4383_v52 }
 0xacf   : > { %v4379_v28 = vpop.permute.xlu1 %4378  ;;  %7628 = vmatprep.subr.mxu0 %v4381_v48 }
 0xad0   : > { %7629 = vmatpush3.msra.mxu0 %v4381_v48 }
 0xad1   : > { %7630 = vmatprep.subr.mxu0 %v4379_v28 }
 0xad2   : > { %7631 = vmatpush3.msra.mxu0 %v4379_v28 }
 0xad3   : > { %v4377_v5 = vpop.permute.xlu1 %4376 }
 0xad4   : > { %7632 = vmatprep.subr.mxu0 %v4377_v5 }
 0xad5   : > { %7633 = vmatpush3.msra.mxu0 %v4377_v5  ;;  %v8311_v5 = vld [vmem:[%s11352_s1 + $0x10] sm:$0xff] }
 0xad7   : > { %v10376_v6 = vpop.permute.xlu1 %4585 }
 0xadb   : > { %v4375_v22 = vpop.permute.xlu1 %4374 }
 0xadc   : > { %7634 = vmatprep.subr.mxu0 %v4375_v22 }
 0xadd   : > { %7635 = vmatpush3.msra.mxu0 %v4375_v22 }
 0xadf   : > { %v4373_v39 = vpop.permute.xlu1 %4372 }
 0xae0   : > { %7636 = vmatprep.subr.mxu0 %v4373_v39 }
 0xae1   : > { %7637 = vmatpush3.msra.mxu0 %v4373_v39 }
 0xae3   : > { %v10378_v38 = vpop.permute.xlu1 %4581 }
 0xae6   : > { %v7532_v34 = vpop.f32.mrf.mxu0 }
 0xae7   : > { %v3745_v16 = vmul.f32 0.25, %v7532_v34  ;;  %v4371_v53 = vpop.permute.xlu1 %4370 }
 0xae8   : > { %7638 = vmatprep.subr.mxu0 %v4371_v53  ;;  %v3665_v51 = vpop.f32.mrf.mxu0 }
 0xae9   : > { %v3761_v32 = vadd.f32 %v8308_v49, %v3745_v16  ;;  %v3744_v44 = vmul.f32 0.25, %v3665_v51  ;;  %7639 = vmatpush3.msra.mxu0 %v4371_v53 }
 0xaea   : > { %v7535_v40 = vpop.f32.mrf.mxu0 }
 0xaeb   : > { %v3778_v17 = vmul.f32 1.442695, %v3761_v32  ;;  %v7588_v63 = vpop.f32.mrf.mxu1  ;;  %v4369_v25 = vpop.permute.xlu1 %4368  ;;  %v3760_v59 = vadd.f32 %v8309_v11, %v3744_v44  ;;  %v3747_v56 = vmul.f32 0.25, %v7535_v40  ;;  %v8312_v40 = vld [vmem:[%s11352_s1 + $0x20] sm:$0xff] }
 0xaec   : > { %v4206_v57 = vmul.f32 0.25, %v7588_v63  ;;  %7640 = vmatprep.subr.mxu0 %v4369_v25  ;;  %v3675_v24 = vpop.f32.mrf.mxu0 }
 0xaed   : > { %8111 = vpow2.f32 %v3778_v17  ;;  %v4126_v14 = vpop.f32.mrf.mxu1  ;;  %7641 = vmatpush3.msra.mxu0 %v4369_v25  ;;  %v3776_v26 = vmul.f32 1.442695, %v3760_v59  ;;  %v3763_v27 = vadd.f32 %v8310_v47, %v3747_v56  ;;  %v3746_v39 = vmul.f32 0.25, %v3675_v24 }
 0xaee   : > { %v4222_v50 = vadd.f32 %v8308_v49, %v4206_v57  ;;  %v4205_v21 = vmul.f32 0.25, %v4126_v14  ;;  %v7538_v53 = vpop.f32.mrf.mxu0 }
 0xaef   : > { %v7591_v37 = vpop.f32.mrf.mxu1  ;;  %v10386_v0 = vpop.permute.xlu1 %4577  ;;  %v3782_v16 = vmul.f32 1.442695, %v3763_v27  ;;  %v3762_v63 = vadd.f32 %v8311_v5, %v3746_v39  ;;  %v3749_v25 = vmul.f32 0.25, %v7538_v53 }
 0xaf0   : > { %v4239_v41 = vmul.f32 1.442695, %v4222_v50  ;;  %v4221_v3 = vadd.f32 %v8309_v11, %v4205_v21  ;;  %v4208_v20 = vmul.f32 0.25, %v7591_v37  ;;  %v10413_v50 = vld [vmem:[%s11352_s1 + $0x30] sm:$0xff]  ;;  %v8314_v37 = vld [vmem:[%s11352_s1 + $0x28] sm:$0xff] }
 0xaf1   : > { %v4136_v31 = vpop.f32.mrf.mxu1  ;;  %v3780_v21 = vmul.f32 1.442695, %v3762_v63 }
 0xaf2   : > { %8113 = vpow2.f32 %v4239_v41  ;;  %v4237_v54 = vmul.f32 1.442695, %v4221_v3  ;;  %v4207_v52 = vmul.f32 0.25, %v4136_v31  ;;  %v4224_v51 = vadd.f32 %v8310_v47, %v4208_v20 }
 0xaf3   : > { %v7594_v48 = vpop.f32.mrf.mxu1  ;;  %v4606_v28 = vpop.permute.xlu1 %4605  ;;  %v3765_v41 = vadd.f32 %v8314_v37, %v3749_v25 }
 0xaf4   : > { %8115 = vpow2.f32 %v4237_v54  ;;  %v4223_v22 = vadd.f32 %v8311_v5, %v4207_v52  ;;  %7668 = vmatprep.subr.mxu1 %v4606_v28  ;;  %v4243_v59 = vmul.f32 1.442695, %v4224_v51  ;;  %v10430_v54 = vld [vmem:[%s11352_s1 + $0x40] sm:$0xff] }
 0xaf5   : > { %8117 = vpow2.f32 %v3776_v26  ;;  %v4146_v34 = vpop.f32.mrf.mxu1  ;;  %7669 = vmatpush3.msra.mxu1 %v4606_v28  ;;  %v4210_v26 = vmul.f32 0.25, %v7594_v48  ;;  %v3786_v28 = vmul.f32 1.442695, %v3765_v41 }
 0xaf6   : > { %v4241_v49 = vmul.f32 1.442695, %v4223_v22  ;;  %v4209_v32 = vmul.f32 0.25, %v4146_v34  ;;  %7670 = vmatprep.subr.mxu1 %v10354_v36 }
 0xaf7   : > { %v10395_v44 = vpop.f32.mrf.mxu1  ;;  %7671 = vmatpush3.msra.mxu1 %v10354_v36  ;;  %v4226_v22 = vadd.f32 %v8314_v37, %v4210_v26 }
 0xaf8   : > { %8119 = vpow2.f32 %v4241_v49  ;;  %v4225_v17 = vadd.f32 %v8312_v40, %v4209_v32  ;;  %7672 = vmatprep.subr.mxu1 %v10358_v9  ;;  %v4212_v41 = vmul.f32 0.25, %v10395_v44 }
 0xaf9   : > { %v4156_v57 = vpop.f32.mrf.mxu1  ;;  %7673 = vmatpush3.msra.mxu1 %v10358_v9  ;;  %8121 = vpow2.f32 %v3782_v16 }
 0xafa   : > { %v10403_v11 = vpop.eup %8111  ;;  %v4245_v56 = vmul.f32 1.442695, %v4225_v17  ;;  %v4211_v14 = vmul.f32 0.25, %v4156_v57  ;;  %7674 = vmatprep.subr.mxu1 %v10356_v45 }
 0xafb   : > { %v10406_v36 = vpop.f32.mrf.mxu1  ;;  %7675 = vmatpush3.msra.mxu1 %v10356_v45  ;;  %3810 = vadd.xlane.f32.xlu0 %v10403_v11  ;;  %v3685_v45 = vpop.f32.mrf.mxu0 }
 0xafc   : > { %8123 = vpow2.f32 %v4245_v56  ;;  %v4227_v9 = vadd.f32 %v10413_v50, %v4211_v14  ;;  %7676 = vmatprep.subr.mxu1 %v10366_v33  ;;  %v3748_v52 = vmul.f32 0.25, %v3685_v45 }
 0xafd   : > { %v4166_v3 = vpop.f32.mrf.mxu1  ;;  %7677 = vmatpush3.msra.mxu1 %v10366_v33  ;;  %8125 = vpow2.f32 %v4243_v59  ;;  %v7541_v5 = vpop.f32.mrf.mxu0 }
 0xafe   : > { %v4249_v47 = vmul.f32 1.442695, %v4227_v9  ;;  %v4213_v27 = vmul.f32 0.25, %v4166_v3  ;;  %7678 = vmatprep.subr.mxu1 %v10360_v18  ;;  %v3764_v49 = vadd.f32 %v8312_v40, %v3748_v52  ;;  %v3751_v32 = vmul.f32 0.25, %v7541_v5  ;;  %v10466_v40 = vld [vmem:[%s11352_s1 + $0x60] sm:$0xff]  ;;  %v8318_v9 = vld [vmem:[%s11352_s1 + $0x38] sm:$0xff] }
 0xaff   : > { %v10422_v31 = vpop.eup %8113  ;;  %v10424_v24 = vpop.f32.mrf.mxu1  ;;  %7679 = vmatpush3.msra.mxu1 %v10360_v18  ;;  %v4228_v52 = vadd.f32 %v8318_v9, %v4212_v41 }
 0xb00   : > { %8127 = vpow2.f32 %v4249_v47  ;;  %v4229_v33 = vadd.f32 %v10430_v54, %v4213_v27  ;;  %4271 = vadd.xlane.f32.xlu0 %v10422_v31  ;;  %7680 = vmatprep.subr.mxu1 %v10372_v7  ;;  %v3784_v14 = vmul.f32 1.442695, %v3764_v49  ;;  %v3695_v37 = vpop.f32.mrf.mxu0  ;;  %v10486_v47 = vld [vmem:[%s11352_s1 + $0x70] sm:$0xff]  ;;  %v8320_v49 = vld [vmem:[%s11352_s1 + $0x48] sm:$0xff] }
 0xb01   : > { %v10435_v20 = vpop.eup %8115  ;;  %8129 = vpow2.f32 %v3780_v21  ;;  %v4176_v48 = vpop.f32.mrf.mxu1  ;;  %7681 = vmatpush3.msra.mxu1 %v10372_v7  ;;  %v10448_v7 = vld [vmem:[%s11352_s1 + $0x50] sm:$0xff]  ;;  %v3750_v27 = vmul.f32 0.25, %v3695_v37 }
 0xb02   : > { %v10438_v18 = vpop.eup %8117  ;;  %v4253_v39 = vmul.f32 1.442695, %v4229_v33  ;;  %v4215_v34 = vmul.f32 0.25, %v4176_v48  ;;  %4269 = vadd.xlane.f32.xlu1 %v10435_v20  ;;  %7682 = vmatprep.subr.mxu1 %v10362_v62 }
 0xb03   : > { %v10442_v16 = vpop.f32.mrf.mxu1  ;;  %7683 = vmatpush3.msra.mxu1 %v10362_v62  ;;  %v4247_v62 = vmul.f32 1.442695, %v4226_v22 }
 0xb04   : > { %8131 = vpow2.f32 %v4253_v39  ;;  %v4231_v53 = vadd.f32 %v10448_v7, %v4215_v34  ;;  %3808 = vadd.xlane.f32.xlu0 %v10438_v18  ;;  %7684 = vmatprep.subr.mxu1 %v10374_v4  ;;  %v4251_v39 = vmul.f32 1.442695, %v4228_v52 }
 0xb05   : > { %v10453_v51 = vpop.eup %8119  ;;  %v4186_v17 = vpop.f32.mrf.mxu1  ;;  %7685 = vmatpush3.msra.mxu1 %v10374_v4  ;;  %8133 = vpow2.f32 %v3786_v28 }
 0xb06   : > { %v4257_v63 = vmul.f32 1.442695, %v4231_v53  ;;  %v4217_v25 = vmul.f32 0.25, %v4186_v17  ;;  %4273 = vadd.xlane.f32.xlu1 %v10453_v51  ;;  %7686 = vmatprep.subr.mxu1 %v10364_v8  ;;  %v10458_v57 = vpop.eup %8121  ;;  %v7544_v28 = vpop.f32.mrf.mxu0 }
 0xb07   : > { %v10460_v59 = vpop.f32.mrf.mxu1  ;;  %7687 = vmatpush3.msra.mxu1 %v10364_v8  ;;  %v3767_v8 = vadd.f32 %v8318_v9, %v3751_v32  ;;  %v3753_v22 = vmul.f32 0.25, %v7544_v28 }
 0xb08   : > { %8135 = vpow2.f32 %v4257_v63  ;;  %v4233_v4 = vadd.f32 %v10466_v40, %v4217_v25  ;;  %3814 = vadd.xlane.f32.xlu0 %v10458_v57  ;;  %7688 = vmatprep.subr.mxu1 %v10376_v6  ;;  %v3705_v17 = vpop.f32.mrf.mxu0 }
 0xb09   : > { %v10471_v56 = vpop.eup %8123  ;;  %v4196_v21 = vpop.f32.mrf.mxu1  ;;  %7689 = vmatpush3.msra.mxu1 %v10376_v6  ;;  %8137 = vpow2.f32 %v4247_v62  ;;  %v3769_v32 = vadd.f32 %v8320_v49, %v3753_v22  ;;  %v3752_v25 = vmul.f32 0.25, %v3705_v17  ;;  %v8322_v17 = vld [vmem:[%s11352_s1 + $0x68] sm:$0xff] }
 0xb0a   : > { %v4261_v3 = vmul.f32 1.442695, %v4233_v4  ;;  %v4219_v45 = vmul.f32 0.25, %v4196_v21  ;;  %4277 = vadd.xlane.f32.xlu1 %v10471_v56  ;;  %7690 = vmatprep.subr.mxu1 %v10368_v23  ;;  %v10480_v26 = vpop.eup %8125  ;;  %v7547_v9 = vpop.f32.mrf.mxu0 }
 0xb0b   : > { %7691 = vmatpush3.msra.mxu1 %v10368_v23  ;;  %v3790_v23 = vmul.f32 1.442695, %v3767_v8  ;;  %v3794_v63 = vmul.f32 1.442695, %v3769_v32  ;;  %v3768_v8 = vadd.f32 %v10430_v54, %v3752_v25  ;;  %v3755_v21 = vmul.f32 0.25, %v7547_v9 }
 0xb0c   : > { %8139 = vpow2.f32 %v4261_v3  ;;  %v4235_v6 = vadd.f32 %v10486_v47, %v4219_v45  ;;  %4275 = vadd.xlane.f32.xlu0 %v10480_v26  ;;  %7692 = vmatprep.subr.mxu1 %v10378_v38  ;;  %v8321_v45 = vld [vmem:[%s11352_s1 + $0x58] sm:$0xff]  ;;  %v3715_v54 = vpop.f32.mrf.mxu0  ;;  %v4218_v25 = vmul.f32 0.25, %v10442_v16 }
 0xb0d   : > { %v10491_v44 = vpop.eup %8127  ;;  %7693 = vmatpush3.msra.mxu1 %v10378_v38  ;;  %8141 = vpow2.f32 %v3784_v14  ;;  %v3766_v38 = vadd.f32 %v10413_v50, %v3750_v27  ;;  %v3792_v3 = vmul.f32 1.442695, %v3768_v8  ;;  %v4216_v27 = vmul.f32 0.25, %v10424_v24 }
 0xb0e   : > { %v10494_v33 = vpop.eup %8129  ;;  %v4265_v48 = vmul.f32 1.442695, %v4235_v6  ;;  %4281 = vadd.xlane.f32.xlu1 %v10491_v44  ;;  %7694 = vmatprep.subr.mxu1 %v10370_v61  ;;  %v3771_v6 = vadd.f32 %v8321_v45, %v3755_v21  ;;  %v7550_v22 = vpop.f32.mrf.mxu0  ;;  %v4234_v21 = vadd.f32 %v8322_v17, %v4218_v25 }
 0xb0f   : > { %7695 = vmatpush3.msra.mxu1 %v10370_v61  ;;  %v3788_v53 = vmul.f32 1.442695, %v3766_v38  ;;  %v4232_v28 = vadd.f32 %v8321_v45, %v4216_v27 }
 0xb10   : > { %8143 = vpow2.f32 %v4265_v48  ;;  %3812 = vadd.xlane.f32.xlu0 %v10494_v33  ;;  %7696 = vmatprep.subr.mxu1 %v10386_v0  ;;  %v3798_v52 = vmul.f32 1.442695, %v3771_v6  ;;  %v3754_v48 = vmul.f32 0.25, %v3715_v54  ;;  %v3725_v32 = vpop.f32.mrf.mxu0  ;;  %v4263_v6 = vmul.f32 1.442695, %v4234_v21 }
 0xb11   : > { %v10501_v5 = vpop.eup %8131  ;;  %7697 = vmatpush3.msra.mxu1 %v10386_v0  ;;  %8145 = vpow2.f32 %v3790_v23  ;;  %v4214_v0 = vmul.f32 0.25, %v10406_v36  ;;  %v3756_v8 = vmul.f32 0.25, %v3725_v32 }
 0xb12   : > { %4285 = vadd.xlane.f32.xlu1 %v10501_v5  ;;  %v10506_v34 = vpop.eup %8133  ;;  %8147 = vpow2.f32 %v4251_v39  ;;  %v3770_v39 = vadd.f32 %v10448_v7, %v3754_v48  ;;  %v7553_v9 = vpop.f32.mrf.mxu0 }
 0xb13   : > { %8149 = vpow2.f32 %v3788_v53  ;;  %v4230_v4 = vadd.f32 %v8320_v49, %v4214_v0  ;;  %v3757_v53 = vmul.f32 0.25, %v7550_v22  ;;  %v4259_v49 = vmul.f32 1.442695, %v4232_v28 }
 0xb14   : > { %3818 = vadd.xlane.f32.xlu0 %v10506_v34  ;;  %8151 = vpow2.f32 %v3794_v63  ;;  %v3796_v0 = vmul.f32 1.442695, %v3770_v39  ;;  %v3772_v45 = vadd.f32 %v10466_v40, %v3756_v8  ;;  %v8323_v40 = vld [vmem:[%s11352_s1 + $0x78] sm:$0xff] }
 0xb15   : > { %v10509_v61 = vpop.eup %8135  ;;  %v4255_v37 = vmul.f32 1.442695, %v4230_v4  ;;  %v3773_v63 = vadd.f32 %v8322_v17, %v3757_v53  ;;  %v4220_v53 = vmul.f32 0.25, %v10460_v59 }
 0xb16   : > { %4289 = vadd.xlane.f32.xlu1 %v10509_v61  ;;  %v10516_v50 = vpop.eup %8137  ;;  %v3800_v54 = vmul.f32 1.442695, %v3772_v45 }
 0xb17   : > { %8153 = vpow2.f32 %v4255_v37  ;;  %v3802_v7 = vmul.f32 1.442695, %v3773_v63 }
 0xb18   : > { %4279 = vadd.xlane.f32.xlu0 %v10516_v50  ;;  %8155 = vpow2.f32 %v3792_v3  ;;  %v3735_v3 = vpop.f32.mrf.mxu0 }
 0xb19   : > { %v10519_v62 = vpop.eup %8139  ;;  %8157 = vpow2.f32 %v3798_v52  ;;  %v3758_v27 = vmul.f32 0.25, %v3735_v3  ;;  %v3759_v52 = vmul.f32 0.25, %v7553_v9 }
 0xb1a   : > { %4293 = vadd.xlane.f32.xlu1 %v10519_v62  ;;  %v10522_v14 = vpop.eup %8141  ;;  %8159 = vpow2.f32 %v4259_v49 }
 0xb1b   : > { %8161 = vpow2.f32 %v3796_v0  ;;  %v3774_v48 = vadd.f32 %v10486_v47, %v3758_v27  ;;  %v3775_v22 = vadd.f32 %v8323_v40, %v3759_v52  ;;  %v4236_v47 = vadd.f32 %v8323_v40, %v4220_v53 }
 0xb1c   : > { %3816 = vadd.xlane.f32.xlu0 %v10522_v14  ;;  %8163 = vpow2.f32 %v3802_v7 }
 0xb1d   : > { %v10525_v36 = vpop.eup %8143  ;;  %8165 = vpow2.f32 %v4263_v6  ;;  %v3804_v39 = vmul.f32 1.442695, %v3774_v48  ;;  %v3806_v32 = vmul.f32 1.442695, %v3775_v22  ;;  %v4267_v17 = vmul.f32 1.442695, %v4236_v47 }
 0xb1e   : > { %4297 = vadd.xlane.f32.xlu1 %v10525_v36  ;;  %v10529_v41 = vpop.eup %8145  ;;  %8167 = vpow2.f32 %v3800_v54 }
 0xb1f   : > { %v10536_v23 = vpop.eup %8147  ;;  %8169 = vpow2.f32 %v3804_v39 }
 0xb20   : > { %3822 = vadd.xlane.f32.xlu0 %v10529_v41  ;;  %v10539_v38 = vpop.eup %8149  ;;  %8171 = vpow2.f32 %v3806_v32 }
 0xb21   : > { %v10543_v24 = vpop.eup %8151  ;;  %8173 = vpow2.f32 %v4267_v17 }
 0xb24   : > { %4283 = vadd.xlane.f32.xlu0 %v10536_v23  ;;  %v10550_v4 = vpop.eup %8153 }
 0xb25   : > { %v10553_v37 = vpop.eup %8155 }
 0xb26   : > { %v10557_v16 = vpop.eup %8157 }
 0xb27   : > { %v10561_v28 = vpop.eup %8159 }
 0xb28   : > { %3820 = vadd.xlane.f32.xlu0 %v10539_v38  ;;  %v10568_v49 = vpop.eup %8161 }
 0xb29   : > { %v10571_v0 = vpop.eup %8163 }
 0xb2a   : > { %v10574_v63 = vpop.eup %8165 }
 0xb2b   : > { %v10577_v25 = vpop.eup %8167 }
 0xb2c   : > { %3826 = vadd.xlane.f32.xlu0 %v10543_v24  ;;  %v10580_v59 = vpop.eup %8169 }
 0xb2d   : > { %v10583_v9 = vpop.eup %8171 }
 0xb2e   : > { %v10586_v7 = vpop.eup %8173 }
 0xb30   : > { %4287 = vadd.xlane.f32.xlu0 %v10550_v4 }
 0xb34   : > { %3824 = vadd.xlane.f32.xlu0 %v10553_v37 }
 0xb38   : > { %3830 = vadd.xlane.f32.xlu0 %v10557_v16 }
 0xb3c   : > { %4291 = vadd.xlane.f32.xlu0 %v10561_v28 }
 0xb40   : > { %3828 = vadd.xlane.f32.xlu0 %v10568_v49 }
 0xb44   : > { %3834 = vadd.xlane.f32.xlu0 %v10571_v0 }
 0xb48   : > { %4295 = vadd.xlane.f32.xlu0 %v10574_v63 }
 0xb4c   : > { %3832 = vadd.xlane.f32.xlu0 %v10577_v25 }
 0xb50   : > { %3836 = vadd.xlane.f32.xlu0 %v10580_v59 }
 0xb54   : > { %3838 = vadd.xlane.f32.xlu0 %v10583_v9 }
 0xb58   : > { %4299 = vadd.xlane.f32.xlu0 %v10586_v7 }
 0xb84   : > { %v3811_v8 = vpop.xlane.xlu0 %3810 }
 0xb89   : > { %v4272_v21 = vpop.xlane.xlu0 %4271 }
 0xb8a   : > { %8175 = vrcp.f32 %v4272_v21 }
 0xb8b   : > { %v4270_v3 = vpop.xlane.xlu1 %4269 }
 0xb8c   : > { %8177 = vrcp.f32 %v4270_v3 }
 0xb8d   : > { %8179 = vrcp.f32 %v3811_v8  ;;  %v3809_v45 = vpop.xlane.xlu0 %3808 }
 0xb8e   : > { %8181 = vrcp.f32 %v3809_v45 }
 0xb8f   : > { %v4274_v6 = vpop.xlane.xlu1 %4273 }
 0xb90   : > { %8183 = vrcp.f32 %v4274_v6 }
 0xb91   : > { %v3815_v27 = vpop.xlane.xlu0 %3814 }
 0xb93   : > { %v4278_v54 = vpop.xlane.xlu1 %4277 }
 0xb94   : > { %8185 = vrcp.f32 %v4278_v54 }
 0xb95   : > { %v4276_v52 = vpop.xlane.xlu0 %4275 }
 0xb96   : > { %8187 = vrcp.f32 %v4276_v52 }
 0xb97   : > { %v8176_v48 = vpop.eup %8175  ;;  %8189 = vrcp.f32 %v3815_v27  ;;  %v4282_v45 = vpop.xlane.xlu1 %4281 }
 0xb98   : > { %v4304_v47 = vmul.f32 %v8176_v48, %v10422_v31 }
 0xb99   : > { %v8178_v40 = vpop.eup %8177  ;;  %v3813_v22 = vpop.xlane.xlu0 %3812 }
 0xb9a   : > { %v8180_v39 = vpop.eup %8179  ;;  %8191 = vrcp.f32 %v3813_v22  ;;  %v4302_v53 = vmul.f32 %v8178_v40, %v10435_v20 }
 0xb9b   : > { %v8182_v32 = vpop.eup %8181  ;;  %v3843_v3 = vmul.f32 %v8180_v39, %v10403_v11  ;;  %8193 = vrcp.f32 %v4282_v45  ;;  %v4286_v39 = vpop.xlane.xlu1 %4285 }
 0xb9c   : > { %7642 = vmatprep.mubr.f32.mxu0 %v4302_v53  ;;  %v3841_v17 = vmul.f32 %v8182_v32, %v10438_v18 }
 0xb9d   : > { %v8184_v8 = vpop.eup %8183  ;;  %7643 = vmatmul.mubr.f32.vlgmr.msra.gmra.mxu0 %v4304_v47  ;;  %v3819_v21 = vpop.xlane.xlu0 %3818 }
 0xb9e   : > { %7698 = vmatprep.mubr.f32.mxu1 %v3841_v17  ;;  %v4306_v6 = vmul.f32 %v8184_v8, %v10453_v51 }
 0xb9f   : > { %7699 = vmatmul.mubr.f32.vlgmr.msra.gmra.mxu1 %v3843_v3  ;;  %v4290_v45 = vpop.xlane.xlu1 %4289 }
 0xba0   : > { %7645 = vmatprep.mubr.f32.mxu0 %v4306_v6 }
 0xba1   : > { %v4280_v27 = vpop.xlane.xlu0 %4279  ;;  %v8186_v20 = vpop.eup %8185 }
 0xba2   : > { %8195 = vrcp.f32 %v4280_v27  ;;  %v4310_v52 = vmul.f32 %v8186_v20, %v10471_v56 }
 0xba3   : > { %v8188_v54 = vpop.eup %8187  ;;  %8197 = vrcp.f32 %v3819_v21 }
 0xba4   : > { %v4308_v31 = vmul.f32 %v8188_v54, %v10480_v26  ;;  %v8190_v48 = vpop.eup %8189 }
 0xba5   : > { %v3817_v18 = vpop.xlane.xlu0 %3816  ;;  %v3847_v22 = vmul.f32 %v8190_v48, %v10458_v57  ;;  %v4294_v48 = vpop.xlane.xlu1 %4293 }
 0xba6   : > { %8199 = vrcp.f32 %v3817_v18  ;;  %7646 = vmatmul.mubr.f32.gmra.mxu0 %v4308_v31 }
 0xba7   : > { %v8192_v11 = vpop.eup %8191  ;;  %7648 = vmatprep.mubr.f32.mxu0 %v4310_v52  ;;  %8201 = vrcp.f32 %v4286_v39 }
 0xba8   : > { %v3845_v51 = vmul.f32 %v8192_v11, %v10494_v33  ;;  %v8194_v26 = vpop.eup %8193 }
 0xba9   : > { %v3823_v40 = vpop.xlane.xlu0 %3822  ;;  %v4314_v17 = vmul.f32 %v8194_v26, %v10491_v44 }
 0xbaa   : > { %7701 = vmatprep.mubr.f32.mxu1 %v3845_v51 }
 0xbab   : > { %7702 = vmatmul.mubr.f32.gmra.mxu1 %v3847_v22 }
 0xbad   : > { %v4284_v53 = vpop.xlane.xlu0 %4283 }
 0xbae   : > { %8203 = vrcp.f32 %v4284_v53 }
 0xbaf   : > { %v8196_v32 = vpop.eup %8195  ;;  %8205 = vrcp.f32 %v3823_v40 }
 0xbb0   : > { %v4312_v56 = vmul.f32 %v8196_v32, %v10516_v50  ;;  %v8198_v8 = vpop.eup %8197  ;;  %v4298_v32 = vpop.xlane.xlu1 %4297 }
 0xbb1   : > { %v3821_v47 = vpop.xlane.xlu0 %3820  ;;  %v3851_v3 = vmul.f32 %v8198_v8, %v10506_v34 }
 0xbb2   : > { %8207 = vrcp.f32 %v3821_v47  ;;  %7649 = vmatmul.mubr.f32.gmra.mxu0 %v4312_v56 }
 0xbb3   : > { %v8200_v33 = vpop.eup %8199  ;;  %7651 = vmatprep.mubr.f32.mxu0 %v4314_v17  ;;  %8209 = vrcp.f32 %v4290_v45 }
 0xbb4   : > { %v3849_v57 = vmul.f32 %v8200_v33, %v10522_v14  ;;  %v8202_v50 = vpop.eup %8201 }
 0xbb5   : > { %v3827_v21 = vpop.xlane.xlu0 %3826  ;;  %v4318_v54 = vmul.f32 %v8202_v50, %v10501_v5 }
 0xbb6   : > { %7704 = vmatprep.mubr.f32.mxu1 %v3849_v57 }
 0xbb7   : > { %7705 = vmatmul.mubr.f32.gmra.mxu1 %v3851_v3 }
 0xbb9   : > { %v4288_v6 = vpop.xlane.xlu0 %4287 }
 0xbba   : > { %8211 = vrcp.f32 %v4288_v6 }
 0xbbb   : > { %v8204_v27 = vpop.eup %8203  ;;  %8213 = vrcp.f32 %v3827_v21 }
 0xbbc   : > { %v4316_v44 = vmul.f32 %v8204_v27, %v10536_v23  ;;  %v8206_v31 = vpop.eup %8205 }
 0xbbd   : > { %v3825_v20 = vpop.xlane.xlu0 %3824  ;;  %v3855_v52 = vmul.f32 %v8206_v31, %v10529_v41 }
 0xbbe   : > { %8215 = vrcp.f32 %v3825_v20  ;;  %7652 = vmatmul.mubr.f32.gmra.mxu0 %v4316_v44  ;;  %v6554_v44 = vld [vmem:[%s11355_s4 + $0xe8] sm:$0xff] }
 0xbbf   : > { %v8208_v14 = vpop.eup %8207  ;;  %7654 = vmatprep.mubr.f32.mxu0 %v4318_v54  ;;  %8217 = vrcp.f32 %v4294_v48 }
 0xbc0   : > { %v3853_v34 = vmul.f32 %v8208_v14, %v10539_v38  ;;  %v8210_v23 = vpop.eup %8209 }
 0xbc1   : > { %v3831_v18 = vpop.xlane.xlu0 %3830  ;;  %v4322_v22 = vmul.f32 %v8210_v23, %v10509_v61 }
 0xbc2   : > { %7707 = vmatprep.mubr.f32.mxu1 %v3853_v34 }
 0xbc3   : > { %7708 = vmatmul.mubr.f32.gmra.mxu1 %v3855_v52 }
 0xbc5   : > { %v4292_v11 = vpop.xlane.xlu0 %4291 }
 0xbc6   : > { %8219 = vrcp.f32 %v4292_v11 }
 0xbc7   : > { %v8212_v51 = vpop.eup %8211  ;;  %8221 = vrcp.f32 %v3831_v18 }
 0xbc8   : > { %v4320_v5 = vmul.f32 %v8212_v51, %v10550_v4  ;;  %v8214_v39 = vpop.eup %8213 }
 0xbc9   : > { %v3829_v40 = vpop.xlane.xlu0 %3828  ;;  %v3859_v26 = vmul.f32 %v8214_v39, %v10543_v24 }
 0xbca   : > { %8223 = vrcp.f32 %v3829_v40  ;;  %7655 = vmatmul.mubr.f32.gmra.mxu0 %v4320_v5 }
 0xbcb   : > { %v8216_v38 = vpop.eup %8215  ;;  %7657 = vmatprep.mubr.f32.mxu0 %v4322_v22  ;;  %8225 = vrcp.f32 %v4298_v32 }
 0xbcc   : > { %v3857_v41 = vmul.f32 %v8216_v38, %v10553_v37  ;;  %v8218_v4 = vpop.eup %8217 }
 0xbcd   : > { %v3835_v53 = vpop.xlane.xlu0 %3834  ;;  %v4326_v8 = vmul.f32 %v8218_v4, %v10519_v62 }
 0xbce   : > { %7710 = vmatprep.mubr.f32.mxu1 %v3857_v41 }
 0xbcf   : > { %7711 = vmatmul.mubr.f32.gmra.mxu1 %v3859_v26 }
 0xbd1   : > { %v4296_v56 = vpop.xlane.xlu0 %4295 }
 0xbd2   : > { %8227 = vrcp.f32 %v4296_v56 }
 0xbd3   : > { %v8220_v47 = vpop.eup %8219  ;;  %8229 = vrcp.f32 %v3835_v53 }
 0xbd4   : > { %v4324_v61 = vmul.f32 %v8220_v47, %v10561_v28  ;;  %v8222_v33 = vpop.eup %8221  ;;  %v6556_v28 = vld [vmem:[%s11355_s4 + $0xf8] sm:$0xff] }
 0xbd5   : > { %v3833_v17 = vpop.xlane.xlu0 %3832  ;;  %v3863_v21 = vmul.f32 %v8222_v33, %v10557_v16  ;;  %7722 = vmatprep.subr.mxu0 %v6556_v28 }
 0xbd6   : > { %8231 = vrcp.f32 %v3833_v17  ;;  %7658 = vmatmul.mubr.f32.gmra.mxu0 %v4324_v61 }
 0xbd7   : > { %v8224_v37 = vpop.eup %8223  ;;  %7660 = vmatprep.mubr.f32.mxu0 %v4326_v8  ;;  %7723 = vmatpush3.msra.mxu0 %v6556_v28 }
 0xbd8   : > { %v3861_v24 = vmul.f32 %v8224_v37, %v10568_v49  ;;  %v8226_v45 = vpop.eup %8225  ;;  %v6555_v49 = vld [vmem:[%s11355_s4 + $0xf0] sm:$0xff] }
 0xbd9   : > { %v3837_v57 = vpop.xlane.xlu0 %3836  ;;  %v4330_v50 = vmul.f32 %v8226_v45, %v10525_v36  ;;  %7724 = vmatprep.subr.mxu0 %v6555_v49 }
 0xbda   : > { %8233 = vrcp.f32 %v3837_v57  ;;  %7713 = vmatprep.mubr.f32.mxu1 %v3861_v24  ;;  %7725 = vmatpush3.msra.mxu0 %v6555_v49 }
 0xbdb   : > { %7714 = vmatmul.mubr.f32.gmra.mxu1 %v3863_v21  ;;  %7726 = vmatprep.subr.mxu0 %v6554_v44 }
 0xbdc   : > { %7727 = vmatpush3.msra.mxu0 %v6554_v44 }
 0xbdd   : > { %v3839_v3 = vpop.xlane.xlu0 %3838 }
 0xbde   : > { %8235 = vrcp.f32 %v3839_v3 }
 0xbdf   : > { %v8228_v62 = vpop.eup %8227 }
 0xbe0   : > { %v4328_v6 = vmul.f32 %v8228_v62, %v10574_v63  ;;  %v8230_v27 = vpop.eup %8229  ;;  %v6553_v63 = vld [vmem:[%s11355_s4 + $0xe0] sm:$0xff] }
 0xbe1   : > { %v4300_v16 = vpop.xlane.xlu0 %4299  ;;  %v3867_v36 = vmul.f32 %v8230_v27, %v10571_v0  ;;  %7728 = vmatprep.subr.mxu0 %v6553_v63 }
 0xbe2   : > { %8237 = vrcp.f32 %v4300_v16  ;;  %7661 = vmatmul.mubr.f32.gmra.mxu0 %v4328_v6 }
 0xbe3   : > { %v8232_v20 = vpop.eup %8231  ;;  %7663 = vmatprep.mubr.f32.mxu0 %v4330_v50  ;;  %7729 = vmatpush3.msra.mxu0 %v6553_v63 }
 0xbe4   : > { %v3865_v54 = vmul.f32 %v8232_v20, %v10577_v25 }
 0xbe6   : > { %7716 = vmatprep.mubr.f32.mxu1 %v3865_v54 }
 0xbe7   : > { %v8234_v31 = vpop.eup %8233  ;;  %7717 = vmatmul.mubr.f32.gmra.mxu1 %v3867_v36 }
 0xbe8   : > { %v3869_v14 = vmul.f32 %v8234_v31, %v10580_v59 }
 0xbea   : > { %7719 = vmatprep.mubr.f32.mxu1 %v3869_v14 }
 0xbeb   : > { %v8236_v34 = vpop.eup %8235 }
 0xbec   : > { %v3871_v18 = vmul.f32 %v8236_v34, %v10583_v9 }
 0xbee   : > { %7720 = vmatmul.mubr.f32.gmra.mxu1 %v3871_v18 }
 0xbef   : > { %v8238_v52 = vpop.eup %8237 }
 0xbf0   : > { %v4332_v48 = vmul.f32 %v8238_v52, %v10586_v7 }
 0xbf2   : > { %7664 = vmatmul.mubr.f32.gmra.mxu0 %v4332_v48 }
 0xc5d   : > { %v7644_v25 = vpop.f32.mrf.mxu0 }
 0xc5f   : > { %v7700_v11 = vpop.f32.mrf.mxu1  ;;  %v4482_v0 = vpop.f32.mrf.mxu0 }
 0xc60   : > { %v4697_v5 = vadd.f32 %v7700_v11, %v7644_v25  ;;  %v10652_v25 = vld [vmem:[%s11357_s6 + $0x9] ss:$0 sm:$0xff] }
 0xc61   : > { %v4691_v23 = vpop.f32.mrf.mxu1 }
 0xc62   : > { %v4692_v51 = vadd.f32 %v4691_v23, %v4482_v0 }
 0xc64   : > { %7730 = vmatprep.mubr.msk.f32.mxu0 %vm521_vm1, %v4692_v51 }
 0xc65   : > { %7731 = vmatmul.mubr.msk.f32.vlgmr.msra.gmra.mxu0 %vm521_vm1, %v4697_v5 }
 0xc66   : > { %v7647_v59 = vpop.f32.mrf.mxu0 }
 0xc68   : > { %v4492_v22 = vpop.f32.mrf.mxu0 }
 0xc6b   : > { %v7703_v40 = vpop.f32.mrf.mxu1 }
 0xc6c   : > { %v4707_v38 = vadd.f32 %v7703_v40, %v7647_v59 }
 0xc6d   : > { %v4701_v39 = vpop.f32.mrf.mxu1 }
 0xc6e   : > { %v4702_v9 = vadd.f32 %v4701_v39, %v4492_v22 }
 0xc70   : > { %7733 = vmatprep.mubr.msk.f32.mxu0 %vm521_vm1, %v4702_v9 }
 0xc71   : > { %7734 = vmatmul.mubr.msk.f32.gmra.mxu0 %vm521_vm1, %v4707_v38 }
 0xc72   : > { %v7650_v7 = vpop.f32.mrf.mxu0 }
 0xc74   : > { %v4502_v53 = vpop.f32.mrf.mxu0 }
 0xc77   : > { %v7706_v41 = vpop.f32.mrf.mxu1 }
 0xc78   : > { %v4717_v56 = vadd.f32 %v7706_v41, %v7650_v7 }
 0xc79   : > { %v4711_v26 = vpop.f32.mrf.mxu1 }
 0xc7a   : > { %v4712_v32 = vadd.f32 %v4711_v26, %v4502_v53 }
 0xc7c   : > { %7736 = vmatprep.mubr.msk.f32.mxu0 %vm521_vm1, %v4712_v32 }
 0xc7d   : > { %7737 = vmatmul.mubr.msk.f32.gmra.mxu0 %vm521_vm1, %v4717_v56 }
 0xc7e   : > { %v7653_v4 = vpop.f32.mrf.mxu0 }
 0xc80   : > { %v4512_v61 = vpop.f32.mrf.mxu0 }
 0xc83   : > { %v7709_v47 = vpop.f32.mrf.mxu1 }
 0xc84   : > { %v4727_v33 = vadd.f32 %v7709_v47, %v7653_v4 }
 0xc85   : > { %v4721_v17 = vpop.f32.mrf.mxu1 }
 0xc86   : > { %v4722_v8 = vadd.f32 %v4721_v17, %v4512_v61 }
 0xc88   : > { %7739 = vmatprep.mubr.msk.f32.mxu0 %vm521_vm1, %v4722_v8 }
 0xc89   : > { %7740 = vmatmul.mubr.msk.f32.gmra.mxu0 %vm521_vm1, %v4727_v33 }
 0xc8a   : > { %v7656_v37 = vpop.f32.mrf.mxu0 }
 0xc8c   : > { %v4522_v57 = vpop.f32.mrf.mxu0 }
 0xc8f   : > { %v7712_v24 = vpop.f32.mrf.mxu1 }
 0xc90   : > { %v4737_v28 = vadd.f32 %v7712_v24, %v7656_v37 }
 0xc91   : > { %v4731_v21 = vpop.f32.mrf.mxu1 }
 0xc92   : > { %v4732_v3 = vadd.f32 %v4731_v21, %v4522_v57 }
 0xc94   : > { %7742 = vmatprep.mubr.msk.f32.mxu0 %vm521_vm1, %v4732_v3 }
 0xc95   : > { %7743 = vmatmul.mubr.msk.f32.gmra.mxu0 %vm521_vm1, %v4737_v28 }
 0xc96   : > { %v7659_v45 = vpop.f32.mrf.mxu0 }
 0xc98   : > { %v4532_v6 = vpop.f32.mrf.mxu0 }
 0xc9b   : > { %v7715_v62 = vpop.f32.mrf.mxu1 }
 0xc9c   : > { %v4747_v50 = vadd.f32 %v7715_v62, %v7659_v45 }
 0xc9d   : > { %v4741_v49 = vpop.f32.mrf.mxu1 }
 0xc9e   : > { %v4742_v16 = vadd.f32 %v4741_v49, %v4532_v6 }
 0xca0   : > { %7745 = vmatprep.mubr.msk.f32.mxu0 %vm521_vm1, %v4742_v16 }
 0xca1   : > { %7746 = vmatmul.mubr.msk.f32.gmra.mxu0 %vm521_vm1, %v4747_v50 }
 0xca2   : > { %v7662_v27 = vpop.f32.mrf.mxu0 }
 0xca4   : > { %v4542_v20 = vpop.f32.mrf.mxu0 }
 0xca7   : > { %v7718_v44 = vpop.f32.mrf.mxu1 }
 0xca8   : > { %v4757_v36 = vadd.f32 %v7718_v44, %v7662_v27 }
 0xca9   : > { %v4751_v63 = vpop.f32.mrf.mxu1 }
 0xcaa   : > { %v4752_v54 = vadd.f32 %v4751_v63, %v4542_v20 }
 0xcac   : > { %7748 = vmatprep.mubr.msk.f32.mxu0 %vm521_vm1, %v4752_v54 }
 0xcad   : > { %7749 = vmatmul.mubr.msk.f32.gmra.mxu0 %vm521_vm1, %v4757_v36 }
 0xcae   : > { %v7721_v31 = vpop.f32.mrf.mxu1 }
 0xcb0   : > { %v4761_v34 = vpop.f32.mrf.mxu1 }
 0xcb2   : > { %v7665_v14 = vpop.f32.mrf.mxu0 }
 0xcb3   : > { %v4767_v48 = vadd.f32 %v7721_v31, %v7665_v14  ;;  %v6580_v14 = vld [vmem:[%s11355_s4 + $0xa8] sm:$0xff] }
 0xcb4   : > { %v4552_v18 = vpop.f32.mrf.mxu0 }
 0xcb5   : > { %v4762_v52 = vadd.f32 %v4761_v34, %v4552_v18 }
 0xcb7   : > { %7751 = vmatprep.mubr.msk.f32.mxu0 %vm521_vm1, %v4762_v52  ;;  %v6579_v52 = vld [vmem:[%s11355_s4 + $0xa0] sm:$0xff] }
 0xcb8   : > { %7752 = vmatmul.mubr.msk.f32.gmra.mxu0 %vm521_vm1, %v4767_v48 }
 0xd25   : > { %v7732_v11 = vpop.f32.mrf.mxu0 }
 0xd26   : > { %v4899_v0 = vadd.f32 %v7732_v11, %v10652_v25 }
 0xd27   : > { %v4893_v23 = vpop.f32.mrf.mxu0 }
 0xd28   : > { %v10656_v51 = vadd.f32 %v4899_v0, %v9824_v29  ;;  %v4894_v5 = vadd.f32 %v10652_v25, %v4893_v23 }
 0xd2a   : > { %v10660_v59 = vadd.f32 %v4894_v5, %v9821_v12  ;;  %v4993_v40 = vsel %vm521_vm1, %v10656_v51, 0.0  ;;  %v5055_v22 = vmul.f32 %v10656_v51, %v10656_v51 }
 0xd2b   : > { %4994 = vadd.xlane.f32.xlu0 %v4993_v40 }
 0xd2c   : > { %v4990_v39 = vsel %vm521_vm1, %v10660_v59, 0.0  ;;  %v5054_v9 = vmul.f32 %v10660_v59, %v10660_v59  ;;  %v5073_v29 = vsel %vm521_vm1, %v5055_v22, 0.0 }
 0xd2d   : > { %4991 = vadd.xlane.f32.xlu1 %v4990_v39 }
 0xd2e   : > { %v5070_v12 = vsel %vm521_vm1, %v5054_v9, 0.0 }
 0xd2f   : > { %5074 = vadd.xlane.f32.xlu0 %v5073_v29 }
 0xd31   : > { %v7735_v38 = vpop.f32.mrf.mxu0  ;;  %5071 = vadd.xlane.f32.xlu1 %v5070_v12 }
 0xd32   : > { %v4909_v7 = vadd.f32 %v7735_v38, %v10652_v25 }
 0xd33   : > { %v4903_v41 = vpop.f32.mrf.mxu0 }
 0xd34   : > { %v10674_v53 = vadd.f32 %v4909_v7, %v9838_v58  ;;  %v4904_v26 = vadd.f32 %v10652_v25, %v4903_v41 }
 0xd36   : > { %v10678_v32 = vadd.f32 %v4904_v26, %v9835_v43  ;;  %v4999_v56 = vsel %vm521_vm1, %v10674_v53, 0.0  ;;  %v5057_v4 = vmul.f32 %v10674_v53, %v10674_v53 }
 0xd37   : > { %5000 = vadd.xlane.f32.xlu0 %v4999_v56 }
 0xd38   : > { %v4996_v47 = vsel %vm521_vm1, %v10678_v32, 0.0  ;;  %v5056_v61 = vmul.f32 %v10678_v32, %v10678_v32  ;;  %v5079_v58 = vsel %vm521_vm1, %v5057_v4, 0.0 }
 0xd39   : > { %4997 = vadd.xlane.f32.xlu1 %v4996_v47 }
 0xd3a   : > { %v5076_v43 = vsel %vm521_vm1, %v5056_v61, 0.0 }
 0xd3b   : > { %5080 = vadd.xlane.f32.xlu0 %v5079_v58 }
 0xd3d   : > { %v7738_v17 = vpop.f32.mrf.mxu0  ;;  %5077 = vadd.xlane.f32.xlu1 %v5076_v43 }
 0xd3e   : > { %v4919_v8 = vadd.f32 %v7738_v17, %v10652_v25 }
 0xd3f   : > { %v4913_v33 = vpop.f32.mrf.mxu0 }
 0xd40   : > { %v10692_v37 = vadd.f32 %v4919_v8, %v9852_v35  ;;  %v4914_v24 = vadd.f32 %v10652_v25, %v4913_v33 }
 0xd42   : > { %v10696_v57 = vadd.f32 %v4914_v24, %v9849_v15  ;;  %v5005_v21 = vsel %vm521_vm1, %v10692_v37, 0.0  ;;  %v5059_v3 = vmul.f32 %v10692_v37, %v10692_v37 }
 0xd43   : > { %5006 = vadd.xlane.f32.xlu0 %v5005_v21 }
 0xd44   : > { %v5002_v28 = vsel %vm521_vm1, %v10696_v57, 0.0  ;;  %v5058_v45 = vmul.f32 %v10696_v57, %v10696_v57  ;;  %v5085_v35 = vsel %vm521_vm1, %v5059_v3, 0.0 }
 0xd45   : > { %5003 = vadd.xlane.f32.xlu1 %v5002_v28 }
 0xd46   : > { %v5082_v15 = vsel %vm521_vm1, %v5058_v45, 0.0 }
 0xd47   : > { %5086 = vadd.xlane.f32.xlu0 %v5085_v35 }
 0xd49   : > { %v7741_v62 = vpop.f32.mrf.mxu0  ;;  %5083 = vadd.xlane.f32.xlu1 %v5082_v15 }
 0xd4a   : > { %v4929_v6 = vadd.f32 %v7741_v62, %v10652_v25 }
 0xd4b   : > { %v4923_v49 = vpop.f32.mrf.mxu0 }
 0xd4c   : > { %v10710_v16 = vadd.f32 %v4929_v6, %v9866_v60  ;;  %v4924_v50 = vadd.f32 %v10652_v25, %v4923_v49  ;;  %v6582_v60 = vld [vmem:[%s11355_s4 + $0xb8] sm:$0xff] }
 0xd4d   : > { %7754 = vmatprep.subr.mxu1 %v6582_v60 }
 0xd4e   : > { %v10714_v27 = vadd.f32 %v4924_v50, %v9863_v13  ;;  %v5011_v44 = vsel %vm521_vm1, %v10710_v16, 0.0  ;;  %v5061_v20 = vmul.f32 %v10710_v16, %v10710_v16  ;;  %v6581_v13 = vld [vmem:[%s11355_s4 + $0xb0] sm:$0xff]  ;;  %7755 = vmatpush3.msra.mxu1 %v6582_v60 }
 0xd4f   : > { %5012 = vadd.xlane.f32.xlu0 %v5011_v44  ;;  %7756 = vmatprep.subr.mxu1 %v6581_v13 }
 0xd50   : > { %v5008_v63 = vsel %vm521_vm1, %v10714_v27, 0.0  ;;  %v5060_v54 = vmul.f32 %v10714_v27, %v10714_v27  ;;  %v5091_v36 = vsel %vm521_vm1, %v5061_v20, 0.0  ;;  %7757 = vmatpush3.msra.mxu1 %v6581_v13 }
 0xd51   : > { %5009 = vadd.xlane.f32.xlu1 %v5008_v63  ;;  %7758 = vmatprep.subr.mxu1 %v6580_v14 }
 0xd52   : > { %v5088_v31 = vsel %vm521_vm1, %v5060_v54, 0.0  ;;  %7759 = vmatpush3.msra.mxu1 %v6580_v14  ;;  %v6603_v54 = vld [vmem:[%s11355_s4 + $0xd0] sm:$0xff] }
 0xd53   : > { %5092 = vadd.xlane.f32.xlu0 %v5091_v36  ;;  %7760 = vmatprep.subr.mxu1 %v6579_v52 }
 0xd54   : > { %7761 = vmatpush3.msra.mxu1 %v6579_v52 }
 0xd55   : > { %v7744_v34 = vpop.f32.mrf.mxu0  ;;  %5089 = vadd.xlane.f32.xlu1 %v5088_v31 }
 0xd56   : > { %v4939_v18 = vadd.f32 %v7744_v34, %v10652_v25 }
 0xd57   : > { %v4933_v48 = vpop.f32.mrf.mxu0 }
 0xd58   : > { %v10740_v11 = vadd.f32 %v4939_v18, %v9880_v46  ;;  %v4934_v0 = vadd.f32 %v10652_v25, %v4933_v48 }
 0xd5a   : > { %v10744_v23 = vadd.f32 %v4934_v0, %v9877_v55  ;;  %v5017_v5 = vsel %vm521_vm1, %v10740_v11, 0.0  ;;  %v5063_v40 = vmul.f32 %v10740_v11, %v10740_v11 }
 0xd5b   : > { %5018 = vadd.xlane.f32.xlu0 %v5017_v5 }
 0xd5c   : > { %v5014_v22 = vsel %vm521_vm1, %v10744_v23, 0.0  ;;  %v5062_v46 = vmul.f32 %v10744_v23, %v10744_v23  ;;  %v5097_v39 = vsel %vm521_vm1, %v5063_v40, 0.0 }
 0xd5d   : > { %5015 = vadd.xlane.f32.xlu1 %v5014_v22 }
 0xd5e   : > { %v5094_v55 = vsel %vm521_vm1, %v5062_v46, 0.0 }
 0xd5f   : > { %5098 = vadd.xlane.f32.xlu0 %v5097_v39 }
 0xd61   : > { %v7747_v9 = vpop.f32.mrf.mxu0  ;;  %5095 = vadd.xlane.f32.xlu1 %v5094_v55 }
 0xd62   : > { %v4949_v29 = vadd.f32 %v7747_v9, %v10652_v25 }
 0xd63   : > { %v4943_v12 = vpop.f32.mrf.mxu0 }
 0xd64   : > { %v10758_v38 = vadd.f32 %v4949_v29, %v9894_v19  ;;  %v4944_v7 = vadd.f32 %v10652_v25, %v4943_v12 }
 0xd66   : > { %v10762_v41 = vadd.f32 %v4944_v7, %v9891_v42  ;;  %v5023_v26 = vsel %vm521_vm1, %v10758_v38, 0.0  ;;  %v5065_v56 = vmul.f32 %v10758_v38, %v10758_v38 }
 0xd67   : > { %5024 = vadd.xlane.f32.xlu0 %v5023_v26 }
 0xd68   : > { %v5020_v4 = vsel %vm521_vm1, %v10762_v41, 0.0  ;;  %v5064_v47 = vmul.f32 %v10762_v41, %v10762_v41  ;;  %v5103_v19 = vsel %vm521_vm1, %v5065_v56, 0.0 }
 0xd69   : > { %5021 = vadd.xlane.f32.xlu1 %v5020_v4 }
 0xd6a   : > { %v5100_v42 = vsel %vm521_vm1, %v5064_v47, 0.0 }
 0xd6b   : > { %5104 = vadd.xlane.f32.xlu0 %v5103_v19 }
 0xd6d   : > { %v7750_v61 = vpop.f32.mrf.mxu0  ;;  %5101 = vadd.xlane.f32.xlu1 %v5100_v42 }
 0xd6e   : > { %v4959_v58 = vadd.f32 %v7750_v61, %v10652_v25 }
 0xd6f   : > { %v4953_v43 = vpop.f32.mrf.mxu0 }
 0xd70   : > { %v10776_v17 = vadd.f32 %v4959_v58, %v9908_v30  ;;  %v4954_v8 = vadd.f32 %v10652_v25, %v4953_v43 }
 0xd72   : > { %v10780_v33 = vadd.f32 %v4954_v8, %v9905_v2  ;;  %v5029_v24 = vsel %vm521_vm1, %v10776_v17, 0.0  ;;  %v5067_v21 = vmul.f32 %v10776_v17, %v10776_v17 }
 0xd73   : > { %5030 = vadd.xlane.f32.xlu0 %v5029_v24 }
 0xd74   : > { %v5026_v3 = vsel %vm521_vm1, %v10780_v33, 0.0  ;;  %v5066_v28 = vmul.f32 %v10780_v33, %v10780_v33  ;;  %v5109_v30 = vsel %vm521_vm1, %v5067_v21, 0.0 }
 0xd75   : > { %5027 = vadd.xlane.f32.xlu1 %v5026_v3 }
 0xd76   : > { %v5106_v2 = vsel %vm521_vm1, %v5066_v28, 0.0 }
 0xd77   : > { %5110 = vadd.xlane.f32.xlu0 %v5109_v30 }
 0xd78   : > { %v7753_v45 = vpop.f32.mrf.mxu0 }
 0xd79   : > { %v4969_v35 = vadd.f32 %v7753_v45, %v10652_v25  ;;  %5107 = vadd.xlane.f32.xlu1 %v5106_v2  ;;  %v10821_v45 = vld [vmem:[%s11357_s6 + $0xa] ss:$0 sm:$0xff] }
 0xd7a   : > { %v4963_v15 = vpop.f32.mrf.mxu0 }
 0xd7b   : > { %v10794_v62 = vadd.f32 %v4969_v35, %v9922_v10  ;;  %v4964_v6 = vadd.f32 %v10652_v25, %v4963_v15  ;;  %v6604_v25 = vld [vmem:[%s11355_s4 + $0xd8] sm:$0xff] }
 0xd7c   : > { %7786 = vmatprep.subr.mxu0 %v6604_v25 }
 0xd7d   : > { %v10798_v49 = vadd.f32 %v4964_v6, %v9919_v1  ;;  %v5035_v50 = vsel %vm521_vm1, %v10794_v62, 0.0  ;;  %v5069_v44 = vmul.f32 %v10794_v62, %v10794_v62  ;;  %7787 = vmatpush3.xpose.msra.mxu0 %v6604_v25 }
 0xd7e   : > { %5036 = vadd.xlane.f32.xlu0 %v5035_v50  ;;  %7788 = vmatprep.subr.mxu0 %v6603_v54 }
 0xd7f   : > { %v5032_v20 = vsel %vm521_vm1, %v10798_v49, 0.0  ;;  %v5068_v63 = vmul.f32 %v10798_v49, %v10798_v49  ;;  %v5115_v10 = vsel %vm521_vm1, %v5069_v44, 0.0 }
 0xd80   : > { %5033 = vadd.xlane.f32.xlu1 %v5032_v20  ;;  %v10827_v20 = vld [vmem:[%s11357_s6 + $0xb] ss:$0 sm:$0xff] }
 0xd81   : > { %v5112_v1 = vsel %vm521_vm1, %v5068_v63, 0.0  ;;  %7789 = vmatpush3.xpose.msra.mxu0 %v6603_v54 }
 0xd82   : > { %5116 = vadd.xlane.f32.xlu0 %v5115_v10 }
 0xd84   : > { %5113 = vadd.xlane.f32.xlu1 %v5112_v1 }
 0xdb4   : > { %v4995_v60 = vpop.xlane.xlu0 %4994 }
 0xdb5   : > { %v5039_v13 = vmul.f32 0.03125, %v4995_v60 }
 0xdb6   : > { %v4992_v36 = vpop.xlane.xlu1 %4991 }
 0xdb7   : > { %v5038_v31 = vmul.f32 0.03125, %v4992_v36  ;;  %v5135_v34 = vmul.f32 %v5039_v13, %v5039_v13  ;;  %v5167_v58 = vsub.f32 %v10656_v51, %v5039_v13 }
 0xdb8   : > { %v5075_v14 = vpop.xlane.xlu0 %5074 }
 0xdb9   : > { %v5119_v18 = vmul.f32 0.03125, %v5075_v14  ;;  %v5134_v48 = vmul.f32 %v5038_v31, %v5038_v31  ;;  %v5166_v30 = vsub.f32 %v10660_v59, %v5038_v31 }
 0xdba   : > { %v5072_v52 = vpop.xlane.xlu1 %5071 }
 0xdbb   : > { %v5151_v0 = vsub.f32 %v5119_v18, %v5135_v34  ;;  %v5118_v5 = vmul.f32 0.03125, %v5072_v52 }
 0xdbd   : > { %v5183_v40 = vadd.f32 1e-05, %v5151_v0  ;;  %v5150_v22 = vsub.f32 %v5118_v5, %v5134_v48 }
 0xdbf   : > { %8239 = vrsqrt.f32 %v5183_v40  ;;  %v5182_v46 = vadd.f32 1e-05, %v5150_v22 }
 0xdc0   : > { %v5001_v39 = vpop.xlane.xlu0 %5000 }
 0xdc1   : > { %8241 = vrsqrt.f32 %v5182_v46  ;;  %v5041_v55 = vmul.f32 0.03125, %v5001_v39 }
 0xdc2   : > { %v4998_v9 = vpop.xlane.xlu1 %4997 }
 0xdc3   : > { %v5040_v29 = vmul.f32 0.03125, %v4998_v9  ;;  %v5137_v7 = vmul.f32 %v5041_v55, %v5041_v55  ;;  %v5169_v31 = vsub.f32 %v10674_v53, %v5041_v55 }
 0xdc4   : > { %v5081_v12 = vpop.xlane.xlu0 %5080 }
 0xdc5   : > { %v5121_v26 = vmul.f32 0.03125, %v5081_v12  ;;  %v5136_v4 = vmul.f32 %v5040_v29, %v5040_v29  ;;  %v5168_v52 = vsub.f32 %v10678_v32, %v5040_v29 }
 0xdc6   : > { %v5078_v56 = vpop.xlane.xlu1 %5077 }
 0xdc7   : > { %v5153_v47 = vsub.f32 %v5121_v26, %v5137_v7  ;;  %v5120_v19 = vmul.f32 0.03125, %v5078_v56 }
 0xdc9   : > { %v5185_v42 = vadd.f32 1e-05, %v5153_v47  ;;  %v5152_v61 = vsub.f32 %v5120_v19, %v5136_v4 }
 0xdcb   : > { %8243 = vrsqrt.f32 %v5185_v42  ;;  %v5184_v43 = vadd.f32 1e-05, %v5152_v61 }
 0xdcc   : > { %v8240_v8 = vpop.eup %8239  ;;  %v5007_v24 = vpop.xlane.xlu0 %5006 }
 0xdcd   : > { %v5215_v21 = vmul.f32 %v8240_v8, %v5167_v58  ;;  %8245 = vrsqrt.f32 %v5184_v43  ;;  %v5043_v3 = vmul.f32 0.03125, %v5007_v24 }
 0xdce   : > { %v8242_v28 = vpop.eup %8241  ;;  %v5004_v2 = vpop.xlane.xlu1 %5003 }
 0xdcf   : > { %v5042_v35 = vmul.f32 0.03125, %v5004_v2  ;;  %v5214_v6 = vmul.f32 %v8242_v28, %v5166_v30  ;;  %v5235_v51 = vmul.f32 %v10821_v45, %v5215_v21  ;;  %v5139_v50 = vmul.f32 %v5043_v3, %v5043_v3 }
 0xdd0   : > { %v5087_v15 = vpop.xlane.xlu0 %5086  ;;  %v5171_v42 = vsub.f32 %v10692_v37, %v5043_v3 }
 0xdd1   : > { %v5123_v44 = vmul.f32 0.03125, %v5087_v15  ;;  %v5234_v59 = vmul.f32 %v10821_v45, %v5214_v6  ;;  %v5138_v10 = vmul.f32 %v5042_v35, %v5042_v35  ;;  %v10834_v60 = vadd.f32 %v10827_v20, %v5235_v51 }
 0xdd2   : > { %v5084_v63 = vpop.xlane.xlu1 %5083  ;;  %v5170_v8 = vsub.f32 %v10696_v57, %v5042_v35 }
 0xdd3   : > { %v5155_v1 = vsub.f32 %v5123_v44, %v5139_v50  ;;  %v5122_v25 = vmul.f32 0.03125, %v5084_v63  ;;  %v10831_v54 = vadd.f32 %v10827_v20, %v5234_v59 }
 0xdd5   : > { %v5187_v13 = vadd.f32 1e-05, %v5155_v1  ;;  %v5154_v36 = vsub.f32 %v5122_v25, %v5138_v10  ;;  %7762 = vmatprep.mubr.msk.f32.mxu1 %vm521_vm1, %v10831_v54 }
 0xdd6   : > { %7763 = vmatmul.mubr.msk.f32.vlgmr.msra.gmra.mxu1 %vm521_vm1, %v10834_v60 }
 0xdd7   : > { %8247 = vrsqrt.f32 %v5187_v13  ;;  %v5186_v14 = vadd.f32 1e-05, %v5154_v36 }
 0xdd8   : > { %v8244_v34 = vpop.eup %8243  ;;  %v5013_v18 = vpop.xlane.xlu0 %5012 }
 0xdd9   : > { %8249 = vrsqrt.f32 %v5186_v14  ;;  %v5045_v48 = vmul.f32 0.03125, %v5013_v18  ;;  %v5217_v0 = vmul.f32 %v8244_v34, %v5169_v31 }
 0xdda   : > { %v8246_v5 = vpop.eup %8245  ;;  %v5010_v40 = vpop.xlane.xlu1 %5009 }
 0xddb   : > { %v5044_v22 = vmul.f32 0.03125, %v5010_v40  ;;  %v5216_v46 = vmul.f32 %v8246_v5, %v5168_v52  ;;  %v5237_v9 = vmul.f32 %v10821_v45, %v5217_v0  ;;  %v5141_v53 = vmul.f32 %v5045_v48, %v5045_v48 }
 0xddc   : > { %v5093_v39 = vpop.xlane.xlu0 %5092  ;;  %v5173_v13 = vsub.f32 %v10710_v16, %v5045_v48 }
 0xddd   : > { %v5125_v55 = vmul.f32 0.03125, %v5093_v39  ;;  %v5236_v12 = vmul.f32 %v10821_v45, %v5216_v46  ;;  %v5140_v26 = vmul.f32 %v5044_v22, %v5044_v22  ;;  %v10848_v29 = vadd.f32 %v10827_v20, %v5237_v9 }
 0xdde   : > { %v5090_v7 = vpop.xlane.xlu1 %5089  ;;  %v5172_v34 = vsub.f32 %v10714_v27, %v5044_v22 }
 0xddf   : > { %v5157_v56 = vsub.f32 %v5125_v55, %v5141_v53  ;;  %v5124_v4 = vmul.f32 0.03125, %v5090_v7  ;;  %v10845_v32 = vadd.f32 %v10827_v20, %v5236_v12 }
 0xde1   : > { %v5189_v47 = vadd.f32 1e-05, %v5157_v56  ;;  %v5156_v19 = vsub.f32 %v5124_v4, %v5140_v26  ;;  %7765 = vmatprep.mubr.msk.f32.mxu1 %vm521_vm1, %v10845_v32 }
 0xde2   : > { %7766 = vmatmul.mubr.msk.f32.gmra.mxu1 %vm521_vm1, %v10848_v29 }
 0xde3   : > { %8251 = vrsqrt.f32 %v5189_v47  ;;  %v5188_v61 = vadd.f32 1e-05, %v5156_v19 }
 0xde4   : > { %v8248_v58 = vpop.eup %8247  ;;  %v5019_v43 = vpop.xlane.xlu0 %5018 }
 0xde5   : > { %8253 = vrsqrt.f32 %v5188_v61  ;;  %v5047_v24 = vmul.f32 0.03125, %v5019_v43  ;;  %v5219_v21 = vmul.f32 %v8248_v58, %v5171_v42 }
 0xde6   : > { %v8250_v28 = vpop.eup %8249  ;;  %v5016_v30 = vpop.xlane.xlu1 %5015 }
 0xde7   : > { %v5046_v2 = vmul.f32 0.03125, %v5016_v30  ;;  %v5218_v15 = vmul.f32 %v8250_v28, %v5170_v8  ;;  %v5239_v51 = vmul.f32 %v10821_v45, %v5219_v21  ;;  %v5143_v50 = vmul.f32 %v5047_v24, %v5047_v24 }
 0xde8   : > { %v5099_v6 = vpop.xlane.xlu0 %5098  ;;  %v5175_v47 = vsub.f32 %v10740_v11, %v5047_v24 }
 0xde9   : > { %v5127_v44 = vmul.f32 0.03125, %v5099_v6  ;;  %v5238_v37 = vmul.f32 %v10821_v45, %v5218_v15  ;;  %v5142_v63 = vmul.f32 %v5046_v2, %v5046_v2  ;;  %v10862_v35 = vadd.f32 %v10827_v20, %v5239_v51 }
 0xdea   : > { %v5096_v3 = vpop.xlane.xlu1 %5095  ;;  %v5174_v58 = vsub.f32 %v10744_v23, %v5046_v2 }
 0xdeb   : > { %v5159_v59 = vsub.f32 %v5127_v44, %v5143_v50  ;;  %v5126_v10 = vmul.f32 0.03125, %v5096_v3  ;;  %v10859_v57 = vadd.f32 %v10827_v20, %v5238_v37 }
 0xded   : > { %v5191_v1 = vadd.f32 1e-05, %v5159_v59  ;;  %v5158_v25 = vsub.f32 %v5126_v10, %v5142_v63  ;;  %7768 = vmatprep.mubr.msk.f32.mxu1 %vm521_vm1, %v10859_v57 }
 0xdee   : > { %7769 = vmatmul.mubr.msk.f32.gmra.mxu1 %vm521_vm1, %v10862_v35 }
 0xdef   : > { %8255 = vrsqrt.f32 %v5191_v1  ;;  %v5190_v36 = vadd.f32 1e-05, %v5158_v25 }
 0xdf0   : > { %v8252_v31 = vpop.eup %8251  ;;  %v5025_v14 = vpop.xlane.xlu0 %5024 }
 0xdf1   : > { %8257 = vrsqrt.f32 %v5190_v36  ;;  %v5049_v18 = vmul.f32 0.03125, %v5025_v14  ;;  %v5221_v52 = vmul.f32 %v8252_v31, %v5173_v13 }
 0xdf2   : > { %v8254_v0 = vpop.eup %8253  ;;  %v5022_v5 = vpop.xlane.xlu1 %5021 }
 0xdf3   : > { %v5048_v40 = vmul.f32 0.03125, %v5022_v5  ;;  %v5220_v46 = vmul.f32 %v8254_v0, %v5172_v34  ;;  %v5241_v9 = vmul.f32 %v10821_v45, %v5221_v52  ;;  %v5145_v53 = vmul.f32 %v5049_v18, %v5049_v18 }
 0xdf4   : > { %v5105_v39 = vpop.xlane.xlu0 %5104  ;;  %v5177_v1 = vsub.f32 %v10758_v38, %v5049_v18 }
 0xdf5   : > { %v5129_v55 = vmul.f32 0.03125, %v5105_v39  ;;  %v5240_v16 = vmul.f32 %v10821_v45, %v5220_v46  ;;  %v5144_v12 = vmul.f32 %v5048_v40, %v5048_v40  ;;  %v10876_v22 = vadd.f32 %v10827_v20, %v5241_v9 }
 0xdf6   : > { %v5102_v48 = vpop.xlane.xlu1 %5101  ;;  %v5176_v14 = vsub.f32 %v10762_v41, %v5048_v40 }
 0xdf7   : > { %v5161_v7 = vsub.f32 %v5129_v55, %v5145_v53  ;;  %v5128_v26 = vmul.f32 0.03125, %v5102_v48  ;;  %v10873_v27 = vadd.f32 %v10827_v20, %v5240_v16 }
 0xdf9   : > { %v5193_v56 = vadd.f32 1e-05, %v5161_v7  ;;  %v5160_v4 = vsub.f32 %v5128_v26, %v5144_v12  ;;  %7771 = vmatprep.mubr.msk.f32.mxu1 %vm521_vm1, %v10873_v27 }
 0xdfa   : > { %7772 = vmatmul.mubr.msk.f32.gmra.mxu1 %vm521_vm1, %v10876_v22 }
 0xdfb   : > { %8259 = vrsqrt.f32 %v5193_v56  ;;  %v5192_v19 = vadd.f32 1e-05, %v5160_v4 }
 0xdfc   : > { %v8256_v42 = vpop.eup %8255  ;;  %v5031_v61 = vpop.xlane.xlu0 %5030 }
 0xdfd   : > { %8261 = vrsqrt.f32 %v5192_v19  ;;  %v5051_v43 = vmul.f32 0.03125, %v5031_v61  ;;  %v5223_v8 = vmul.f32 %v8256_v42, %v5175_v47 }
 0xdfe   : > { %v8258_v21 = vpop.eup %8257  ;;  %v5028_v28 = vpop.xlane.xlu1 %5027 }
 0xdff   : > { %v5050_v30 = vmul.f32 0.03125, %v5028_v28  ;;  %v5222_v15 = vmul.f32 %v8258_v21, %v5174_v58  ;;  %v5243_v51 = vmul.f32 %v10821_v45, %v5223_v8  ;;  %v5147_v50 = vmul.f32 %v5051_v43, %v5051_v43  ;;  %v6602_v21 = vld [vmem:[%s11355_s4 + $0xc8] sm:$0xff] }
 0xe00   : > { %v5111_v6 = vpop.xlane.xlu0 %5110  ;;  %v5179_v4 = vsub.f32 %v10776_v17, %v5051_v43  ;;  %7790 = vmatprep.subr.mxu0 %v6602_v21 }
 0xe01   : > { %v5131_v44 = vmul.f32 0.03125, %v5111_v6  ;;  %v5242_v11 = vmul.f32 %v10821_v45, %v5222_v15  ;;  %v5146_v37 = vmul.f32 %v5050_v30, %v5050_v30  ;;  %v10890_v2 = vadd.f32 %v10827_v20, %v5243_v51  ;;  %7791 = vmatpush3.xpose.msra.mxu0 %v6602_v21 }
 0xe02   : > { %v5108_v24 = vpop.xlane.xlu1 %5107  ;;  %v5178_v19 = vsub.f32 %v10780_v33, %v5050_v30  ;;  %v6601_v33 = vld [vmem:[%s11355_s4 + $0xc0] sm:$0xff] }
 0xe03   : > { %v5163_v3 = vsub.f32 %v5131_v44, %v5147_v50  ;;  %v5130_v63 = vmul.f32 0.03125, %v5108_v24  ;;  %v10887_v23 = vadd.f32 %v10827_v20, %v5242_v11  ;;  %7792 = vmatprep.subr.mxu0 %v6601_v33 }
 0xe05   : > { %v5195_v59 = vadd.f32 1e-05, %v5163_v3  ;;  %v5162_v10 = vsub.f32 %v5130_v63, %v5146_v37  ;;  %7774 = vmatprep.mubr.msk.f32.mxu1 %vm521_vm1, %v10887_v23  ;;  %7793 = vmatpush3.xpose.msra.mxu0 %v6601_v33 }
 0xe06   : > { %7775 = vmatmul.mubr.msk.f32.gmra.mxu1 %vm521_vm1, %v10890_v2 }
 0xe07   : > { %8263 = vrsqrt.f32 %v5195_v59  ;;  %v5194_v25 = vadd.f32 1e-05, %v5162_v10  ;;  %v5037_v13 = vpop.xlane.xlu0 %5036 }
 0xe08   : > { %v8260_v36 = vpop.eup %8259  ;;  %v5053_v31 = vmul.f32 0.03125, %v5037_v13 }
 0xe09   : > { %8265 = vrsqrt.f32 %v5194_v25  ;;  %v5034_v34 = vpop.xlane.xlu1 %5033  ;;  %v5225_v52 = vmul.f32 %v8260_v36, %v5177_v1 }
 0xe0a   : > { %v8262_v0 = vpop.eup %8261  ;;  %v5052_v5 = vmul.f32 0.03125, %v5034_v34  ;;  %v5149_v9 = vmul.f32 %v5053_v31, %v5053_v31  ;;  %v5181_v43 = vsub.f32 %v10794_v62, %v5053_v31  ;;  %v6584_v62 = vld [vmem:[%s11357_s6 + $0xe] ss:$0 sm:$0xff] }
 0xe0b   : > { %v5117_v46 = vpop.xlane.xlu0 %5116  ;;  %v5224_v39 = vmul.f32 %v8262_v0, %v5176_v14  ;;  %v5245_v55 = vmul.f32 %v10821_v45, %v5225_v52 }
 0xe0c   : > { %v5133_v53 = vmul.f32 0.03125, %v5117_v46  ;;  %v5148_v18 = vmul.f32 %v5052_v5, %v5052_v5  ;;  %v5180_v6 = vsub.f32 %v10798_v49, %v5052_v5 }
 0xe0d   : > { %v5114_v16 = vpop.xlane.xlu1 %5113  ;;  %v5244_v38 = vmul.f32 %v10821_v45, %v5224_v39  ;;  %v10904_v26 = vadd.f32 %v10827_v20, %v5245_v55 }
 0xe0e   : > { %v5165_v48 = vsub.f32 %v5133_v53, %v5149_v9  ;;  %v5132_v12 = vmul.f32 0.03125, %v5114_v16 }
 0xe0f   : > { %v10901_v7 = vadd.f32 %v10827_v20, %v5244_v38 }
 0xe10   : > { %v5197_v41 = vadd.f32 1e-05, %v5165_v48  ;;  %v5164_v40 = vsub.f32 %v5132_v12, %v5148_v18 }
 0xe11   : > { %7777 = vmatprep.mubr.msk.f32.mxu1 %vm521_vm1, %v10901_v7 }
 0xe12   : > { %8267 = vrsqrt.f32 %v5197_v41  ;;  %v5196_v56 = vadd.f32 1e-05, %v5164_v40  ;;  %7778 = vmatmul.mubr.msk.f32.gmra.mxu1 %vm521_vm1, %v10904_v26 }
 0xe14   : > { %v8264_v47 = vpop.eup %8263  ;;  %8269 = vrsqrt.f32 %v5196_v56 }
 0xe15   : > { %v5227_v42 = vmul.f32 %v8264_v47, %v5179_v4 }
 0xe16   : > { %v8266_v61 = vpop.eup %8265 }
 0xe17   : > { %v5226_v58 = vmul.f32 %v8266_v61, %v5178_v19  ;;  %v5247_v8 = vmul.f32 %v10821_v45, %v5227_v42 }
 0xe19   : > { %v5246_v28 = vmul.f32 %v10821_v45, %v5226_v58  ;;  %v10921_v17 = vadd.f32 %v10827_v20, %v5247_v8 }
 0xe1b   : > { %v10918_v15 = vadd.f32 %v10827_v20, %v5246_v28 }
 0xe1d   : > { %7780 = vmatprep.mubr.msk.f32.mxu1 %vm521_vm1, %v10918_v15 }
 0xe1e   : > { %7781 = vmatmul.mubr.msk.f32.gmra.mxu1 %vm521_vm1, %v10921_v17 }
 0xe1f   : > { %v8268_v30 = vpop.eup %8267 }
 0xe20   : > { %v5229_v51 = vmul.f32 %v8268_v30, %v5181_v43 }
 0xe21   : > { %v8270_v50 = vpop.eup %8269 }
 0xe22   : > { %v5228_v44 = vmul.f32 %v8270_v50, %v5180_v6  ;;  %v5249_v11 = vmul.f32 %v10821_v45, %v5229_v51 }
 0xe24   : > { %v5248_v24 = vmul.f32 %v10821_v45, %v5228_v44  ;;  %v10938_v3 = vadd.f32 %v10827_v20, %v5249_v11 }
 0xe26   : > { %v10935_v37 = vadd.f32 %v10827_v20, %v5248_v24 }
 0xe28   : > { %7783 = vmatprep.mubr.msk.f32.mxu1 %vm521_vm1, %v10935_v37 }
 0xe29   : > { %7784 = vmatmul.mubr.msk.f32.gmra.mxu1 %vm521_vm1, %v10938_v3 }
 0xe96   : > { %v7764_v49 = vpop.f32.mrf.mxu1 }
 0xe97   : > { %v5399_v63 = vadd.f32 %v7764_v49, %v6584_v62 }
 0xe98   : > { %v5393_v59 = vpop.f32.mrf.mxu1 }
 0xe99   : > { %v5394_v45 = vadd.f32 %v6584_v62, %v5393_v59  ;;  %v5473_v1 = vmax.f32 %v5399_v63, 0.0 }
 0xe9b   : > { %v5472_v10 = vmax.f32 %v5394_v45, 0.0 }
 0xe9d   : > { %7794 = vmatprep.mubr.f32.mxu0 %v5472_v10 }
 0xe9e   : > { %7795 = vmatmul.mubr.f32.vlgmr.msra.gmra.mxu0 %v5473_v1 }
 0xea2   : > { %v7767_v20 = vpop.f32.mrf.mxu1 }
 0xea3   : > { %v5409_v25 = vadd.f32 %v7767_v20, %v6584_v62 }
 0xea4   : > { %v5403_v13 = vpop.f32.mrf.mxu1 }
 0xea5   : > { %v5404_v36 = vadd.f32 %v6584_v62, %v5403_v13  ;;  %v5475_v14 = vmax.f32 %v5409_v25, 0.0 }
 0xea7   : > { %v5474_v31 = vmax.f32 %v5404_v36, 0.0 }
 0xea9   : > { %7797 = vmatprep.mubr.f32.mxu0 %v5474_v31 }
 0xeaa   : > { %7798 = vmatmul.mubr.f32.gmra.mxu0 %v5475_v14 }
 0xeae   : > { %v7770_v34 = vpop.f32.mrf.mxu1 }
 0xeaf   : > { %v5419_v52 = vadd.f32 %v7770_v34, %v6584_v62 }
 0xeb0   : > { %v5413_v0 = vpop.f32.mrf.mxu1 }
 0xeb1   : > { %v5414_v5 = vadd.f32 %v6584_v62, %v5413_v0  ;;  %v5477_v39 = vmax.f32 %v5419_v52, 0.0 }
 0xeb3   : > { %v5476_v46 = vmax.f32 %v5414_v5, 0.0 }
 0xeb5   : > { %7800 = vmatprep.mubr.f32.mxu0 %v5476_v46 }
 0xeb6   : > { %7801 = vmatmul.mubr.f32.gmra.mxu0 %v5477_v39 }
 0xeba   : > { %v7773_v9 = vpop.f32.mrf.mxu1 }
 0xebb   : > { %v5429_v53 = vadd.f32 %v7773_v9, %v6584_v62 }
 0xebc   : > { %v5423_v55 = vpop.f32.mrf.mxu1 }
 0xebd   : > { %v5424_v16 = vadd.f32 %v6584_v62, %v5423_v55  ;;  %v5479_v18 = vmax.f32 %v5429_v53, 0.0 }
 0xebf   : > { %v5478_v38 = vmax.f32 %v5424_v16, 0.0 }
 0xec1   : > { %7803 = vmatprep.mubr.f32.mxu0 %v5478_v38 }
 0xec2   : > { %7804 = vmatmul.mubr.f32.gmra.mxu0 %v5479_v18 }
 0xec6   : > { %v7776_v48 = vpop.f32.mrf.mxu1 }
 0xec7   : > { %v5439_v12 = vadd.f32 %v7776_v48, %v6584_v62 }
 0xec8   : > { %v5433_v41 = vpop.f32.mrf.mxu1 }
 0xec9   : > { %v5434_v40 = vadd.f32 %v6584_v62, %v5433_v41  ;;  %v5481_v4 = vmax.f32 %v5439_v12, 0.0 }
 0xecb   : > { %v5480_v56 = vmax.f32 %v5434_v40, 0.0 }
 0xecd   : > { %7806 = vmatprep.mubr.f32.mxu0 %v5480_v56 }
 0xece   : > { %7807 = vmatmul.mubr.f32.gmra.mxu0 %v5481_v4 }
 0xed2   : > { %v7779_v47 = vpop.f32.mrf.mxu1 }
 0xed3   : > { %v5449_v19 = vadd.f32 %v7779_v47, %v6584_v62 }
 0xed4   : > { %v5443_v42 = vpop.f32.mrf.mxu1 }
 0xed5   : > { %v5444_v61 = vadd.f32 %v6584_v62, %v5443_v42  ;;  %v5483_v8 = vmax.f32 %v5449_v19, 0.0 }
 0xed7   : > { %v5482_v58 = vmax.f32 %v5444_v61, 0.0 }
 0xed9   : > { %7809 = vmatprep.mubr.f32.mxu0 %v5482_v58 }
 0xeda   : > { %7810 = vmatmul.mubr.f32.gmra.mxu0 %v5483_v8 }
 0xede   : > { %v7782_v21 = vpop.f32.mrf.mxu1 }
 0xedf   : > { %v5459_v28 = vadd.f32 %v7782_v21, %v6584_v62 }
 0xee0   : > { %v5453_v33 = vpop.f32.mrf.mxu1 }
 0xee1   : > { %v5454_v43 = vadd.f32 %v6584_v62, %v5453_v33  ;;  %v5485_v6 = vmax.f32 %v5459_v28, 0.0 }
 0xee3   : > { %v5484_v30 = vmax.f32 %v5454_v43, 0.0 }
 0xee5   : > { %7812 = vmatprep.mubr.f32.mxu0 %v5484_v30 }
 0xee6   : > { %7813 = vmatmul.mubr.f32.gmra.mxu0 %v5485_v6 }
 0xee9   : > { %v7785_v51 = vpop.f32.mrf.mxu1 }
 0xeea   : > { %v5469_v50 = vadd.f32 %v7785_v51, %v6584_v62 }
 0xeeb   : > { %v5463_v44 = vpop.f32.mrf.mxu1 }
 0xeec   : > { %v5464_v11 = vadd.f32 %v6584_v62, %v5463_v44  ;;  %v5487_v49 = vmax.f32 %v5469_v50, 0.0  ;;  %v10962_v62 = vld [vmem:[%s11357_s6 + $0xf] ss:$0 sm:$0xff] }
 0xeee   : > { %v5486_v24 = vmax.f32 %v5464_v11, 0.0 }
 0xef0   : > { %7815 = vmatprep.mubr.f32.mxu0 %v5486_v24 }
 0xef1   : > { %7816 = vmatmul.mubr.f32.gmra.mxu0 %v5487_v49 }
 0xf5e   : > { %v10947_v63 = vpop.f32.mrf.mxu0 }
 0xf60   : > { %v10949_v59 = vpop.f32.mrf.mxu0 }
 0xf6a   : > { %v10951_v45 = vpop.f32.mrf.mxu0 }
 0xf6c   : > { %v10953_v10 = vpop.f32.mrf.mxu0 }
 0xf76   : > { %v10955_v1 = vpop.f32.mrf.mxu0 }
 0xf78   : > { %v10957_v20 = vpop.f32.mrf.mxu0 }
 0xf82   : > { %v7805_v25 = vpop.f32.mrf.mxu0 }
 0xf83   : > { %v5599_v13 = vadd.f32 %v7805_v25, %v10962_v62  ;;  %v5589_v25 = vadd.f32 %v10955_v1, %v10962_v62 }
 0xf84   : > { %v5593_v14 = vpop.f32.mrf.mxu0 }
 0xf85   : > { %v10966_v36 = vadd.f32 %v5599_v13, %v10876_v22 }
 0xf87   : > { %v5681_v31 = vsel %vm521_vm1, %v10966_v36, 0.0 }
 0xf88   : > { %5682 = vadd.xlane.f32.xlu0 %v5681_v31 }
 0xf8e   : > { %v7808_v34 = vpop.f32.mrf.mxu0 }
 0xf8f   : > { %v5609_v52 = vadd.f32 %v7808_v34, %v10962_v62  ;;  %v5584_v34 = vadd.f32 %v10962_v62, %v10957_v20 }
 0xf90   : > { %v5603_v0 = vpop.f32.mrf.mxu0 }
 0xf91   : > { %v10972_v5 = vadd.f32 %v5609_v52, %v10890_v2  ;;  %v5604_v46 = vadd.f32 %v10962_v62, %v5603_v0  ;;  %v5579_v0 = vadd.f32 %v10951_v45, %v10962_v62 }
 0xf93   : > { %v10976_v39 = vadd.f32 %v5604_v46, %v10887_v23  ;;  %v5687_v22 = vsel %vm521_vm1, %v10972_v5, 0.0  ;;  %v5733_v9 = vmul.f32 %v10972_v5, %v10972_v5  ;;  %v11057_v46 = vadd.f32 %v5584_v34, %v10859_v57 }
 0xf94   : > { %5688 = vadd.xlane.f32.xlu0 %v5687_v22  ;;  %v5731_v22 = vmul.f32 %v10966_v36, %v10966_v36 }
 0xf95   : > { %v5767_v53 = vsel %vm521_vm1, %v5733_v9, 0.0  ;;  %v5732_v55 = vmul.f32 %v10976_v39, %v10976_v39  ;;  %v5684_v2 = vsel %vm521_vm1, %v10976_v39, 0.0  ;;  %v11065_v9 = vadd.f32 %v5579_v0, %v10848_v29 }
 0xf96   : > { %5768 = vadd.xlane.f32.xlu1 %v5767_v53  ;;  %v5574_v53 = vadd.f32 %v10962_v62, %v10953_v10  ;;  %v5672_v57 = vsel %vm521_vm1, %v11057_v46, 0.0  ;;  %v5761_v45 = vsel %vm521_vm1, %v5731_v22, 0.0 }
 0xf97   : > { %v5764_v23 = vsel %vm521_vm1, %v5732_v55, 0.0  ;;  %v5669_v29 = vsel %vm521_vm1, %v11065_v9, 0.0 }
 0xf98   : > { %5685 = vadd.xlane.f32.xlu0 %v5684_v2  ;;  %v5569_v2 = vadd.f32 %v10947_v63, %v10962_v62 }
 0xf9a   : > { %v7811_v16 = vpop.f32.mrf.mxu0  ;;  %5765 = vadd.xlane.f32.xlu1 %v5764_v23  ;;  %v11077_v23 = vadd.f32 %v5574_v53, %v10845_v32 }
 0xf9b   : > { %v5619_v38 = vadd.f32 %v7811_v16, %v10962_v62 }
 0xf9c   : > { %v5613_v18 = vpop.f32.mrf.mxu0  ;;  %v5666_v32 = vsel %vm521_vm1, %v11077_v23, 0.0 }
 0xf9d   : > { %v10990_v48 = vadd.f32 %v5619_v38, %v10904_v26  ;;  %v5614_v12 = vadd.f32 %v10962_v62, %v5613_v18  ;;  %v11085_v38 = vadd.f32 %v5569_v2, %v10834_v60  ;;  %v5564_v18 = vadd.f32 %v10962_v62, %v10949_v59 }
 0xf9e   : > { %v5727_v59 = vmul.f32 %v11065_v9, %v11065_v9 }
 0xf9f   : > { %v10994_v41 = vadd.f32 %v5614_v12, %v10901_v7  ;;  %v5693_v40 = vsel %vm521_vm1, %v10990_v48, 0.0  ;;  %v5735_v56 = vmul.f32 %v10990_v48, %v10990_v48  ;;  %v5728_v12 = vmul.f32 %v11057_v46, %v11057_v46 }
 0xfa0   : > { %5694 = vadd.xlane.f32.xlu0 %v5693_v40  ;;  %v11095_v40 = vadd.f32 %v5564_v18, %v10831_v54  ;;  %v5663_v60 = vsel %vm521_vm1, %v11085_v38, 0.0  ;;  %v5749_v54 = vsel %vm521_vm1, %v5727_v59, 0.0 }
 0xfa1   : > { %v5773_v4 = vsel %vm521_vm1, %v5735_v56, 0.0  ;;  %v5734_v47 = vmul.f32 %v10994_v41, %v10994_v41  ;;  %v5690_v26 = vsel %vm521_vm1, %v10994_v41, 0.0  ;;  %v5752_v56 = vsel %vm521_vm1, %v5728_v12, 0.0 }
 0xfa2   : > { %5774 = vadd.xlane.f32.xlu1 %v5773_v4  ;;  %v5724_v4 = vmul.f32 %v11095_v40, %v11095_v40 }
 0xfa3   : > { %v5770_v7 = vsel %vm521_vm1, %v5734_v47, 0.0  ;;  %v5726_v47 = vmul.f32 %v11077_v23, %v11077_v23 }
 0xfa4   : > { %5691 = vadd.xlane.f32.xlu0 %v5690_v26  ;;  %v5740_v26 = vsel %vm521_vm1, %v5724_v4, 0.0 }
 0xfa6   : > { %v7814_v19 = vpop.f32.mrf.mxu0  ;;  %5771 = vadd.xlane.f32.xlu1 %v5770_v7  ;;  %v5746_v7 = vsel %vm521_vm1, %v5726_v47, 0.0 }
 0xfa7   : > { %v5629_v42 = vadd.f32 %v7814_v19, %v10962_v62  ;;  %v5725_v19 = vmul.f32 %v11085_v38, %v11085_v38 }
 0xfa8   : > { %v5623_v61 = vpop.f32.mrf.mxu0 }
 0xfa9   : > { %v11008_v58 = vadd.f32 %v5629_v42, %v10921_v17  ;;  %v5624_v8 = vadd.f32 %v10962_v62, %v5623_v61  ;;  %v5743_v42 = vsel %vm521_vm1, %v5725_v19, 0.0  ;;  %v5940_v61 = vld [vmem:[%s11353_s2] sm:$0xff] }
 0xfaa   : > { %7850 = vmatprep.mubr.f32.mxu1 %v5940_v61 }
 0xfab   : > { %v11012_v21 = vadd.f32 %v5624_v8, %v10918_v15  ;;  %v5699_v28 = vsel %vm521_vm1, %v11008_v58, 0.0  ;;  %v5737_v33 = vmul.f32 %v11008_v58, %v11008_v58  ;;  %v5594_v15 = vadd.f32 %v10962_v62, %v5593_v14 }
 0xfac   : > { %5700 = vadd.xlane.f32.xlu0 %v5699_v28  ;;  %v11045_v14 = vadd.f32 %v5589_v25, %v10862_v35 }
 0xfad   : > { %v5779_v43 = vsel %vm521_vm1, %v5737_v33, 0.0  ;;  %v5696_v30 = vsel %vm521_vm1, %v11012_v21, 0.0  ;;  %v5736_v49 = vmul.f32 %v11012_v21, %v11012_v21  ;;  %v11037_v13 = vadd.f32 %v5594_v15, %v10873_v27 }
 0xfae   : > { %5780 = vadd.xlane.f32.xlu1 %v5779_v43  ;;  %v5675_v35 = vsel %vm521_vm1, %v11045_v14, 0.0  ;;  %v5729_v16 = vmul.f32 %v11045_v14, %v11045_v14 }
 0xfaf   : > { %v5678_v27 = vsel %vm521_vm1, %v11037_v13, 0.0  ;;  %v5730_v55 = vmul.f32 %v11037_v13, %v11037_v13 }
 0xfb0   : > { %5697 = vadd.xlane.f32.xlu0 %v5696_v30  ;;  %v5755_v63 = vsel %vm521_vm1, %v5729_v16, 0.0 }
 0xfb1   : > { %v7817_v17 = vpop.f32.mrf.mxu0  ;;  %v5758_v10 = vsel %vm521_vm1, %v5730_v55, 0.0 }
 0xfb2   : > { %v5639_v6 = vadd.f32 %v7817_v17, %v10962_v62 }
 0xfb3   : > { %v5633_v51 = vpop.f32.mrf.mxu0 }
 0xfb4   : > { %v11024_v50 = vadd.f32 %v5639_v6, %v10938_v3  ;;  %v5634_v44 = vadd.f32 %v10962_v62, %v5633_v51  ;;  %v5660_v62 = vsel %vm521_vm1, %v11095_v40, 0.0 }
 0xfb6   : > { %v11028_v11 = vadd.f32 %v5634_v44, %v10935_v37  ;;  %v5705_v24 = vsel %vm521_vm1, %v11024_v50, 0.0  ;;  %v5776_v37 = vsel %vm521_vm1, %v5736_v49, 0.0  ;;  %v5739_v31 = vmul.f32 %v11024_v50, %v11024_v50 }
 0xfb7   : > { %5706 = vadd.xlane.f32.xlu1 %v5705_v24 }
 0xfb8   : > { %v5702_v3 = vsel %vm521_vm1, %v11028_v11, 0.0  ;;  %v5785_v1 = vsel %vm521_vm1, %v5739_v31, 0.0  ;;  %v5738_v52 = vmul.f32 %v11028_v11, %v11028_v11 }
 0xfb9   : > { %5703 = vadd.xlane.f32.xlu0 %v5702_v3 }
 0xfba   : > { %v5782_v20 = vsel %vm521_vm1, %v5738_v52, 0.0 }
 0xfbb   : > { %5777 = vadd.xlane.f32.xlu1 %v5776_v37 }
 0xfbd   : > { %5679 = vadd.xlane.f32.xlu0 %v5678_v27 }
 0xfbf   : > { %5786 = vadd.xlane.f32.xlu1 %v5785_v1 }
 0xfc1   : > { %5676 = vadd.xlane.f32.xlu0 %v5675_v35 }
 0xfc3   : > { %5783 = vadd.xlane.f32.xlu1 %v5782_v20 }
 0xfc5   : > { %5673 = vadd.xlane.f32.xlu0 %v5672_v57 }
 0xfc7   : > { %5762 = vadd.xlane.f32.xlu1 %v5761_v45 }
 0xfc9   : > { %5670 = vadd.xlane.f32.xlu0 %v5669_v29 }
 0xfcb   : > { %5759 = vadd.xlane.f32.xlu1 %v5758_v10 }
 0xfcd   : > { %5667 = vadd.xlane.f32.xlu0 %v5666_v32 }
 0xfcf   : > { %5756 = vadd.xlane.f32.xlu1 %v5755_v63 }
 0xfd1   : > { %5664 = vadd.xlane.f32.xlu0 %v5663_v60 }
 0xfd3   : > { %5753 = vadd.xlane.f32.xlu1 %v5752_v56 }
 0xfd5   : > { %5661 = vadd.xlane.f32.xlu0 %v5660_v62 }
 0xfd7   : > { %5750 = vadd.xlane.f32.xlu1 %v5749_v54 }
 0xfd9   : > { %5741 = vadd.xlane.f32.xlu0 %v5740_v26 }
 0xfdb   : > { %5747 = vadd.xlane.f32.xlu1 %v5746_v7 }
 0xfdf   : > { %5744 = vadd.xlane.f32.xlu1 %v5743_v42 }
0x1011   : > { %v5683_v8 = vpop.xlane.xlu0 %5682 }
0x1012   : > { %v11145_v7 = vmul.f32 0.03125, %v5683_v8 }
0x101d   : > { %v5689_v28 = vpop.xlane.xlu0 %5688 }
0x101e   : > { %v11129_v53 = vmul.f32 0.03125, %v5689_v28 }
0x101f   : > { %v5769_v33 = vpop.xlane.xlu1 %5768 }
0x1020   : > { %v5813_v62 = vmul.f32 %v11129_v53, %v11129_v53  ;;  %v5797_v4 = vmul.f32 0.03125, %v5769_v33 }
0x1021   : > { %v5686_v43 = vpop.xlane.xlu0 %5685 }
0x1022   : > { %v11139_v32 = vmul.f32 0.03125, %v5686_v43  ;;  %v5829_v33 = vsub.f32 %v5797_v4, %v5813_v62 }
0x1023   : > { %v5766_v30 = vpop.xlane.xlu1 %5765 }
0x1024   : > { %v5812_v28 = vmul.f32 %v11139_v32, %v11139_v32  ;;  %v5796_v43 = vmul.f32 0.03125, %v5766_v30 }
0x1029   : > { %v5695_v17 = vpop.xlane.xlu0 %5694 }
0x102a   : > { %v11119_v31 = vmul.f32 0.03125, %v5695_v17 }
0x102b   : > { %v5775_v6 = vpop.xlane.xlu1 %5774 }
0x102c   : > { %v5815_v57 = vmul.f32 %v11119_v31, %v11119_v31  ;;  %v5799_v45 = vmul.f32 0.03125, %v5775_v6 }
0x102d   : > { %v5692_v51 = vpop.xlane.xlu0 %5691 }
0x102e   : > { %v11127_v35 = vmul.f32 0.03125, %v5692_v51  ;;  %v5831_v54 = vsub.f32 %v5799_v45, %v5815_v57 }
0x102f   : > { %v5772_v15 = vpop.xlane.xlu1 %5771 }
0x1030   : > { %v5814_v63 = vmul.f32 %v11127_v35, %v11127_v35  ;;  %v5798_v12 = vmul.f32 0.03125, %v5772_v15 }
0x1032   : > { %v5830_v17 = vsub.f32 %v5798_v12, %v5814_v63 }
0x1035   : > { %v5701_v44 = vpop.xlane.xlu0 %5700 }
0x1036   : > { %v11117_v25 = vmul.f32 0.03125, %v5701_v44  ;;  %v5863_v44 = vadd.f32 1e-05, %v5831_v54 }
0x1037   : > { %v5781_v24 = vpop.xlane.xlu1 %5780 }
0x1038   : > { %v5817_v34 = vmul.f32 %v11117_v25, %v11117_v25  ;;  %v5801_v27 = vmul.f32 0.03125, %v5781_v24 }
0x1039   : > { %v5698_v49 = vpop.xlane.xlu0 %5697 }
0x103a   : > { %v11123_v1 = vmul.f32 0.03125, %v5698_v49  ;;  %v5833_v55 = vsub.f32 %v5801_v27, %v5817_v34  ;;  %v5828_v34 = vsub.f32 %v5796_v43, %v5812_v28  ;;  %v5862_v27 = vadd.f32 1e-05, %v5830_v17 }
0x103b   : > { %v5849_v17 = vsub.f32 %v11008_v58, %v11117_v25 }
0x103c   : > { %v5816_v2 = vmul.f32 %v11123_v1, %v11123_v1  ;;  %v5865_v47 = vadd.f32 1e-05, %v5833_v55 }
0x1040   : > { %v5707_v3 = vpop.xlane.xlu1 %5706 }
0x1041   : > { %v11125_v0 = vmul.f32 0.03125, %v5707_v3 }
0x1042   : > { %v5704_v37 = vpop.xlane.xlu0 %5703 }
0x1043   : > { %v5819_v10 = vmul.f32 %v11125_v0, %v11125_v0  ;;  %v11137_v16 = vmul.f32 0.03125, %v5704_v37  ;;  %v5811_v37 = vmul.f32 %v11145_v7, %v11145_v7 }
0x1044   : > { %v5778_v52 = vpop.xlane.xlu1 %5777 }
0x1045   : > { %v5800_v20 = vmul.f32 0.03125, %v5778_v52  ;;  %v5818_v19 = vmul.f32 %v11137_v16, %v11137_v16  ;;  %v5861_v52 = vadd.f32 1e-05, %v5829_v33 }
0x1046   : > { %v5680_v22 = vpop.xlane.xlu0 %5679 }
0x1047   : > { %v5832_v60 = vsub.f32 %v5800_v20, %v5816_v2  ;;  %v11151_v8 = vmul.f32 0.03125, %v5680_v22  ;;  %v5860_v2 = vadd.f32 1e-05, %v5828_v34 }
0x1048   : > { %v5787_v29 = vpop.xlane.xlu1 %5786 }
0x1049   : > { %v5803_v18 = vmul.f32 0.03125, %v5787_v29  ;;  %v5864_v6 = vadd.f32 1e-05, %v5832_v60  ;;  %v5810_v45 = vmul.f32 %v11151_v8, %v11151_v8 }
0x104a   : > { %v5677_v56 = vpop.xlane.xlu0 %5676 }
0x104b   : > { %v5835_v59 = vsub.f32 %v5803_v18, %v5819_v10  ;;  %v11157_v55 = vmul.f32 0.03125, %v5677_v56 }
0x104c   : > { %v5784_v26 = vpop.xlane.xlu1 %5783 }
0x104d   : > { %v5867_v42 = vadd.f32 1e-05, %v5835_v59  ;;  %v5802_v61 = vmul.f32 0.03125, %v5784_v26  ;;  %v5809_v12 = vmul.f32 %v11157_v55, %v11157_v55 }
0x104e   : > { %v5674_v51 = vpop.xlane.xlu0 %5673 }
0x104f   : > { %8271 = vrsqrt.f32 %v5867_v42  ;;  %v5834_v15 = vsub.f32 %v5802_v61, %v5818_v19  ;;  %v11161_v60 = vmul.f32 0.03125, %v5674_v51 }
0x1050   : > { %8273 = vrsqrt.f32 %v5865_v47  ;;  %v5763_v24 = vpop.xlane.xlu1 %5762  ;;  %v5851_v47 = vsub.f32 %v11024_v50, %v11125_v0  ;;  %v5848_v50 = vsub.f32 %v11012_v21, %v11123_v1  ;;  %v5850_v0 = vsub.f32 %v11028_v11, %v11137_v16 }
0x1051   : > { %v5866_v49 = vadd.f32 1e-05, %v5834_v15  ;;  %v5795_v3 = vmul.f32 0.03125, %v5763_v24  ;;  %8275 = vrsqrt.f32 %v5864_v6  ;;  %v5808_v42 = vmul.f32 %v11161_v60, %v11161_v60  ;;  %v11180_v24 = vld [vmem:[%s11357_s6 + $0xc] ss:$0 sm:$0xff] }
0x1052   : > { %v5671_v30 = vpop.xlane.xlu0 %5670  ;;  %v5847_v11 = vsub.f32 %v10990_v48, %v11119_v31 }
0x1053   : > { %8277 = vrsqrt.f32 %v5866_v49  ;;  %v5827_v20 = vsub.f32 %v5795_v3, %v5811_v37  ;;  %v11167_v61 = vmul.f32 0.03125, %v5671_v30  ;;  %v5846_v30 = vsub.f32 %v10994_v41, %v11127_v35 }
0x1054   : > { %8279 = vrsqrt.f32 %v5863_v44  ;;  %v5760_v57 = vpop.xlane.xlu1 %5759 }
0x1055   : > { %v5794_v22 = vmul.f32 0.03125, %v5760_v57  ;;  %8281 = vrsqrt.f32 %v5862_v27  ;;  %v5859_v18 = vadd.f32 1e-05, %v5827_v20  ;;  %v5807_v1 = vmul.f32 %v11167_v61, %v11167_v61  ;;  %v11192_v27 = vld [vmem:[%s11357_s6 + $0xd] ss:$0 sm:$0xff] }
0x1056   : > { %v5668_v29 = vpop.xlane.xlu0 %5667  ;;  %8283 = vrsqrt.f32 %v5861_v52 }
0x1057   : > { %v5826_v10 = vsub.f32 %v5794_v22, %v5810_v45  ;;  %8285 = vrsqrt.f32 %v5860_v2  ;;  %v11182_v58 = vmul.f32 0.03125, %v5668_v29 }
0x1058   : > { %v5757_v63 = vpop.xlane.xlu1 %5756  ;;  %8287 = vrsqrt.f32 %v5859_v18 }
0x1059   : > { %v5793_v59 = vmul.f32 0.03125, %v5757_v63  ;;  %v5858_v62 = vadd.f32 1e-05, %v5826_v10  ;;  %v5806_v29 = vmul.f32 %v11182_v58, %v11182_v58 }
0x105a   : > { %v5665_v4 = vpop.xlane.xlu0 %5664 }
0x105b   : > { %v5825_v54 = vsub.f32 %v5793_v59, %v5809_v12  ;;  %8289 = vrsqrt.f32 %v5858_v62  ;;  %v11203_v12 = vmul.f32 0.03125, %v5665_v4  ;;  %v5844_v4 = vsub.f32 %v10976_v39, %v11139_v32 }
0x105c   : > { %v8272_v56 = vpop.eup %8271  ;;  %v5754_v26 = vpop.xlane.xlu1 %5753 }
0x105d   : > { %v8274_v19 = vpop.eup %8273  ;;  %v5857_v28 = vadd.f32 1e-05, %v5825_v54  ;;  %v5792_v43 = vmul.f32 0.03125, %v5754_v26  ;;  %v5899_v51 = vmul.f32 %v8272_v56, %v5851_v47  ;;  %v5845_v56 = vsub.f32 %v10972_v5, %v11129_v53 }
0x105e   : > { %v5662_v6 = vpop.xlane.xlu0 %5661  ;;  %v8276_v15 = vpop.eup %8275  ;;  %v5897_v37 = vmul.f32 %v8274_v19, %v5849_v17  ;;  %v5843_v53 = vsub.f32 %v10966_v36, %v11145_v7  ;;  %v5842_v36 = vsub.f32 %v11037_v13, %v11151_v8  ;;  %v5840_v8 = vsub.f32 %v11057_v46, %v11161_v60 }
0x105f   : > { %v5824_v33 = vsub.f32 %v5792_v43, %v5808_v42  ;;  %v11175_v44 = vmul.f32 0.03125, %v5662_v6  ;;  %8291 = vrsqrt.f32 %v5857_v28  ;;  %v5919_v3 = vmul.f32 %v11180_v24, %v5899_v51 }
0x1060   : > { %v8278_v49 = vpop.eup %8277  ;;  %v5751_v25 = vpop.xlane.xlu1 %5750  ;;  %v5896_v45 = vmul.f32 %v8276_v15, %v5848_v50  ;;  %v5917_v41 = vmul.f32 %v11180_v24, %v5897_v37  ;;  %v5805_v50 = vmul.f32 %v11203_v12, %v11203_v12 }
0x1061   : > { %v8280_v21 = vpop.eup %8279  ;;  %v5856_v16 = vadd.f32 1e-05, %v5824_v33  ;;  %v5791_v34 = vmul.f32 0.03125, %v5751_v25  ;;  %v5939_v20 = vadd.f32 %v11192_v27, %v5919_v3  ;;  %v5898_v57 = vmul.f32 %v8278_v49, %v5850_v0 }
0x1062   : > { %v5742_v52 = vpop.xlane.xlu0 %5741  ;;  %v8282_v22 = vpop.eup %8281  ;;  %v5804_v48 = vmul.f32 %v11175_v44, %v11175_v44  ;;  %v5895_v35 = vmul.f32 %v8280_v21, %v5847_v11  ;;  %v5916_v26 = vmul.f32 %v11180_v24, %v5896_v45  ;;  %v5937_v6 = vadd.f32 %v11192_v27, %v5917_v41 }
0x1063   : > { %8293 = vrsqrt.f32 %v5856_v16  ;;  %v5823_v31 = vsub.f32 %v5791_v34, %v5807_v1  ;;  %v5788_v2 = vmul.f32 0.03125, %v5742_v52  ;;  %7818 = vmatprep.subr.mxu1 %v5939_v20  ;;  %v5918_v18 = vmul.f32 %v11180_v24, %v5898_v57  ;;  %v8284_v63 = vpop.eup %8283 }
0x1064   : > { %v5748_v10 = vpop.xlane.xlu1 %5747  ;;  %7819 = vmatpush3.msra.mxu1 %v5939_v20  ;;  %v5894_v19 = vmul.f32 %v8282_v22, %v5846_v30  ;;  %v8286_v42 = vpop.eup %8285  ;;  %v5915_v51 = vmul.f32 %v11180_v24, %v5895_v35  ;;  %v5893_v15 = vmul.f32 %v8284_v63, %v5845_v56  ;;  %v5936_v39 = vadd.f32 %v11192_v27, %v5916_v26 }
0x1065   : > { %v5855_v59 = vadd.f32 1e-05, %v5823_v31  ;;  %v5820_v62 = vsub.f32 %v5788_v2, %v5804_v48  ;;  %v5790_v54 = vmul.f32 0.03125, %v5748_v10  ;;  %v5938_v47 = vadd.f32 %v11192_v27, %v5918_v18  ;;  %v8288_v5 = vpop.eup %8287 }
0x1066   : > { %v5914_v32 = vmul.f32 %v11180_v24, %v5894_v19  ;;  %v5892_v49 = vmul.f32 %v8286_v42, %v5844_v4  ;;  %v5935_v7 = vadd.f32 %v11192_v27, %v5915_v51  ;;  %v5913_v37 = vmul.f32 %v11180_v24, %v5893_v15  ;;  %v5941_v42 = vld [vmem:[%s11353_s2 + $0x8] sm:$0xff] }
0x1067   : > { %8295 = vrsqrt.f32 %v5855_v59  ;;  %v5852_v28 = vadd.f32 1e-05, %v5820_v62  ;;  %v5822_v43 = vsub.f32 %v5790_v54, %v5806_v29  ;;  %7820 = vmatprep.subr.mxu1 %v5938_v47  ;;  %v5891_v21 = vmul.f32 %v8288_v5, %v5843_v53 }
0x1068   : > { %v5745_v17 = vpop.xlane.xlu1 %5744  ;;  %7821 = vmatpush3.msra.mxu1 %v5938_v47  ;;  %v8290_v25 = vpop.eup %8289  ;;  %v5841_v16 = vsub.f32 %v11045_v14, %v11157_v55  ;;  %v5934_v34 = vadd.f32 %v11192_v27, %v5914_v32  ;;  %v5912_v30 = vmul.f32 %v11180_v24, %v5892_v49  ;;  %v5933_v20 = vadd.f32 %v11192_v27, %v5913_v37 }
0x1069   : > { %v5854_v0 = vadd.f32 1e-05, %v5822_v43  ;;  %v5789_v33 = vmul.f32 0.03125, %v5745_v17  ;;  %8297 = vrsqrt.f32 %v5852_v28  ;;  %7822 = vmatprep.subr.mxu1 %v5937_v6  ;;  %v5890_v52 = vmul.f32 %v8290_v25, %v5842_v36  ;;  %v6020_v28 = vld [vmem:[%s11354_s3 + $0x20] sm:$0xff]  ;;  %v6017_v43 = vld [vmem:[%s11354_s3 + $0x8] sm:$0xff]  ;;  %v6152_v36 = vld [vmem:[%s11354_s3 + $0x30] sm:$0xff] }
0x106a   : > { %7823 = vmatpush3.msra.mxu1 %v5937_v6  ;;  %v5911_v57 = vmul.f32 %v11180_v24, %v5891_v21  ;;  %v5932_v14 = vadd.f32 %v11192_v27, %v5912_v30  ;;  %v5839_v48 = vsub.f32 %v11065_v9, %v11167_v61  ;;  %v5838_v41 = vsub.f32 %v11077_v23, %v11182_v58  ;;  %v6611_v6 = vld [vmem:[%s11356_s5 + $0x1] ss:$0 sm:$0xff] }
0x106b   : > { %8299 = vrsqrt.f32 %v5854_v0  ;;  %v5821_v3 = vsub.f32 %v5789_v33, %v5805_v50  ;;  %7824 = vmatprep.subr.mxu1 %v5936_v39  ;;  %v5910_v55 = vmul.f32 %v11180_v24, %v5890_v52  ;;  %v5836_v63 = vsub.f32 %v11095_v40, %v11175_v44  ;;  %v6154_v25 = vld [vmem:[%s11354_s3 + $0x40] sm:$0xff] }
0x106c   : > { %v8292_v11 = vpop.eup %8291  ;;  %7825 = vmatpush3.msra.mxu1 %v5936_v39  ;;  %v5931_v46 = vadd.f32 %v11192_v27, %v5911_v57  ;;  %v5837_v54 = vsub.f32 %v11085_v38, %v11203_v12 }
0x106d   : > { %v5853_v1 = vadd.f32 1e-05, %v5821_v3  ;;  %7826 = vmatprep.subr.mxu1 %v5935_v7  ;;  %v5889_v45 = vmul.f32 %v8292_v11, %v5841_v16  ;;  %v5930_v29 = vadd.f32 %v11192_v27, %v5910_v55  ;;  %v6153_v3 = vld [vmem:[%s11354_s3 + $0x38] sm:$0xff] }
0x106e   : > { %7827 = vmatpush3.msra.mxu1 %v5935_v7  ;;  %v6151_v7 = vld [vmem:[%s11354_s3 + $0x28] sm:$0xff] }
0x106f   : > { %8301 = vrsqrt.f32 %v5853_v1  ;;  %7828 = vmatprep.subr.mxu1 %v5934_v34  ;;  %v5909_v60 = vmul.f32 %v11180_v24, %v5889_v45 }
0x1070   : > { %v8294_v13 = vpop.eup %8293  ;;  %7829 = vmatpush3.msra.mxu1 %v5934_v34 }
0x1071   : > { %7830 = vmatprep.subr.mxu1 %v5933_v20  ;;  %v5888_v22 = vmul.f32 %v8294_v13, %v5840_v8  ;;  %v5929_v61 = vadd.f32 %v11192_v27, %v5909_v60 }
0x1072   : > { %7831 = vmatpush3.msra.mxu1 %v5933_v20 }
0x1073   : > { %7832 = vmatprep.subr.mxu1 %v5932_v14  ;;  %v5908_v10 = vmul.f32 %v11180_v24, %v5888_v22 }
0x1074   : > { %v8296_v31 = vpop.eup %8295  ;;  %7833 = vmatpush3.msra.mxu1 %v5932_v14 }
0x1075   : > { %v5887_v2 = vmul.f32 %v8296_v31, %v5839_v48  ;;  %7834 = vmatprep.subr.mxu1 %v5931_v46  ;;  %v5928_v62 = vadd.f32 %v11192_v27, %v5908_v10  ;;  %v6614_v31 = vld [vmem:[%s11356_s5 + $0x2] ss:$0 sm:$0xff]  ;;  %v6615_v10 = vld [vmem:[%s11356_s5 + $0x3] ss:$0 sm:$0xff] }
0x1076   : > { %v8298_v18 = vpop.eup %8297  ;;  %7835 = vmatpush3.msra.mxu1 %v5931_v46 }
0x1077   : > { %7836 = vmatprep.subr.mxu1 %v5930_v29  ;;  %v5907_v35 = vmul.f32 %v11180_v24, %v5887_v2  ;;  %v5884_v58 = vmul.f32 %v8298_v18, %v5836_v63 }
0x1078   : > { %v8300_v9 = vpop.eup %8299  ;;  %7837 = vmatpush3.msra.mxu1 %v5930_v29 }
0x1079   : > { %v5886_v59 = vmul.f32 %v8300_v9, %v5838_v41  ;;  %7838 = vmatprep.subr.mxu1 %v5929_v61  ;;  %v5927_v47 = vadd.f32 %v11192_v27, %v5907_v35  ;;  %v5904_v19 = vmul.f32 %v11180_v24, %v5884_v58 }
0x107a   : > { %7839 = vmatpush3.msra.mxu1 %v5929_v61  ;;  %v6616_v61 = vld [vmem:[%s11356_s5 + $0x4] ss:$0 sm:$0xff] }
0x107b   : > { %v5906_v23 = vmul.f32 %v11180_v24, %v5886_v59  ;;  %7840 = vmatprep.subr.mxu1 %v5928_v62  ;;  %v5924_v12 = vadd.f32 %v11192_v27, %v5904_v19 }
0x107c   : > { %v8302_v56 = vpop.eup %8301  ;;  %7841 = vmatpush3.msra.mxu1 %v5928_v62 }
0x107d   : > { %v5926_v26 = vadd.f32 %v11192_v27, %v5906_v23  ;;  %v5885_v40 = vmul.f32 %v8302_v56, %v5837_v54  ;;  %7842 = vmatprep.subr.mxu1 %v5927_v47 }
0x107e   : > { %7843 = vmatpush3.msra.mxu1 %v5927_v47 }
0x107f   : > { %v5905_v44 = vmul.f32 %v11180_v24, %v5885_v40  ;;  %7844 = vmatprep.subr.mxu1 %v5926_v26  ;;  %v6019_v24 = vld [vmem:[%s11354_s3 + $0x18] sm:$0xff] }
0x1080   : > { %7845 = vmatpush3.msra.mxu1 %v5926_v26 }
0x1081   : > { %v5925_v38 = vadd.f32 %v11192_v27, %v5905_v44  ;;  %v6018_v27 = vld [vmem:[%s11354_s3 + $0x10] sm:$0xff] }
0x1083   : > { %7846 = vmatprep.subr.mxu1 %v5925_v38 }
0x1084   : > { %7847 = vmatpush3.msra.mxu1 %v5925_v38 }
0x1085   : > { %7848 = vmatprep.subr.mxu1 %v5924_v12 }
0x1086   : > { %7849 = vmatpush3.msra.mxu1 %v5924_v12 }
0x1087   : > { %7851 = vmatmul.mubr.f32.vlgmr.msra.gmra.mxu1 %v5941_v42  ;;  %7853 = vmatprep.subr.mxu1 %v6020_v28 }
0x1088   : > { %7854 = vmatpush3.msra.mxu1 %v6020_v28 }
0x1089   : > { %7855 = vmatprep.subr.mxu1 %v6019_v24 }
0x108a   : > { %7856 = vmatpush3.msra.mxu1 %v6019_v24 }
0x108b   : > { %7857 = vmatprep.subr.mxu1 %v6018_v27 }
0x108c   : > { %7858 = vmatpush3.msra.mxu1 %v6018_v27 }
0x108d   : > { %7859 = vmatprep.subr.mxu1 %v6017_v43 }
0x108e   : > { %7860 = vmatpush3.msra.mxu1 %v6017_v43 }
0x108f   : > { %7864 = vmatprep.subr.mxu1 %v6154_v25 }
0x1147   : > { %v7852_v4 = vpop.f32.mrf.mxu1 }
0x1149   : > { %v6008_v17 = vpop.f32.mrf.mxu1 }
0x114a   : > { %7861 = vmatprep.mubr.msk.f32.mxu1 %vm521_vm1, %v6008_v17 }
0x114b   : > { %7862 = vmatmul.mubr.msk.f32.vlgmr.msra.gmra.mxu1 %vm521_vm1, %v7852_v4 }
0x114c   : > { %7865 = vmatpush3.msra.mxu1 %v6154_v25 }
0x114d   : > { %7866 = vmatprep.subr.mxu1 %v6153_v3 }
0x114e   : > { %7867 = vmatpush3.msra.mxu1 %v6153_v3 }
0x114f   : > { %7868 = vmatprep.subr.mxu1 %v6152_v36 }
0x1150   : > { %7869 = vmatpush3.msra.mxu1 %v6152_v36 }
0x1151   : > { %7870 = vmatprep.subr.mxu1 %v6151_v7 }
0x1152   : > { %7871 = vmatpush3.msra.mxu1 %v6151_v7 }
0x120b   : > { %v7863_v51 = vpop.f32.mrf.mxu1 }
0x120c   : > { %v6104_v15 = vadd.f32 %v7863_v51, %v6611_v6 }
0x120d   : > { %v6098_v5 = vpop.f32.mrf.mxu1 }
0x120e   : > { %v6099_v53 = vadd.f32 %v6611_v6, %v6098_v5  ;;  %v6112_v50 = vsel %vm521_vm1, %v6104_v15, 0.0  ;;  %v6118_v0 = vmul.f32 %v6104_v15, %v6104_v15 }
0x120f   : > { %6113 = vadd.xlane.f32.xlu0 %v6112_v50 }
0x1210   : > { %v6109_v33 = vsel %vm521_vm1, %v6099_v53, 0.0  ;;  %v6117_v39 = vmul.f32 %v6099_v53, %v6099_v53  ;;  %v6122_v32 = vsel %vm521_vm1, %v6118_v0, 0.0 }
0x1211   : > { %6110 = vadd.xlane.f32.xlu1 %v6109_v33 }
0x1212   : > { %v6119_v49 = vsel %vm521_vm1, %v6117_v39, 0.0 }
0x1213   : > { %6123 = vadd.xlane.f32.xlu0 %v6122_v32 }
0x1215   : > { %6120 = vadd.xlane.f32.xlu1 %v6119_v49 }
0x1298   : > { %v6114_v37 = vpop.xlane.xlu0 %6113 }
0x1299   : > { %v6116_v21 = vmul.f32 0.03125, %v6114_v37 }
0x129a   : > { %v6111_v11 = vpop.xlane.xlu1 %6110 }
0x129b   : > { %v6115_v1 = vmul.f32 0.03125, %v6111_v11  ;;  %v6128_v34 = vmul.f32 %v6116_v21, %v6116_v21  ;;  %v6132_v55 = vsub.f32 %v6104_v15, %v6116_v21 }
0x129c   : > { %v6124_v16 = vpop.xlane.xlu0 %6123 }
0x129d   : > { %v6126_v30 = vmul.f32 0.03125, %v6124_v16  ;;  %v6127_v13 = vmul.f32 %v6115_v1, %v6115_v1  ;;  %v6131_v48 = vsub.f32 %v6099_v53, %v6115_v1 }
0x129e   : > { %v6121_v52 = vpop.xlane.xlu1 %6120 }
0x129f   : > { %v6130_v8 = vsub.f32 %v6126_v30, %v6128_v34  ;;  %v6125_v20 = vmul.f32 0.03125, %v6121_v52 }
0x12a1   : > { %v6134_v57 = vadd.f32 1e-05, %v6130_v8  ;;  %v6129_v45 = vsub.f32 %v6125_v20, %v6127_v13 }
0x12a3   : > { %8303 = vrsqrt.f32 %v6134_v57  ;;  %v6133_v14 = vadd.f32 1e-05, %v6129_v45 }
0x12a5   : > { %8305 = vrsqrt.f32 %v6133_v14 }
0x12b0   : > { %v8304_v22 = vpop.eup %8303 }
0x12b1   : > { %v6138_v46 = vmul.f32 %v8304_v22, %v6132_v55 }
0x12b2   : > { %v8306_v60 = vpop.eup %8305 }
0x12b3   : > { %v6137_v2 = vmul.f32 %v8306_v60, %v6131_v48  ;;  %v6144_v29 = vmul.f32 %v6614_v31, %v6138_v46 }
0x12b5   : > { %v6143_v18 = vmul.f32 %v6614_v31, %v6137_v2  ;;  %v6150_v9 = vadd.f32 %v6615_v10, %v6144_v29 }
0x12b7   : > { %v6149_v41 = vadd.f32 %v6615_v10, %v6143_v18 }
0x12b9   : > { %7872 = vmatprep.mubr.msk.f32.mxu1 %vm521_vm1, %v6149_v41 }
0x12ba   : > { %7873 = vmatmul.mubr.msk.f32.vlgmr.msra.gmra.mxu1 %vm521_vm1, %v6150_v9 }
0x137a   : > { %v7874_v35 = vpop.f32.mrf.mxu1 }
0x137b   : > { %v6238_v63 = vadd.f32 %v7874_v35, %v6616_v61 }
0x137c   : > { %v6232_v59 = vpop.f32.mrf.mxu1 }
0x137d   : > { %6242 = vst [vmem:[%s272_s20 + $0x8] sm:$0xff] %v6238_v63  ;;  %v6233_v62 = vadd.f32 %v6616_v61, %v6232_v59 }
0x137f   : > { %6241 = vst [vmem:[%s272_s20] sm:$0xff] %v6233_v62 }
0x1380   : > { %8337 = shalt.err (!%p8334_p3)
}
0x1381   : > { %s8338_s23 = scalar_lea.hbm %s11309_s9, 256  ;;  %s8342_s19 = scalar_lea.hbm %s11358_s7, 1024 }
0x1382   : > { %p8339_p4 = scmp.ne.s32.totalorder %s11309_s9, %s8338_s23  ;;  %p8343_p9 = scmp.lt.s32.totalorder %s11309_s9, %s11358_s7 }
0x1383   : > { %p8344_p10 = scmp.lt.s32.totalorder %s8342_s19, %s8338_s23 }
0x1384   : > { %p8340_p7 = pnand %p8339_p4, %p8470_p5 }
0x1385   : > { %p8345_p11 = por %p8344_p10, %p8343_p9 }
0x1386   : > { %p8341_p8 = pneg %p8340_p7 }
0x1388   : > { %p8346_p12 = pnand %p8345_p11, %p8341_p8 }
0x138a   : > { %8349 = shalt.err (!%p8346_p12)
}
0x138b   : > { %s8390_s8 = smov 128   ;;  %s8391_s16 = smov 8  }
0x138c   : > { %7875 = dma.vmem_to_hbm [thread:$0]  (%p8470_p5), %s11304_s21, 256, %s11309_s9, %s11311_s13, %s8390_s8, %s8390_s8, %s8391_s16  }
0x138d PF: > { %p7881_p13 = scmp.ge.s32.totalorder %s8384_s27, 2  ;;  %s6272_s14 = sand.u32 1, %s8372_s24  }
0x138e   : > { %s6273_s28 = scalar_lea.sflag [#allocation3], %s6272_s14 }
0x138f   : > { %p7878_p0 = pnand %p7881_p13, %p8474_p6 }
0x1391   : > { %p7879_p1 = pneg %p7878_p0 }
0x1393   : > { %8367 = dma.done.wait (%p7879_p1), %s6273_s28, 256  }
0x1394   : > { %8369 = vsyncadd (%p7879_p1), %s6273_s28, 4294967040  ;;  %p17_p2 = scmp.ge.s32.totalorder %s8457_s30, 6   ;;  %s11361_s24 = smov %s8376_s25 }
0x1395   : > { %s11362_s25 = smov %s8380_s26  ;;  %s11363_s26 = smov %s8468_s10 }
0x1396   : > { %s11364_s27 = smov %s8457_s30  ;;  %19 = sbr.rel (!%p17_p2) target bundleno = 3 (0x3), region = 85 }
0x139b   :  { %6278 = vsyncpa [#allocation3], 1 }
0x139c   :  { %6280 = vsyncpa [#allocation3 + $0x1], 1 }

</bundles_post_ra>
